<compile_context>
chip_gen: v5e
topology: v5e:2x2
jax: 0.10.0
libtpu: 0.0.40
codegen_flags: <defaults>
</compile_context>

<pallas_src>
import functools
import math

import jax
import jax.numpy as jnp
from jax.experimental import pallas as pl
from jax.experimental.pallas import tpu as pltpu

_INV_SQRT2 = 0.7071067811865476
_SQRT_2_OVER_PI = 0.7978845608028654


def _gelu(x, approximate):
    if approximate:
        # tanh form -> EUP (frees the VALU slot); ~1e-3 deviation from erf.
        return 0.5 * x * (1.0 + jnp.tanh(_SQRT_2_OVER_PI * (x + 0.044715 * (x * x * x))))
    # PyTorch nn.GELU() default: exact erf form.
    return 0.5 * x * (1.0 + jax.lax.erf(x * _INV_SQRT2))


# --------------------------------------------------------------------------
# Kernel
# --------------------------------------------------------------------------
def gdfn_kernel(x_top_ref, x_cur_ref, x_bot_ref,        # (1,1,W,C), (1,TH,W,C), (1,1,W,C)
                ln_g_ref, ln_b_ref,                     # (1, C), (1, C)
                w12p_ref, b12p_ref,                     # fused pointwise (C, 2Ce), (1, 2Ce)
                w12d_ref, b12d_ref,                     # fused depthwise (3, 3, 2Ce), (1, 2Ce)
                wf_ref, bf_ref,                         # final 1x1 (Ce, C), (1, C)
                o_ref,                                  # (1, TH, W, C)
                t_ref,                                  # VMEM scratch (TH+2, W, 2Ce)
                *, inv_c, ce_split, approx_gelu):
    TH = x_cur_ref.shape[1]
    W = x_cur_ref.shape[2]
    C = x_cur_ref.shape[3]
    C2 = w12p_ref.shape[1]

    i = pl.program_id(1)
    last = pl.num_programs(1) - 1

    # ---- LayerNorm over channels (single-pass moments) for strip + halos ----
    # inv_c = 1 / real_C: padded channels are zero so they do not perturb the
    # moments, and gamma/beta padding is zero so padded xn channels stay 0.
    x_all = jnp.concatenate(
        [x_top_ref[0], x_cur_ref[0], x_bot_ref[0]], axis=0)       # (TH+2, W, C) f32
    mu = jnp.sum(x_all, axis=-1, keepdims=True) * inv_c
    ex2 = jnp.sum(x_all * x_all, axis=-1, keepdims=True) * inv_c
    xn = (x_all - mu) * jax.lax.rsqrt(ex2 - mu * mu + 1e-5)
    xn = xn * ln_g_ref[0] + ln_b_ref[0]

    # ---- ONE fused 1x1 conv (both branches) over all TH+2 rows ----
    wp = w12p_ref[...]
    rows = (TH + 2) * W
    t = jnp.dot(xn.reshape(rows, C).astype(wp.dtype), wp,
                preferred_element_type=jnp.float32) + b12p_ref[0]
    t_ref[...] = t.reshape(TH + 2, W, C2).astype(t_ref.dtype)

    # The 3x3 depthwise conv zero-pads the *post*-pointwise tensor, so halo
    # rows outside the image are zeroed (boundary strips only).
    zero_row = jnp.zeros((W, C2), t_ref.dtype)

    @pl.when(i == 0)
    def _():
        t_ref[0] = zero_row

    @pl.when(i == last)
    def _():
        t_ref[TH + 1] = zero_row

    # ---- 3x3 depthwise conv, fused over both branches ----
    wd = w12d_ref[...]                                            # (3, 3, C2) f32
    t0 = t_ref[0:TH]
    t1 = t_ref[1:TH + 1]
    t2 = t_ref[2:TH + 2]
    # Vertical taps first (halo rows make these plain row slices); products
    # promote to f32 so the 9-tap accumulation stays f32 even when t is bf16.
    s0 = t0 * wd[0, 0] + t1 * wd[1, 0] + t2 * wd[2, 0]            # left-column taps
    s1 = t0 * wd[0, 1] + t1 * wd[1, 1] + t2 * wd[2, 1]            # centre taps
    s2 = t0 * wd[0, 2] + t1 * wd[1, 2] + t2 * wd[2, 2]            # right-column taps
    # Horizontal taps: XLU sublane roll along W; the wrapped edge column is
    # zeroed with a 0/1 mask to reproduce the conv's zero padding.
    col = jax.lax.broadcasted_iota(jnp.int32, (1, W, 1), 1)
    left_ok = (col >= 1).astype(jnp.float32)                      # kill wrap at column 0
    right_ok = (col <= W - 2).astype(jnp.float32)                 # kill wrap at column W-1
    d = (s1
         + left_ok * pltpu.roll(s0, 1, axis=1)
         + right_ok * pltpu.roll(s2, W - 1, axis=1)
         + b12d_ref[0])                                           # (TH, W, C2) f32

    # ---- gating: GELU(branch1) * branch2 ----
    b1 = d[:, :, :ce_split]
    b2 = d[:, :, ce_split:]
    if approx_gelu and t_ref.dtype == jnp.bfloat16:
        # bf16 VPU/EUP gating path (v6e/v7x only): halves vreg traffic.
        b1 = b1.astype(jnp.bfloat16)
        b2 = b2.astype(jnp.bfloat16)
    g = _gelu(b1, approx_gelu) * b2

    # ---- final 1x1 conv + residual ----
    wfm = wf_ref[...]
    y = jnp.dot(g.reshape(TH * W, ce_split).astype(wfm.dtype), wfm,
                preferred_element_type=jnp.float32) + bf_ref[0]
    o_ref[0] = y.reshape(TH, W, C) + x_cur_ref[0]


# --------------------------------------------------------------------------
# Sizing helpers (generation-aware, physical-tiling aware)
# --------------------------------------------------------------------------
def _round_up(v, m):
    return -(-v // m) * m


def _tpu_vmem_capacity_bytes():
    try:
        return int(pltpu.get_tpu_info().vmem_capacity_bytes)
    except Exception:
        pass
    try:
        kind = jax.devices()[0].device_kind.lower()
        if "v5" in kind or "v6" in kind:
            return 128 * 2**20
    except Exception:
        pass
    return 64 * 2**20          # conservative (v7x-sized)


def _default_elementwise_dtype():
    """bf16 elementwise storage only on parts with bf16 VPU/EUP (v6e/v7x)."""
    try:
        kind = jax.devices()[0].device_kind.lower()
    except Exception:
        return jnp.float32
    if "v6" in kind or "v7" in kind or "7x" in kind:
        return jnp.bfloat16
    return jnp.float32          # v5e and older: no bf16 VALU/EUP


def _tiled_bytes(rows, w, ch, itemsize):
    """Buffer footprint including (8,128)/(16,128) physical tile padding."""
    sub = {2: 16, 4: 8}.get(itemsize, 8)
    return rows * _round_up(max(w, 1), sub) * _round_up(max(ch, 1), 128) * itemsize


def _strip_vmem_bytes(TH, W, C, C2, ew_item, mm_item):
    """Approximate live footprint of one grid step (scratch + temps + I/O)."""
    hs = TH + 2
    total = 0
    total += _tiled_bytes(hs, W, C2, ew_item)          # t scratch (both branches)
    total += 2 * 2 * _tiled_bytes(TH, W, C, 4)         # x_cur in + out, double-buffered
    total += 2 * 2 * _tiled_bytes(1, W, C, 4)          # top/bot halo rows, double-buffered
    total += 2 * _tiled_bytes(hs, W, C, 4)             # x_all / xn LN temporaries
    total += _tiled_bytes(hs, W, C, mm_item)           # xn cast to matmul dtype
    total += _tiled_bytes(hs, W, C2, 4)                # fused pointwise matmul result
    total += 4 * _tiled_bytes(TH, W, C2, 4)            # s0/s1/s2 + rolled taps
    total += _tiled_bytes(TH, W, C2, 4)                # d
    total += 2 * _tiled_bytes(TH, W, C2 // 2, 4)       # gating temporaries
    total += _tiled_bytes(TH, W, C, 4)                 # y
    return total


def _weights_vmem_bytes(C, C2, mm_item):
    b = 0
    b += _tiled_bytes(1, C, C2, mm_item)               # w12p
    b += _tiled_bytes(3, 3, C2, 4)                     # w12d
    b += _tiled_bytes(1, C2 // 2, C, mm_item)          # wf
    b += 2 * _tiled_bytes(1, 1, C2, 4)                 # b12p, b12d
    b += 3 * _tiled_bytes(1, 1, C, 4)                  # bf, ln gamma, ln beta
    return 2 * b                                       # double-buffered


def _choose_strip_rows(H, W, C, C2, N, ew_item, mm_item, vmem_cap):
    """Largest divisor of H fitting a generation-aware VMEM budget, preferring
    >=2 total grid steps (v7x megacore) and TH*W % 8 == 0 (sublane-aligned
    matmul reshapes)."""
    budget = max(8 << 20, int(0.35 * vmem_cap))   # ~45 MiB on 128 MiB parts, ~22 MiB on v7x
    divisors = [d for d in range(1, H + 1) if H % d == 0]
    fitting = [d for d in divisors
               if _strip_vmem_bytes(d, W, C, C2, ew_item, mm_item) <= budget]
    if not fitting:
        return 1   # TODO(synk): remainder strips instead of this perf cliff
    prefs = (lambda th: N * (H // th) >= 2 and (th * W) % 8 == 0,
             lambda th: N * (H // th) >= 2,
             lambda th: (th * W) % 8 == 0,
             lambda th: True)
    for pred in prefs:
        cands = [d for d in fitting if pred(d)]
        if cands:
            return max(cands)
    return max(fitting)


# --------------------------------------------------------------------------
# Wrappers
# --------------------------------------------------------------------------
def gdfn_forward_nhwc(x, params, *, strip_rows=None, matmul_dtype=jnp.bfloat16,
                      elementwise_dtype=None, approx_gelu=True, pad_channels=True):
    """x: (N, H, W, C) float32.
    matmul_dtype=jnp.bfloat16 (default) feeds bf16 MXU operands with f32
    accumulation; use jnp.float32 + approx_gelu=False for strict parity."""
    N, H, W, C = x.shape
    (ln_g, ln_b, w1p, b1p, w1d, b1d, w2p, b2p, w2d, b2d, wf, bf) = params
    Ce = w1p.shape[1]

    vmem_cap = _tpu_vmem_capacity_bytes()
    if elementwise_dtype is None:
        elementwise_dtype = _default_elementwise_dtype()
    ew_dtype = jnp.dtype(elementwise_dtype)
    mm_dtype = jnp.dtype(matmul_dtype)

    # ---- lane-dense channel padding (math-preserving: pads are zero) ----
    lane = 128
    C_pad = _round_up(C, lane) if pad_channels else C
    Ce_pad = _round_up(Ce, lane) if pad_channels else Ce
    C2_pad = 2 * Ce_pad

    x_p = x.astype(jnp.float32)
    if C_pad != C:
        x_p = jnp.pad(x_p, ((0, 0), (0, 0), (0, 0), (0, C_pad - C)))

    def pad2(a, r, c):
        return jnp.pad(a, ((0, r - a.shape[0]), (0, c - a.shape[1])))

    def pad_dw(wd):
        return jnp.pad(wd, ((0, 0), (0, 0), (0, Ce_pad - Ce)))

    ln_gp = pad2(ln_g, 1, C_pad).astype(jnp.float32)
    ln_bp = pad2(ln_b, 1, C_pad).astype(jnp.float32)
    # Host-side fusion: both branches share one pointwise matmul and one
    # depthwise pass over 2*Ce_pad channels (lane-aligned split at Ce_pad).
    w12p = jnp.concatenate([pad2(w1p, C_pad, Ce_pad),
                            pad2(w2p, C_pad, Ce_pad)], axis=1).astype(mm_dtype)
    b12p = jnp.concatenate([pad2(b1p, 1, Ce_pad),
                            pad2(b2p, 1, Ce_pad)], axis=1).astype(jnp.float32)
    w12d = jnp.concatenate([pad_dw(w1d), pad_dw(w2d)], axis=2).astype(jnp.float32)
    b12d = jnp.concatenate([pad2(b1d, 1, Ce_pad),
                            pad2(b2d, 1, Ce_pad)], axis=1).astype(jnp.float32)
    wfm = pad2(wf, Ce_pad, C_pad).astype(mm_dtype)
    bfm = pad2(bf, 1, C_pad).astype(jnp.float32)

    # ---- strip sizing ----
    if strip_rows is None:
        strip_rows = _choose_strip_rows(H, W, C_pad, C2_pad, N,
                                        ew_dtype.itemsize, mm_dtype.itemsize,
                                        vmem_cap)
    TH = int(strip_rows)
    if H % TH != 0:
        # TODO(synk): add a remainder strip instead of requiring divisibility.
        raise ValueError(f"strip_rows={TH} must divide H={H}")
    n_strips = H // TH

    est = (_strip_vmem_bytes(TH, W, C_pad, C2_pad,
                             ew_dtype.itemsize, mm_dtype.itemsize)
           + _weights_vmem_bytes(C_pad, C2_pad, mm_dtype.itemsize))
    vmem_limit = int(max(32 * 2**20,
                         min(int(0.75 * vmem_cap), 2 * est + (8 << 20))))

    # ---- specs ----
    def const_spec(shape):
        zeros = (0,) * len(shape)
        return pl.BlockSpec(shape, lambda n, i: zeros)

    # Vertical halo rows delivered as two extra 1-row views of the same input
    # (clamped at the image boundary; the kernel zeroes the post-pointwise
    # halo rows there).
    x_top_spec = pl.BlockSpec(
        (1, 1, W, C_pad), lambda n, i: (n, jnp.maximum(i * TH - 1, 0), 0, 0))
    x_cur_spec = pl.BlockSpec((1, TH, W, C_pad), lambda n, i: (n, i, 0, 0))
    x_bot_spec = pl.BlockSpec(
        (1, 1, W, C_pad), lambda n, i: (n, jnp.minimum((i + 1) * TH, H - 1), 0, 0))

    grid_spec = pltpu.PrefetchScalarGridSpec(
        num_scalar_prefetch=0,
        grid=(N, n_strips),
        in_specs=[
            x_top_spec, x_cur_spec, x_bot_spec,
            const_spec((1, C_pad)), const_spec((1, C_pad)),         # LN gamma, beta
            const_spec((C_pad, C2_pad)), const_spec((1, C2_pad)),   # fused pointwise
            const_spec((3, 3, C2_pad)), const_spec((1, C2_pad)),    # fused depthwise
            const_spec((Ce_pad, C_pad)), const_spec((1, C_pad)),    # final 1x1
        ],
        out_specs=pl.BlockSpec((1, TH, W, C_pad), lambda n, i: (n, i, 0, 0)),
        scratch_shapes=[pltpu.VMEM((TH + 2, W, C2_pad), ew_dtype)],
    )

    kernel_fn = functools.partial(
        gdfn_kernel,
        inv_c=1.0 / C,                 # moments over the *real* channel count
        ce_split=Ce_pad,
        approx_gelu=bool(approx_gelu))

    out = pl.pallas_call(
        kernel_fn,
        out_shape=jax.ShapeDtypeStruct((N, H, W, C_pad), jnp.float32),
        grid_spec=grid_spec,
        compiler_params=pltpu.CompilerParams(
            dimension_semantics=("parallel", "parallel"),
            vmem_limit_bytes=vmem_limit),
    )(x_p, x_p, x_p, ln_gp, ln_bp, w12p, b12p, w12d, b12d, wfm, bfm)

    return out[..., :C] if C_pad != C else out


def gdfn_forward(x_nchw, params, **kwargs):
    """PyTorch-layout entry point: (N, C, H, W) -> (N, C, H, W)."""
    x = jnp.transpose(x_nchw, (0, 2, 3, 1)).astype(jnp.float32)   # NCHW -> NHWC
    y = gdfn_forward_nhwc(x, params, **kwargs)
    return jnp.transpose(y, (0, 3, 1, 2))                         # NHWC -> NCHW


# --------------------------------------------------------------------------
# Parameters & pure-JAX reference
# --------------------------------------------------------------------------
def init_params(key, C, expansion=2):
    """Deterministic synthetic parameters (shapes implied by the module __init__)."""
    Ce = C * expansion
    ks = jax.random.split(key, 10)
    f32 = jnp.float32
    ln_g = jnp.ones((1, C), f32)
    ln_b = jnp.zeros((1, C), f32)
    w1p = 0.1 * jax.random.normal(ks[0], (C, Ce), f32)
    b1p = 0.1 * jax.random.normal(ks[1], (1, Ce), f32)
    w1d = 0.1 * jax.random.normal(ks[2], (3, 3, Ce), f32)
    b1d = 0.1 * jax.random.normal(ks[3], (1, Ce), f32)
    w2p = 0.1 * jax.random.normal(ks[4], (C, Ce), f32)
    b2p = 0.1 * jax.random.normal(ks[5], (1, Ce), f32)
    w2d = 0.1 * jax.random.normal(ks[6], (3, 3, Ce), f32)
    b2d = 0.1 * jax.random.normal(ks[7], (1, Ce), f32)
    wf  = 0.1 * jax.random.normal(ks[8], (Ce, C), f32)
    bf  = 0.1 * jax.random.normal(ks[9], (1, C), f32)
    return (ln_g, ln_b, w1p, b1p, w1d, b1d, w2p, b2p, w2d, b2d, wf, bf)


def gdfn_reference(x_nchw, params):
    """Pure-JAX reference of the same math (exact erf GELU, f32)."""
    (ln_g, ln_b, w1p, b1p, w1d, b1d, w2p, b2p, w2d, b2d, wf, bf) = params
    x = jnp.transpose(x_nchw, (0, 2, 3, 1)).astype(jnp.float32)   # NHWC
    mu = jnp.mean(x, axis=-1, keepdims=True)
    var = jnp.mean((x - mu) ** 2, axis=-1, keepdims=True)
    xn = (x - mu) / jnp.sqrt(var + 1e-5) * ln_g[0] + ln_b[0]

    def cblock(wp, bp, wd, bd):
        t = jnp.einsum("nhwc,cd->nhwd", xn, wp) + bp[0]
        tp = jnp.pad(t, ((0, 0), (1, 1), (1, 1), (0, 0)))
        H, W = x.shape[1], x.shape[2]
        acc = jnp.zeros_like(t)
        for dy in range(3):
            for dx in range(3):
                acc = acc + tp[:, dy:dy + H, dx:dx + W, :] * wd[dy, dx, :]
        return acc + bd[0]

    o1 = _gelu(cblock(w1p, b1p, w1d, b1d), False)
    o2 = cblock(w2p, b2p, w2d, b2d)
    y = jnp.einsum("nhwd,dc->nhwc", o1 * o2, wf) + bf[0] + x
    return jnp.transpose(y, (0, 3, 1, 2))


if __name__ == "__main__":
    N, C, H, W = 2, 4, 16, 16          # small shapes consistent with the module
    key = jax.random.PRNGKey(0)
    kx, kp = jax.random.split(key)
    x = jax.random.normal(kx, (N, C, H, W), jnp.float32)
    params = init_params(kp, C, expansion=2)

    ref = gdfn_reference(x, params)

    # 1) Full-precision parity path, multi-strip (exercises the vertical halo
    #    across strip boundaries).
    out_exact = jax.block_until_ready(
        gdfn_forward(x, params, strip_rows=8, matmul_dtype=jnp.float32,
                     elementwise_dtype=jnp.float32, approx_gelu=False))
    assert out_exact.shape == (N, C, H, W)
    assert jnp.allclose(out_exact, ref, atol=1e-2, rtol=1e-2)

    # 2) Fast default path: lane-padded channels, bf16 MXU operands, tanh GELU,
    #    auto strip height and elementwise dtype.
    out_fast = jax.block_until_ready(gdfn_forward(x, params))
    assert out_fast.shape == (N, C, H, W)
    assert jnp.allclose(out_fast, ref, atol=5e-2, rtol=5e-2)

    # 3) Unpadded-channel fallback path (pad_channels=False).
    out_np = jax.block_until_ready(
        gdfn_forward(x, params, pad_channels=False, matmul_dtype=jnp.float32,
                     elementwise_dtype=jnp.float32, approx_gelu=False))
    assert jnp.allclose(out_np, ref, atol=1e-2, rtol=1e-2)

    print("KERNEL_OK")
</pallas_src>

<mosaic_0001>
module attributes {stable_mosaic.version = 11 : i64} {
  func.func @gdfn_kernel(%arg0: i32, %arg1: i32, %arg2: memref<1x1x16x128xf32, #tpu.memory_space<vmem>>, %arg3: memref<1x8x16x128xf32, #tpu.memory_space<vmem>>, %arg4: memref<1x1x16x128xf32, #tpu.memory_space<vmem>>, %arg5: memref<1x128xf32, #tpu.memory_space<vmem>>, %arg6: memref<1x128xf32, #tpu.memory_space<vmem>>, %arg7: memref<128x256xf32, #tpu.memory_space<vmem>>, %arg8: memref<1x256xf32, #tpu.memory_space<vmem>>, %arg9: memref<3x3x256xf32, #tpu.memory_space<vmem>>, %arg10: memref<1x256xf32, #tpu.memory_space<vmem>>, %arg11: memref<128x128xf32, #tpu.memory_space<vmem>>, %arg12: memref<1x128xf32, #tpu.memory_space<vmem>>, %arg13: memref<1x8x16x128xf32, #tpu.memory_space<vmem>>, %arg14: memref<10x16x256xf32, #tpu.memory_space<vmem>>) attributes {dimension_semantics = [#tpu.dimension_semantics<parallel>, #tpu.dimension_semantics<parallel>], iteration_bounds = array<i64: 2, 2>, scalar_prefetch = 0 : i64, scratch_operands = 1 : i64, tpu.core_type = #tpu.core_type<tc>, window_params = [{transform_indices = @transform_0, window_bounds = array<i64: 1, 1, 16, 128>}, {transform_indices = @transform_1, window_bounds = array<i64: 1, 8, 16, 128>}, {transform_indices = @transform_2, window_bounds = array<i64: 1, 1, 16, 128>}, {pipeline_mode = #tpu.pipeline_mode<synchronous>, transform_indices = @transform_3, window_bounds = array<i64: 1, 128>}, {pipeline_mode = #tpu.pipeline_mode<synchronous>, transform_indices = @transform_4, window_bounds = array<i64: 1, 128>}, {pipeline_mode = #tpu.pipeline_mode<synchronous>, transform_indices = @transform_5, window_bounds = array<i64: 128, 256>}, {pipeline_mode = #tpu.pipeline_mode<synchronous>, transform_indices = @transform_6, window_bounds = array<i64: 1, 256>}, {pipeline_mode = #tpu.pipeline_mode<synchronous>, transform_indices = @transform_7, window_bounds = array<i64: 3, 3, 256>}, {pipeline_mode = #tpu.pipeline_mode<synchronous>, transform_indices = @transform_8, window_bounds = array<i64: 1, 256>}, {pipeline_mode = #tpu.pipeline_mode<synchronous>, transform_indices = @transform_9, window_bounds = array<i64: 128, 128>}, {pipeline_mode = #tpu.pipeline_mode<synchronous>, transform_indices = @transform_10, window_bounds = array<i64: 1, 128>}, {transform_indices = @transform_11, window_bounds = array<i64: 1, 8, 16, 128>}]} {
    %c0 = arith.constant 0 : index
    %c0_0 = arith.constant 0 : index
    %c0_1 = arith.constant 0 : index
    %c0_2 = arith.constant 0 : index
    %0 = vector.load %arg2[%c0, %c0_0, %c0_1, %c0_2] : memref<1x1x16x128xf32, #tpu.memory_space<vmem>>, vector<1x1x16x128xf32>
    %1 = vector.shape_cast %0 : vector<1x1x16x128xf32> to vector<1x16x128xf32>
    %c0_3 = arith.constant 0 : index
    %c0_4 = arith.constant 0 : index
    %c0_5 = arith.constant 0 : index
    %c0_6 = arith.constant 0 : index
    %2 = vector.load %arg3[%c0_3, %c0_4, %c0_5, %c0_6] : memref<1x8x16x128xf32, #tpu.memory_space<vmem>>, vector<1x8x16x128xf32>
    %3 = vector.shape_cast %2 : vector<1x8x16x128xf32> to vector<8x16x128xf32>
    %c0_7 = arith.constant 0 : index
    %c0_8 = arith.constant 0 : index
    %c0_9 = arith.constant 0 : index
    %c0_10 = arith.constant 0 : index
    %4 = vector.load %arg4[%c0_7, %c0_8, %c0_9, %c0_10] : memref<1x1x16x128xf32, #tpu.memory_space<vmem>>, vector<1x1x16x128xf32>
    %5 = vector.shape_cast %4 : vector<1x1x16x128xf32> to vector<1x16x128xf32>
    %6 = tpu.concatenate %1, %3, %5 in 0 : vector<1x16x128xf32>, vector<8x16x128xf32>, vector<1x16x128xf32> -> vector<10x16x128xf32>
    %cst = arith.constant dense<0.000000e+00> : vector<10x16xf32>
    %7 = vector.multi_reduction <add>, %6, %cst [2] : vector<10x16x128xf32> to vector<10x16xf32>
    %8 = vector.shape_cast %7 : vector<10x16xf32> to vector<10x16x1xf32>
    %cst_11 = arith.constant 2.500000e-01 : f32
    %9 = vector.broadcast %cst_11 : f32 to vector<10x16x1xf32>
    %10 = arith.mulf %8, %9 : vector<10x16x1xf32>
    %11 = arith.mulf %6, %6 : vector<10x16x128xf32>
    %cst_12 = arith.constant dense<0.000000e+00> : vector<10x16xf32>
    %12 = vector.multi_reduction <add>, %11, %cst_12 [2] : vector<10x16x128xf32> to vector<10x16xf32>
    %13 = vector.shape_cast %12 : vector<10x16xf32> to vector<10x16x1xf32>
    %cst_13 = arith.constant 2.500000e-01 : f32
    %14 = vector.broadcast %cst_13 : f32 to vector<10x16x1xf32>
    %15 = arith.mulf %13, %14 : vector<10x16x1xf32>
    %16 = vector.broadcast %10 : vector<10x16x1xf32> to vector<10x16x128xf32>
    %17 = arith.subf %6, %16 : vector<10x16x128xf32>
    %18 = arith.mulf %10, %10 : vector<10x16x1xf32>
    %19 = arith.subf %15, %18 : vector<10x16x1xf32>
    %cst_14 = arith.constant 9.99999974E-6 : f32
    %20 = vector.broadcast %cst_14 : f32 to vector<10x16x1xf32>
    %21 = arith.addf %19, %20 : vector<10x16x1xf32>
    %22 = math.rsqrt %21 : vector<10x16x1xf32>
    %23 = vector.broadcast %22 : vector<10x16x1xf32> to vector<10x16x128xf32>
    %24 = arith.mulf %17, %23 : vector<10x16x128xf32>
    %c0_15 = arith.constant 0 : index
    %c0_16 = arith.constant 0 : index
    %25 = vector.load %arg5[%c0_15, %c0_16] : memref<1x128xf32, #tpu.memory_space<vmem>>, vector<1x128xf32>
    %26 = vector.shape_cast %25 : vector<1x128xf32> to vector<128xf32>
    %27 = vector.shape_cast %26 : vector<128xf32> to vector<1x1x128xf32>
    %28 = vector.broadcast %27 : vector<1x1x128xf32> to vector<10x16x128xf32>
    %29 = arith.mulf %24, %28 : vector<10x16x128xf32>
    %c0_17 = arith.constant 0 : index
    %c0_18 = arith.constant 0 : index
    %30 = vector.load %arg6[%c0_17, %c0_18] : memref<1x128xf32, #tpu.memory_space<vmem>>, vector<1x128xf32>
    %31 = vector.shape_cast %30 : vector<1x128xf32> to vector<128xf32>
    %32 = vector.shape_cast %31 : vector<128xf32> to vector<1x1x128xf32>
    %33 = vector.broadcast %32 : vector<1x1x128xf32> to vector<10x16x128xf32>
    %34 = arith.addf %29, %33 : vector<10x16x128xf32>
    %c0_19 = arith.constant 0 : index
    %c0_20 = arith.constant 0 : index
    %35 = vector.load %arg7[%c0_19, %c0_20] : memref<128x256xf32, #tpu.memory_space<vmem>>, vector<128x256xf32>
    %36 = vector.shape_cast %34 : vector<10x16x128xf32> to vector<160x128xf32>
    %cst_21 = arith.constant dense<0.000000e+00> : vector<160x256xf32>
    %37 = tpu.matmul %36, %35, %cst_21 {dimension_numbers = #tpu.dot_dimension_numbers<[1], [0], [0], [1], [0, 0, 1, 1], [], []>} : vector<160x128xf32>, vector<128x256xf32>, vector<160x256xf32> -> vector<160x256xf32>
    %c0_22 = arith.constant 0 : index
    %c0_23 = arith.constant 0 : index
    %38 = vector.load %arg8[%c0_22, %c0_23] : memref<1x256xf32, #tpu.memory_space<vmem>>, vector<1x256xf32>
    %39 = vector.shape_cast %38 : vector<1x256xf32> to vector<256xf32>
    %40 = vector.shape_cast %39 : vector<256xf32> to vector<1x256xf32>
    %41 = vector.broadcast %40 : vector<1x256xf32> to vector<160x256xf32>
    %42 = arith.addf %37, %41 : vector<160x256xf32>
    %43 = vector.shape_cast %42 : vector<160x256xf32> to vector<10x16x256xf32>
    %c0_24 = arith.constant 0 : index
    %c0_25 = arith.constant 0 : index
    %c0_26 = arith.constant 0 : index
    %44 = vector.load %arg14[%c0_24, %c0_25, %c0_26] : memref<10x16x256xf32, #tpu.memory_space<vmem>>, vector<10x16x256xf32>
    tpu.vector_store %arg14[%c0_24, %c0_25, %c0_26], %43 {strides = array<i32>} : memref<10x16x256xf32, #tpu.memory_space<vmem>>, vector<10x16x256xf32>,
    %cst_27 = arith.constant 0.000000e+00 : f32
    %45 = vector.broadcast %cst_27 : f32 to vector<16x256xf32>
    %c0_i32 = arith.constant 0 : i32
    %46 = arith.cmpi eq, %arg1, %c0_i32 : i32
    %47 = arith.extui %46 : i1 to i32
    %c0_i32_28 = arith.constant 0 : i32
    %48 = arith.cmpi ne, %47, %c0_i32_28 : i32
    scf.if %48 {
      %c0_60 = arith.constant 0 : index
      %c0_61 = arith.constant 0 : index
      %c0_62 = arith.constant 0 : index
      %155 = vector.load %arg14[%c0_60, %c0_61, %c0_62] : memref<10x16x256xf32, #tpu.memory_space<vmem>>, vector<1x16x256xf32>
      %156 = vector.shape_cast %155 : vector<1x16x256xf32> to vector<16x256xf32>
      %157 = vector.shape_cast %45 : vector<16x256xf32> to vector<1x16x256xf32>
      tpu.vector_store %arg14[%c0_60, %c0_61, %c0_62], %157 {strides = array<i32>} : memref<10x16x256xf32, #tpu.memory_space<vmem>>, vector<1x16x256xf32>,
    } else {
    }
    %c1_i32 = arith.constant 1 : i32
    %49 = arith.cmpi eq, %arg1, %c1_i32 : i32
    %50 = arith.extui %49 : i1 to i32
    %c0_i32_29 = arith.constant 0 : i32
    %51 = arith.cmpi ne, %50, %c0_i32_29 : i32
    scf.if %51 {
      %c9 = arith.constant 9 : index
      %c0_60 = arith.constant 0 : index
      %c0_61 = arith.constant 0 : index
      %155 = vector.load %arg14[%c9, %c0_60, %c0_61] : memref<10x16x256xf32, #tpu.memory_space<vmem>>, vector<1x16x256xf32>
      %156 = vector.shape_cast %155 : vector<1x16x256xf32> to vector<16x256xf32>
      %157 = vector.shape_cast %45 : vector<16x256xf32> to vector<1x16x256xf32>
      tpu.vector_store %arg14[%c9, %c0_60, %c0_61], %157 {strides = array<i32>} : memref<10x16x256xf32, #tpu.memory_space<vmem>>, vector<1x16x256xf32>,
    } else {
    }
    %c0_30 = arith.constant 0 : index
    %c0_31 = arith.constant 0 : index
    %c0_32 = arith.constant 0 : index
    %52 = vector.load %arg9[%c0_30, %c0_31, %c0_32] : memref<3x3x256xf32, #tpu.memory_space<vmem>>, vector<3x3x256xf32>
    %c0_33 = arith.constant 0 : index
    %c0_34 = arith.constant 0 : index
    %c0_35 = arith.constant 0 : index
    %53 = vector.load %arg14[%c0_33, %c0_34, %c0_35] : memref<10x16x256xf32, #tpu.memory_space<vmem>>, vector<8x16x256xf32>
    %c1 = arith.constant 1 : index
    %c0_36 = arith.constant 0 : index
    %c0_37 = arith.constant 0 : index
    %54 = vector.load %arg14[%c1, %c0_36, %c0_37] : memref<10x16x256xf32, #tpu.memory_space<vmem>>, vector<8x16x256xf32>
    %c2 = arith.constant 2 : index
    %c0_38 = arith.constant 0 : index
    %c0_39 = arith.constant 0 : index
    %55 = vector.load %arg14[%c2, %c0_38, %c0_39] : memref<10x16x256xf32, #tpu.memory_space<vmem>>, vector<8x16x256xf32>
    %56 = vector.extract_strided_slice %52 {offsets = [0, 0, 0], sizes = [1, 1, 256], strides = [1, 1, 1]} : vector<3x3x256xf32> to vector<1x1x256xf32>
    %57 = vector.shape_cast %56 : vector<1x1x256xf32> to vector<256xf32>
    %58 = vector.shape_cast %57 : vector<256xf32> to vector<1x1x256xf32>
    %59 = vector.broadcast %58 : vector<1x1x256xf32> to vector<8x16x256xf32>
    %60 = arith.mulf %53, %59 : vector<8x16x256xf32>
    %61 = vector.extract_strided_slice %52 {offsets = [1, 0, 0], sizes = [1, 1, 256], strides = [1, 1, 1]} : vector<3x3x256xf32> to vector<1x1x256xf32>
    %62 = vector.shape_cast %61 : vector<1x1x256xf32> to vector<256xf32>
    %63 = vector.shape_cast %62 : vector<256xf32> to vector<1x1x256xf32>
    %64 = vector.broadcast %63 : vector<1x1x256xf32> to vector<8x16x256xf32>
    %65 = arith.mulf %54, %64 : vector<8x16x256xf32>
    %66 = arith.addf %60, %65 : vector<8x16x256xf32>
    %67 = vector.extract_strided_slice %52 {offsets = [2, 0, 0], sizes = [1, 1, 256], strides = [1, 1, 1]} : vector<3x3x256xf32> to vector<1x1x256xf32>
    %68 = vector.shape_cast %67 : vector<1x1x256xf32> to vector<256xf32>
    %69 = vector.shape_cast %68 : vector<256xf32> to vector<1x1x256xf32>
    %70 = vector.broadcast %69 : vector<1x1x256xf32> to vector<8x16x256xf32>
    %71 = arith.mulf %55, %70 : vector<8x16x256xf32>
    %72 = arith.addf %66, %71 : vector<8x16x256xf32>
    %73 = vector.extract_strided_slice %52 {offsets = [0, 1, 0], sizes = [1, 1, 256], strides = [1, 1, 1]} : vector<3x3x256xf32> to vector<1x1x256xf32>
    %74 = vector.shape_cast %73 : vector<1x1x256xf32> to vector<256xf32>
    %75 = vector.shape_cast %74 : vector<256xf32> to vector<1x1x256xf32>
    %76 = vector.broadcast %75 : vector<1x1x256xf32> to vector<8x16x256xf32>
    %77 = arith.mulf %53, %76 : vector<8x16x256xf32>
    %78 = vector.extract_strided_slice %52 {offsets = [1, 1, 0], sizes = [1, 1, 256], strides = [1, 1, 1]} : vector<3x3x256xf32> to vector<1x1x256xf32>
    %79 = vector.shape_cast %78 : vector<1x1x256xf32> to vector<256xf32>
    %80 = vector.shape_cast %79 : vector<256xf32> to vector<1x1x256xf32>
    %81 = vector.broadcast %80 : vector<1x1x256xf32> to vector<8x16x256xf32>
    %82 = arith.mulf %54, %81 : vector<8x16x256xf32>
    %83 = arith.addf %77, %82 : vector<8x16x256xf32>
    %84 = vector.extract_strided_slice %52 {offsets = [2, 1, 0], sizes = [1, 1, 256], strides = [1, 1, 1]} : vector<3x3x256xf32> to vector<1x1x256xf32>
    %85 = vector.shape_cast %84 : vector<1x1x256xf32> to vector<256xf32>
    %86 = vector.shape_cast %85 : vector<256xf32> to vector<1x1x256xf32>
    %87 = vector.broadcast %86 : vector<1x1x256xf32> to vector<8x16x256xf32>
    %88 = arith.mulf %55, %87 : vector<8x16x256xf32>
    %89 = arith.addf %83, %88 : vector<8x16x256xf32>
    %90 = vector.extract_strided_slice %52 {offsets = [0, 2, 0], sizes = [1, 1, 256], strides = [1, 1, 1]} : vector<3x3x256xf32> to vector<1x1x256xf32>
    %91 = vector.shape_cast %90 : vector<1x1x256xf32> to vector<256xf32>
    %92 = vector.shape_cast %91 : vector<256xf32> to vector<1x1x256xf32>
    %93 = vector.broadcast %92 : vector<1x1x256xf32> to vector<8x16x256xf32>
    %94 = arith.mulf %53, %93 : vector<8x16x256xf32>
    %95 = vector.extract_strided_slice %52 {offsets = [1, 2, 0], sizes = [1, 1, 256], strides = [1, 1, 1]} : vector<3x3x256xf32> to vector<1x1x256xf32>
    %96 = vector.shape_cast %95 : vector<1x1x256xf32> to vector<256xf32>
    %97 = vector.shape_cast %96 : vector<256xf32> to vector<1x1x256xf32>
    %98 = vector.broadcast %97 : vector<1x1x256xf32> to vector<8x16x256xf32>
    %99 = arith.mulf %54, %98 : vector<8x16x256xf32>
    %100 = arith.addf %94, %99 : vector<8x16x256xf32>
    %101 = vector.extract_strided_slice %52 {offsets = [2, 2, 0], sizes = [1, 1, 256], strides = [1, 1, 1]} : vector<3x3x256xf32> to vector<1x1x256xf32>
    %102 = vector.shape_cast %101 : vector<1x1x256xf32> to vector<256xf32>
    %103 = vector.shape_cast %102 : vector<256xf32> to vector<1x1x256xf32>
    %104 = vector.broadcast %103 : vector<1x1x256xf32> to vector<8x16x256xf32>
    %105 = arith.mulf %55, %104 : vector<8x16x256xf32>
    %106 = arith.addf %100, %105 : vector<8x16x256xf32>
    %107 = tpu.iota {dimensions = array<i32: 1>} : vector<1x16x1xi32>
    %c1_i32_40 = arith.constant 1 : i32
    %108 = vector.broadcast %c1_i32_40 : i32 to vector<1x16x1xi32>
    %109 = arith.cmpi sge, %107, %108 : vector<1x16x1xi32>
    %110 = arith.extui %109 : vector<1x16x1xi1> to vector<1x16x1xi32>
    %111 = arith.sitofp %110 : vector<1x16x1xi32> to vector<1x16x1xf32>
    %c14_i32 = arith.constant 14 : i32
    %112 = vector.broadcast %c14_i32 : i32 to vector<1x16x1xi32>
    %113 = arith.cmpi sle, %107, %112 : vector<1x16x1xi32>
    %114 = arith.extui %113 : vector<1x16x1xi1> to vector<1x16x1xi32>
    %115 = arith.sitofp %114 : vector<1x16x1xi32> to vector<1x16x1xf32>
    %c1_i32_41 = arith.constant 1 : i32
    %116 = tpu.dynamic_rotate %72 by %c1_i32_41 dim 1 : vector<8x16x256xf32>, i32 -> vector<8x16x256xf32>
    %117 = vector.broadcast %111 : vector<1x16x1xf32> to vector<8x16x256xf32>
    %118 = arith.mulf %117, %116 : vector<8x16x256xf32>
    %119 = arith.addf %89, %118 : vector<8x16x256xf32>
    %c15_i32 = arith.constant 15 : i32
    %120 = tpu.dynamic_rotate %106 by %c15_i32 dim 1 : vector<8x16x256xf32>, i32 -> vector<8x16x256xf32>
    %121 = vector.broadcast %115 : vector<1x16x1xf32> to vector<8x16x256xf32>
    %122 = arith.mulf %121, %120 : vector<8x16x256xf32>
    %123 = arith.addf %119, %122 : vector<8x16x256xf32>
    %c0_42 = arith.constant 0 : index
    %c0_43 = arith.constant 0 : index
    %124 = vector.load %arg10[%c0_42, %c0_43] : memref<1x256xf32, #tpu.memory_space<vmem>>, vector<1x256xf32>
    %125 = vector.shape_cast %124 : vector<1x256xf32> to vector<256xf32>
    %126 = vector.shape_cast %125 : vector<256xf32> to vector<1x1x256xf32>
    %127 = vector.broadcast %126 : vector<1x1x256xf32> to vector<8x16x256xf32>
    %128 = arith.addf %123, %127 : vector<8x16x256xf32>
    %129 = vector.extract_strided_slice %128 {offsets = [0, 0, 0], sizes = [8, 16, 128], strides = [1, 1, 1]} : vector<8x16x256xf32> to vector<8x16x128xf32>
    %130 = vector.extract_strided_slice %128 {offsets = [0, 0, 128], sizes = [8, 16, 128], strides = [1, 1, 1]} : vector<8x16x256xf32> to vector<8x16x128xf32>
    %cst_44 = arith.constant 5.000000e-01 : f32
    %131 = vector.broadcast %cst_44 : f32 to vector<8x16x128xf32>
    %132 = arith.mulf %131, %129 : vector<8x16x128xf32>
    %cst_45 = arith.constant 0.707106769 : f32
    %133 = vector.broadcast %cst_45 : f32 to vector<8x16x128xf32>
    %134 = arith.mulf %129, %133 : vector<8x16x128xf32>
    %135 = math.erf %134 : vector<8x16x128xf32>
    %cst_46 = arith.constant 1.000000e+00 : f32
    %136 = vector.broadcast %cst_46 : f32 to vector<8x16x128xf32>
    %137 = arith.addf %136, %135 : vector<8x16x128xf32>
    %138 = arith.mulf %132, %137 : vector<8x16x128xf32>
    %139 = arith.mulf %138, %130 : vector<8x16x128xf32>
    %c0_47 = arith.constant 0 : index
    %c0_48 = arith.constant 0 : index
    %140 = vector.load %arg11[%c0_47, %c0_48] : memref<128x128xf32, #tpu.memory_space<vmem>>, vector<128x128xf32>
    %141 = vector.shape_cast %139 : vector<8x16x128xf32> to vector<128x128xf32>
    %cst_49 = arith.constant dense<0.000000e+00> : vector<128x128xf32>
    %142 = tpu.matmul %141, %140, %cst_49 {dimension_numbers = #tpu.dot_dimension_numbers<[1], [0], [0], [1], [0, 0, 1, 1], [], []>} : vector<128x128xf32>, vector<128x128xf32>, vector<128x128xf32> -> vector<128x128xf32>
    %c0_50 = arith.constant 0 : index
    %c0_51 = arith.constant 0 : index
    %143 = vector.load %arg12[%c0_50, %c0_51] : memref<1x128xf32, #tpu.memory_space<vmem>>, vector<1x128xf32>
    %144 = vector.shape_cast %143 : vector<1x128xf32> to vector<128xf32>
    %145 = vector.shape_cast %144 : vector<128xf32> to vector<1x128xf32>
    %146 = vector.broadcast %145 : vector<1x128xf32> to vector<128x128xf32>
    %147 = arith.addf %142, %146 : vector<128x128xf32>
    %148 = vector.shape_cast %147 : vector<128x128xf32> to vector<8x16x128xf32>
    %c0_52 = arith.constant 0 : index
    %c0_53 = arith.constant 0 : index
    %c0_54 = arith.constant 0 : index
    %c0_55 = arith.constant 0 : index
    %149 = vector.load %arg3[%c0_52, %c0_53, %c0_54, %c0_55] : memref<1x8x16x128xf32, #tpu.memory_space<vmem>>, vector<1x8x16x128xf32>
    %150 = vector.shape_cast %149 : vector<1x8x16x128xf32> to vector<8x16x128xf32>
    %151 = arith.addf %148, %150 : vector<8x16x128xf32>
    %c0_56 = arith.constant 0 : index
    %c0_57 = arith.constant 0 : index
    %c0_58 = arith.constant 0 : index
    %c0_59 = arith.constant 0 : index
    %152 = vector.load %arg13[%c0_56, %c0_57, %c0_58, %c0_59] : memref<1x8x16x128xf32, #tpu.memory_space<vmem>>, vector<1x8x16x128xf32>
    %153 = vector.shape_cast %152 : vector<1x8x16x128xf32> to vector<8x16x128xf32>
    %154 = vector.shape_cast %151 : vector<8x16x128xf32> to vector<1x8x16x128xf32>
    tpu.vector_store %arg13[%c0_56, %c0_57, %c0_58, %c0_59], %154 {strides = array<i32>} : memref<1x8x16x128xf32, #tpu.memory_space<vmem>>, vector<1x8x16x128xf32>,
    return
  }
  func.func @transform_0(%arg0: i32, %arg1: i32) -> (i32, i32, i32, i32) {
    %c8_i32 = arith.constant 8 : i32
    %0 = arith.muli %arg1, %c8_i32 : i32
    %c1_i32 = arith.constant 1 : i32
    %1 = arith.subi %0, %c1_i32 : i32
    %c0_i32 = arith.constant 0 : i32
    %2 = arith.maxsi %1, %c0_i32 : i32
    %c0_i32_0 = arith.constant 0 : i32
    %c0_i32_1 = arith.constant 0 : i32
    %c0_i32_2 = arith.constant 0 : i32
    return %arg0, %2, %c0_i32_0, %c0_i32_1 : i32, i32, i32, i32
  }
  func.func @transform_1(%arg0: i32, %arg1: i32) -> (i32, i32, i32, i32) {
    %c0_i32 = arith.constant 0 : i32
    %c0_i32_0 = arith.constant 0 : i32
    %c0_i32_1 = arith.constant 0 : i32
    return %arg0, %arg1, %c0_i32, %c0_i32_0 : i32, i32, i32, i32
  }
  func.func @transform_2(%arg0: i32, %arg1: i32) -> (i32, i32, i32, i32) {
    %c1_i32 = arith.constant 1 : i32
    %0 = arith.addi %arg1, %c1_i32 : i32
    %c8_i32 = arith.constant 8 : i32
    %1 = arith.muli %0, %c8_i32 : i32
    %c15_i32 = arith.constant 15 : i32
    %2 = arith.minsi %1, %c15_i32 : i32
    %c0_i32 = arith.constant 0 : i32
    %c0_i32_0 = arith.constant 0 : i32
    %c0_i32_1 = arith.constant 0 : i32
    return %arg0, %2, %c0_i32, %c0_i32_0 : i32, i32, i32, i32
  }
  func.func @transform_3(%arg0: i32, %arg1: i32) -> (i32, i32) {
    %c0_i32 = arith.constant 0 : i32
    %c0_i32_0 = arith.constant 0 : i32
    %c0_i32_1 = arith.constant 0 : i32
    return %c0_i32, %c0_i32_0 : i32, i32
  }
  func.func @transform_4(%arg0: i32, %arg1: i32) -> (i32, i32) {
    %c0_i32 = arith.constant 0 : i32
    %c0_i32_0 = arith.constant 0 : i32
    %c0_i32_1 = arith.constant 0 : i32
    return %c0_i32, %c0_i32_0 : i32, i32
  }
  func.func @transform_5(%arg0: i32, %arg1: i32) -> (i32, i32) {
    %c0_i32 = arith.constant 0 : i32
    %c0_i32_0 = arith.constant 0 : i32
    %c0_i32_1 = arith.constant 0 : i32
    return %c0_i32, %c0_i32_0 : i32, i32
  }
  func.func @transform_6(%arg0: i32, %arg1: i32) -> (i32, i32) {
    %c0_i32 = arith.constant 0 : i32
    %c0_i32_0 = arith.constant 0 : i32
    %c0_i32_1 = arith.constant 0 : i32
    return %c0_i32, %c0_i32_0 : i32, i32
  }
  func.func @transform_7(%arg0: i32, %arg1: i32) -> (i32, i32, i32) {
    %c0_i32 = arith.constant 0 : i32
    %c0_i32_0 = arith.constant 0 : i32
    %c0_i32_1 = arith.constant 0 : i32
    %c0_i32_2 = arith.constant 0 : i32
    return %c0_i32, %c0_i32_0, %c0_i32_1 : i32, i32, i32
  }
  func.func @transform_8(%arg0: i32, %arg1: i32) -> (i32, i32) {
    %c0_i32 = arith.constant 0 : i32
    %c0_i32_0 = arith.constant 0 : i32
    %c0_i32_1 = arith.constant 0 : i32
    return %c0_i32, %c0_i32_0 : i32, i32
  }
  func.func @transform_9(%arg0: i32, %arg1: i32) -> (i32, i32) {
    %c0_i32 = arith.constant 0 : i32
    %c0_i32_0 = arith.constant 0 : i32
    %c0_i32_1 = arith.constant 0 : i32
    return %c0_i32, %c0_i32_0 : i32, i32
  }
  func.func @transform_10(%arg0: i32, %arg1: i32) -> (i32, i32) {
    %c0_i32 = arith.constant 0 : i32
    %c0_i32_0 = arith.constant 0 : i32
    %c0_i32_1 = arith.constant 0 : i32
    return %c0_i32, %c0_i32_0 : i32, i32
  }
  func.func @transform_11(%arg0: i32, %arg1: i32) -> (i32, i32, i32, i32) {
    %c0_i32 = arith.constant 0 : i32
    %c0_i32_0 = arith.constant 0 : i32
    %c0_i32_1 = arith.constant 0 : i32
    return %arg0, %arg1, %c0_i32, %c0_i32_0 : i32, i32, i32, i32
  }
}

</mosaic_0001>

<bundles_post_ra>
// kernel: tpu_custom_call.1
= control target key start
LH: loop header
LB: loop body
LE: loop exit
PB: predicated region body
PF: predicated region fallthrough
CT: control target
= control target key end

     0   :  { %s7264_s0 = inlined_call_operand.hbm [shape: f32[2,16,16,128], index: 0, kind: input, shape index: {}]   ;;  %s7265_s1 = inlined_call_operand.hbm [shape: f32[2,16,16,128], index: 1, kind: input, shape index: {}]   ;;  %s7266_s2 = inlined_call_operand.hbm [shape: f32[2,16,16,128], index: 2, kind: input, shape index: {}]   ;;  %s7267_s3 = inlined_call_operand.hbm [shape: f32[1,128], index: 3, kind: input, shape index: {}]   ;;  %s7268_s4 = inlined_call_operand.hbm [shape: f32[1,128], index: 4, kind: input, shape index: {}]   ;;  %s7269_s5 = inlined_call_operand.hbm [shape: f32[128,256], index: 5, kind: input, shape index: {}]   ;;  %s7270_s6 = inlined_call_operand.vmem [shape: f32[1,256], index: 6, kind: input, shape index: {}]   ;;  %s7271_s7 = inlined_call_operand.hbm [shape: f32[3,3,256], index: 7, kind: input, shape index: {}]   ;;  %s7272_s8 = inlined_call_operand.vmem [shape: f32[1,256], index: 8, kind: input, shape index: {}]   ;;  %s7273_s9 = inlined_call_operand.hbm [shape: f32[128,128], index: 9, kind: input, shape index: {}]   ;;  %s7274_s10 = inlined_call_operand.vmem [shape: f32[1,128], index: 10, kind: input, shape index: {}]   ;;  %s7275_s11 = inlined_call_operand.hbm [shape: f32[2,16,16,128], index: 11, kind: output, shape index: {}]  }
   0x1   :  { %7379 = sst [smem:[#allocation58_spill]] %s7264_s0 }
   0x2   :  { %7380 = sst [smem:[#allocation59_spill]] %s7265_s1 }
   0x3   :  { %7381 = sst [smem:[#allocation60_spill]] %s7266_s2 }
   0x4   :  { %7382 = sst [smem:[#allocation61_spill]] %s7267_s3 }
   0x5   :  { %7383 = sst [smem:[#allocation62_spill]] %s7268_s4 }
   0x6   :  { %7384 = sst [smem:[#allocation63_spill]] %s7269_s5 }
   0x7   :  { %7385 = sst [smem:[#allocation64_spill]] %s7270_s6 }
   0x8   :  { %7386 = sst [smem:[#allocation65_spill]] %s7271_s7 }
   0x9   :  { %7387 = sst [smem:[#allocation66_spill]] %s7272_s8 }
   0xa   :  { %7388 = sst [smem:[#allocation67_spill]] %s7273_s9 }
   0xb   :  { %7389 = sst [smem:[#allocation68_spill]] %s7274_s10 }
   0xc   :  { %7390 = sst [smem:[#allocation69_spill]] %s7275_s11 }
   0xd   :  { %16 = vsyncpa [#allocation4], 0 }
   0xe   :  { %18 = vsyncpa [#allocation4 + $0x1], 0 }
   0xf   :  { %19 = vsyncpa [#allocation7], 0 }
  0x10   :  { %21 = vsyncpa [#allocation7 + $0x1], 0 }
  0x11   :  { %22 = vsyncpa [#allocation10], 0 }
  0x12   :  { %23 = vsyncpa [#allocation13], 0 }
  0x13   :  { %24 = vsyncpa [#allocation16], 0 }
  0x14   :  { %25 = vsyncpa [#allocation5], 0 }
  0x15   :  { %27 = vsyncpa [#allocation5 + $0x1], 0  ;;  %s4280_s17 = smov 0   ;;  %s4282_s18 = smov 0  }
  0x16   :  { %s4284_s19 = smov 0   ;;  %s4286_s20 = smov 0  }
  0x17   :  { %s4288_s21 = smov 0   ;;  %s4290_s22 = smov 0  }
  0x18   :  { %s4292_s23 = smov 0   ;;  %s4294_s24 = smov 0  }
  0x19   :  { %s4296_s25 = smov 0   ;;  %s4298_s26 = smov 0  }
  0x1a   :  { %s4300_s27 = smov 0   ;;  %s4302_s28 = smov 0  }
  0x1b   :  { %s4304_s29 = smov 0   ;;  %s4306_s30 = smov 0  }
  0x1c LB: > { %7391 = sst [smem:[#allocation25_spill]] %s4152_s17  ;;  %s4351_s12 = sadd.s32 4294967295, %s4204_s30   ;;  %s4204_s30 = sphi %s4306_s30, %s33_s30   ;;  %s4200_s29 = sphi %s4304_s29, %s7639_s29   ;;  %s4196_s28 = sphi %s4302_s28, %s7638_s28   ;;  %s4192_s27 = sphi %s4300_s27, %s7627_s27   ;;  %s4188_s26 = sphi %s4298_s26, %s7637_s26   ;;  %s4184_s25 = sphi %s4296_s25, %s7636_s25   ;;  %s4180_s24 = sphi %s4294_s24, %s7635_s24   ;;  %s4176_s23 = sphi %s4292_s23, %s7634_s23   ;;  %s4172_s22 = sphi %s4290_s22, %s7633_s22   ;;  %s4168_s21 = sphi %s4288_s21, %s7632_s21   ;;  %s4164_s20 = sphi %s4286_s20, %s7631_s20   ;;  %s4160_s19 = sphi %s4284_s19, %s7630_s19   ;;  %s4156_s18 = sphi %s4282_s18, %s7624_s18   ;;  %s4152_s17 = sphi %s4280_s17, %s7623_s17  }
  0x1d   : > { %7392 = sst [smem:[#allocation26_spill]] %s4156_s18  ;;  %p3401_p0 = scmp.ge.s32.totalorder %s4204_s30, 1 }
  0x1e   : > { %7393 = sst [smem:[#allocation27_spill]] %s4160_s19  ;;  %p76_p1 = scmp.eq.s32.totalorder %s4351_s12, 0 }
  0x1f   : > { %7394 = sst [smem:[#allocation28_spill]] %s4164_s20  ;;  %p346_p2 = scmp.lt.s32.totalorder %s4204_s30, 5 }
  0x20   : > { %7395 = sst [smem:[#allocation29_spill]] %s4168_s21  ;;  %s4206_s11 = smov [#allocation9]  }
  0x21   : > { %7396 = sst [smem:[#allocation30_spill]] %s4188_s26  ;;  %p4359_p3 = pnand %p3401_p0, %p346_p2 }
  0x22   : > { %7397 = sst [smem:[#allocation31_spill]] %s4192_s27  ;;  %s360_s27 = sshll.u32 %s4206_s11, 4  ;;  %s361_s27 = int_to_ptr.vmem [resolvable:$true] %s360_s27 }
  0x23   : > { %7398 = sst [smem:[#allocation32_spill]] %s4200_s29  ;;  %p3545_p4 = pneg %p4359_p3 }
  0x24   : > { %s7399_s3 = sld [smem:[#allocation61_spill]]  ;;  %s4208_s8 = smov 256  }
  0x25   : > { %s7400_s16 = scalar_select %p4359_p3, 1, 0 }
  0x26   : > { %s7402_s5 = sld [smem:[#allocation63_spill]]  ;;  %p4370_p5 = pnand %p3545_p4, %p76_p1 }
  0x27   : > { %7401 = sst [smem:[#allocation33_spill]] %s7400_s16  ;;  %s4209_s10 = smov 16  }
  0x28   : > { %s42_s26 = sadd.s32 1, %s4196_s28  ;;  %s45_s6 = sadd.s32 1, %s4200_s29 }
  0x29   : > { %p43_p6 = scmp.ge.s32.totalorder %s42_s26, 2  ;;  %p70_p7 = scmp.eq.s32.totalorder %s4204_s30, 0 }
  0x2a   : > { %s358_s15 = sshll.u32 %s7399_s3, 4  ;;  %s4207_s3 = smov [#allocation12]   ;;  %s359_s15 = int_to_ptr.hbm [resolvable:$true] %s358_s15 }
  0x2b   : > { %s383_s11 = sshll.u32 %s4207_s3, 4  ;;  %s90_s16 = sadd.s32 1, %s4172_s22  ;;  %s384_s11 = int_to_ptr.vmem [resolvable:$true] %s383_s11 }
  0x2c   : > { %s381_s13 = sshll.u32 %s7402_s5, 4  ;;  %s3394_s5 = sadd.s32 4294967294, %s4204_s30   ;;  %s382_s13 = int_to_ptr.hbm [resolvable:$true] %s381_s13 }
  0x2d   : > { %3548 = dma.hbm_to_vmem [thread:$0]  (!%p4370_p5), %s359_s15, 16, %s361_s27, [#allocation10]  }
  0x2e   : > { %3554 = dma.hbm_to_vmem [thread:$0]  (!%p4370_p5), %s382_s13, 4096, %s384_s11, [#allocation13], %s4208_s8, %s4208_s8, %s4209_s10  }
  0x2f   : > { %s7641_s26 = smov (%p43_p6, %s42_s26), 0  ;;  %s7643_s6 = smov (!%p43_p6, %s45_s6), %s4200_s29 }
  0x30   : > { %7404 = sst [smem:[#allocation34_spill]] %s7641_s26  ;;  %s86_s3 = ssub.s32 %s4196_s28, %s7641_s26 }
  0x31   : > { %p97_p8 = scmp.ne.s32.totalorder %s4172_s22, %s4168_s21  ;;  %p47_p9 = scmp.ge.s32.totalorder %s7643_s6, 2 }
  0x32   : > { %p103_p10 = scmp.ne.s32.totalorder %s4168_s21, %s4164_s20  ;;  %p333_p12 = scmp.eq.s32.totalorder %s4351_s12, 3 }
  0x33   : > { %p4394_p11 = por %p97_p8, %p70_p7  ;;  %s7645_s6 = smov (%p47_p9, %s7643_s6), 0 }
  0x34   : > { %7406 = sst [smem:[#allocation35_spill]] %s7645_s6  ;;  %p4403_p13 = por %p103_p10, %p76_p1 }
  0x35   : > { %p4407_p0 = por %p333_p12, %p97_p8  ;;  %s4413_s11 = ssub.s32 %s4200_s29, %s7645_s6 }
  0x36   : > { %s7407_s15 = scalar_select %p4403_p13, 1, 0 }
  0x37   : > { %s7409_s13 = scalar_select %p4407_p0, 1, 0 }
  0x38   : > { %7408 = sst [smem:[#allocation36_spill]] %s7407_s15  ;;  %p339_p2 = scmp.eq.s32.totalorder %s3394_s5, 3 }
  0x39   : > { %7410 = sst [smem:[#allocation37_spill]] %s7409_s13  ;;  %s87_s8 = sor.u32 %s86_s3, %s4413_s11 }
  0x3a   : > { %p88_p4 = scmp.eq.s32.totalorder %s87_s8, 0  ;;  %p4416_p6 = por %p339_p2, %p103_p10 }
  0x3b   : > { %p7295_p9 = scmp.lt.s32.totalorder %s4204_s30, 4  ;;  %s4425_s15 = sshll.u32 %s4200_s29, 5 }
  0x3c   : > { %s7411_s10 = scalar_select %p4416_p6, 1, 0 }
  0x3d   : > { %s4422_s20 = scalar_select %p88_p4, %s4172_s22, %s90_s16  }
  0x3e   : > { %7412 = sst [smem:[#allocation38_spill]] %s7411_s10  ;;  %s462_s21 = sand.u32 1, %s4204_s30  }
  0x3f   : > { %s464_s13 = sand.u32 1, %s4172_s22   ;;  %s3465_s2 = sshll.u32 %s4196_s28, 4 }
  0x40   : > { %s3414_s6 = sshll.u32 %s464_s13, 7  ;;  %s472_s0 = sadd.s32 %s3465_s2, %s4425_s15 }
  0x41   : > { %s3418_s5 = sshll.u32 %s472_s0, 3  ;;  %s466_s3 = scalar_lea.vmem [#allocation6], %s3414_s6 }
  0x42   : > { %s477_s8 = sshll.u32 %s466_s3, 4  ;;  %s7413_s1 = sld [smem:[#allocation59_spill]]  ;;  %s478_s8 = int_to_ptr.vmem [resolvable:$true] %s477_s8 }
  0x43   : > { %p3565_p8 = pnand %p7295_p9, %p4394_p11  ;;  %s7414_s4 = sld [smem:[#allocation62_spill]] }
  0x44   : > { %s4441_s0 = scalar_lea.sflag [#allocation7], %s462_s21  ;;  %s7290_s2 = smov 128  }
  0x45   : > { %s7292_s6 = smov 8   ;;  %s7415_s7 = sld [smem:[#allocation65_spill]] }
  0x46   : > { %s4212_s27 = smov [#allocation11]   ;;  %s4213_s21 = smov [#allocation14]  }
  0x47   : > { %s372_s29 = sshll.u32 %s4212_s27, 4  ;;  %s7416_s9 = sld [smem:[#allocation67_spill]]  ;;  %s373_s29 = int_to_ptr.vmem [resolvable:$true] %s372_s29 }
  0x48   : > { %s474_s19 = scalar_lea.hbm %s7413_s1, %s3418_s5  ;;  %s400_s5 = sshll.u32 %s4213_s21, 4  ;;  %s401_s5 = int_to_ptr.vmem [resolvable:$true] %s400_s5 }
  0x49   : > { %s475_s10 = sshll.u32 %s474_s19, 4  ;;  %s370_s13 = sshll.u32 %s7414_s4, 4  ;;  %s476_s10 = int_to_ptr.hbm [resolvable:$true] %s475_s10  ;;  %s371_s13 = int_to_ptr.hbm [resolvable:$true] %s370_s13 }
  0x4a   : > { %3567 = dma.hbm_to_vmem [thread:$0]  (!%p3565_p8), %s476_s10, 2048, %s478_s8, %s4441_s0, %s7290_s2, %s7290_s2, %s7292_s6  }
  0x4b   : > { %s398_s19 = sshll.u32 %s7415_s7, 4  ;;  %s4214_s8 = smov [#allocation15]   ;;  %s399_s19 = int_to_ptr.hbm [resolvable:$true] %s398_s19 }
  0x4c   : > { %3551 = dma.hbm_to_vmem [thread:$0]  (!%p4370_p5), %s371_s13, 16, %s373_s29, [#allocation10]  }
  0x4d   : > { %s415_s10 = sshll.u32 %s7416_s9, 4  ;;  %s417_s13 = sshll.u32 %s4214_s8, 4  ;;  %s416_s10 = int_to_ptr.hbm [resolvable:$true] %s415_s10  ;;  %s418_s13 = int_to_ptr.vmem [resolvable:$true] %s417_s13 }
  0x4e   : > { %3557 = dma.hbm_to_vmem [thread:$0]  (!%p4370_p5), %s399_s19, 384, %s401_s5, [#allocation13], %s7290_s2, %s7290_s2, %s7292_s6  }
  0x4f   : > { %3560 = dma.hbm_to_vmem [thread:$0]  (!%p4370_p5), %s416_s10, 2048, %s418_s13, [#allocation16], %s7290_s2, %s7290_s2, %s7292_s6  }
  0x50   : > { %s3395_s17 = sshll.u32 %s4196_s28, 3  ;;  %s3397_s27 = sshll.u32 %s7641_s26, 3 }
  0x51   : > { %s3396_s18 = sadd.s32 4294967295, %s3395_s17  ;;  %s3398_s29 = sadd.s32 4294967295, %s3397_s27 }
  0x52   : > { %p51_p10 = scmp.gt.s32.totalorder %s3396_s18, 0  ;;  %p55_p11 = scmp.gt.s32.totalorder %s3398_s29, 0 }
  0x53   : > { %s62_s19 = sadd.s32 1, %s4184_s25  ;;  %p69_p12 = scmp.ne.s32.totalorder %s4184_s25, %s4180_s24 }
  0x54   : > { %s7647_s18 = smov (!%p51_p10, %s3396_s18), 0  ;;  %s7649_s29 = smov (!%p55_p11, %s3398_s29), 0 }
  0x55   : > { %p75_p2 = scmp.ne.s32.totalorder %s4180_s24, %s4176_s23  ;;  %s58_s14 = ssub.s32 %s7647_s18, %s7649_s29 }
  0x56   : > { %s3462_s21 = sadd.s32 8, %s3395_s17  ;;  %s59_s5 = sor.u32 %s58_s14, %s4413_s11 }
  0x57   : > { %p4475_p5 = por %p70_p7, %p69_p12  ;;  %p60_p4 = scmp.eq.s32.totalorder %s59_s5, 0 }
  0x58   : > { %p4481_p8 = por %p76_p1, %p75_p2  ;;  %p115_p10 = scmp.lt.s32.totalorder %s3462_s21, 15 }
  0x59   : > { %s3464_s10 = sadd.s32 8, %s3397_s27  ;;  %s7419_s23 = sld [smem:[#allocation27_spill]] }
  0x5a   : > { %s4486_s8 = scalar_select %p60_p4, %s4184_s25, %s62_s19  }
  0x5b   : > { %p119_p11 = scmp.lt.s32.totalorder %s3464_s10, 15  ;;  %s434_s13 = sand.u32 1, %s4184_s25  }
  0x5c   : > { %s3408_s17 = sshll.u32 %s434_s13, 4  ;;  %s7420_s29 = sld [smem:[#allocation26_spill]] }
  0x5d   : > { %s3411_s14 = sshll.u32 %s7647_s18, 1  ;;  %s7421_s2 = sld [smem:[#allocation25_spill]] }
  0x5e   : > { %s447_s6 = sadd.s32 %s4425_s15, %s3411_s14  ;;  %s438_s5 = scalar_lea.vmem [#allocation3], %s3408_s17 }
  0x5f   : > { %s452_s1 = sshll.u32 %s438_s5, 4  ;;  %s3413_s4 = sshll.u32 %s447_s6, 3  ;;  %s453_s1 = int_to_ptr.vmem [resolvable:$true] %s452_s1 }
  0x60   : > { %s7422_s7 = sld [smem:[#allocation58_spill]]  ;;  %p3562_p12 = pnand %p7295_p9, %p4475_p5 }
  0x61   : > { %s435_s18 = scalar_lea.sflag [#allocation4], %s434_s13  ;;  %s7423_s14 = smov 8  }
  0x62   : > { %s7424_s17 = smov 128   ;;  %s126_s6 = sadd.s32 1, %s7419_s23 }
  0x63   : > { %s7651_s21 = smov (!%p115_p10, %s3462_s21), 15  ;;  %s7653_s10 = smov (!%p119_p11, %s3464_s10), 15 }
  0x64   : > { %p133_p2 = scmp.ne.s32.totalorder %s7419_s23, %s7420_s29  ;;  %p139_p4 = scmp.ne.s32.totalorder %s7420_s29, %s7421_s2 }
  0x65   : > { %s3421_s13 = sshll.u32 %s7651_s21, 1  ;;  %s7427_s19 = sld [smem:[#allocation60_spill]] }
  0x66   : > { %s449_s9 = scalar_lea.hbm %s7422_s7, %s3413_s4  ;;  %s122_s4 = ssub.s32 %s7651_s21, %s7653_s10 }
  0x67   : > { %s450_s26 = sshll.u32 %s449_s9, 4  ;;  %s489_s7 = sand.u32 1, %s7419_s23   ;;  %s451_s26 = int_to_ptr.hbm [resolvable:$true] %s450_s26 }
  0x68   : > { %3564 = dma.hbm_to_vmem [thread:$0]  (!%p3562_p12), %s451_s26, 256, %s453_s1, %s435_s18, %s7424_s17, %s7424_s17, %s7423_s14  }
  0x69   : > { %s123_s3 = sor.u32 %s122_s4, %s4413_s11  ;;  %p4511_p5 = por %p133_p2, %p70_p7 }
  0x6a   : > { %p124_p9 = scmp.eq.s32.totalorder %s123_s3, 0  ;;  %p4517_p12 = por %p139_p4, %p76_p1 }
  0x6b   : > { %s3419_s26 = sshll.u32 %s489_s7, 4  ;;  %s500_s2 = sadd.s32 %s3421_s13, %s4425_s15 }
  0x6c   : > { %s7655_s23 = smov (!%p124_p9, %s7419_s23), %s126_s6  ;;  %s3423_s10 = sshll.u32 %s500_s2, 3 }
  0x6d   : > { %s491_s11 = scalar_lea.vmem [#allocation8], %s3419_s26  ;;  %s502_s18 = scalar_lea.hbm %s7427_s19, %s3423_s10 }
  0x6e   : > { %s505_s29 = sshll.u32 %s491_s11, 4  ;;  %s503_s4 = sshll.u32 %s502_s18, 4  ;;  %s506_s29 = int_to_ptr.vmem [resolvable:$true] %s505_s29  ;;  %s504_s4 = int_to_ptr.hbm [resolvable:$true] %s503_s4 }
  0x6f   : > { %p7428_p7 = scmp.lt.s32.totalorder %s4204_s30, 4  ;;  %517 = sbr.rel (%p4359_p3) target bundleno = 1111 (0x457), region = 64 }
  0x71   : > { %p3568_p10 = pnand %p7428_p7, %p4511_p5 }
  0x73   : > { %3570 = dma.hbm_to_vmem [thread:$0]  (!%p3568_p10), %s504_s4, 256, %s506_s29, %s4441_s0, %s7424_s17, %s7424_s17, %s7423_s14  }
  0x74   : > { %s519_s15 = sand.u32 1, %s4180_s24  }
  0x75   : > { %s3425_s6 = sshll.u32 %s519_s15, 4  ;;  %s520_s7 = scalar_lea.sflag [#allocation4], %s519_s15 }
  0x76   : > { %s523_s3 = scalar_lea.vmem [#allocation3], %s3425_s6 }
  0x77   : > { %4123 = dma.done.wait (%p4481_p8), %s520_s7, 256  }
  0x78   : > { %4125 = vsyncadd (%p4481_p8), %s520_s7, 4294967040  ;;  %s7430_s9 = sld [smem:[#allocation29_spill]]  ;;  %s529_s13 = sand.u32 1, %s4351_s12  }
  0x79   : > { %s530_s17 = scalar_lea.sflag [#allocation7], %s529_s13 }
  0x7e   : > { %s531_s0 = sand.u32 1, %s7430_s9  }
  0x7f   : > { %s4547_s14 = sshll.u32 %s531_s0, 7 }
  0x80   : > { %s4550_s2 = scalar_lea.vmem [#allocation6], %s4547_s14 }
  0x81   : > { %4127 = dma.done.wait (%p4403_p13), %s530_s17, 2048  }
  0x82   : > { %4129 = vsyncadd (%p4403_p13), %s530_s17, 4294965248  ;;  %s7432_s16 = sld [smem:[#allocation26_spill]] }
  0x88   : > { %s541_s10 = sand.u32 1, %s7432_s16  }
  0x89   : > { %s4557_s11 = sshll.u32 %s541_s10, 4 }
  0x8a   : > { %s543_s29 = scalar_lea.vmem [#allocation8], %s4557_s11 }
  0x8b   : > { %4131 = dma.done.wait (%p4517_p12), %s530_s17, 256  }
  0x8c   : > { %4133 = vsyncadd (%p4517_p12), %s530_s17, 4294967040 }
  0x8d   : > { %4135 = dma.done.wait (%p76_p1), [#allocation10], 32  }
  0x8e   : > { %4137 = vsyncadd (%p76_p1), [#allocation10], 4294967264 }
  0x8f   : > { %4139 = dma.done.wait (%p76_p1), [#allocation13], 4480  }
  0x90   : > { %4141 = vsyncadd (%p76_p1), [#allocation13], 4294962816 }
  0x91   : > { %4143 = dma.done.wait (%p76_p1), [#allocation16], 2048  }
  0x92   : > { %4145 = vsyncadd (%p76_p1), [#allocation16], 4294965248  ;;  %v4576_v0 = vld [vmem:[%s523_s3 + $0x8] sm:$0xff]  ;;  %v4578_v1 = vld [vmem:[%s523_s3] sm:$0xff]  ;;  %s7451_s5 = sld [smem:[#allocation64_spill]]  ;;  %s5226_s27 = scalar_lea.vmem [#allocation17], %s4547_s14 }
  0x93   : > { %650 = vadd.xlane.f32.xlu1 %v4576_v0  ;;  %648 = vadd.xlane.f32.xlu0 %v4578_v1  ;;  %v709_v2 = vmul.f32 %v4576_v0, %v4576_v0  ;;  %v4585_v3 = vld [vmem:[%s4550_s2 + $0x60] sm:$0xff]  ;;  %v708_v4 = vmul.f32 %v4578_v1, %v4578_v1  ;;  %v4596_v7 = vld [vmem:[%s4550_s2 + $0x68] sm:$0xff]  ;;  %v4608_v11 = vld [vmem:[%s4550_s2 + $0x70] sm:$0xff]  ;;  %s7452_s19 = sld [smem:[#allocation30_spill]] }
  0x94   : > { %v722_v5 = vmul.f32 %v4585_v3, %v4585_v3  ;;  %v4593_v6 = vld [vmem:[%s4550_s2] sm:$0xff]  ;;  %v723_v9 = vmul.f32 %v4596_v7, %v4596_v7  ;;  %v4605_v10 = vld [vmem:[%s4550_s2 + $0x8] sm:$0xff]  ;;  %v724_v12 = vmul.f32 %v4608_v11, %v4608_v11  ;;  %v4617_v14 = vld [vmem:[%s4550_s2 + $0x10] sm:$0xff] }
  0x95   : > { %730 = vadd.xlane.f32.xlu2 %v709_v2  ;;  %v710_v8 = vmul.f32 %v4593_v6, %v4593_v6  ;;  %v711_v13 = vmul.f32 %v4605_v10, %v4605_v10  ;;  %v4621_v15 = vld [vmem:[%s4550_s2 + $0x78] sm:$0xff]  ;;  %v712_v16 = vmul.f32 %v4617_v14, %v4617_v14  ;;  %v4633_v19 = vld [vmem:[%s543_s29] sm:$0xff]  ;;  %v4655_v26 = vld [vmem:[%s4550_s2 + $0x28] sm:$0xff] }
  0x96   : > { %v725_v17 = vmul.f32 %v4621_v15, %v4621_v15  ;;  %v4629_v18 = vld [vmem:[%s4550_s2 + $0x18] sm:$0xff]  ;;  %v726_v21 = vmul.f32 %v4633_v19, %v4633_v19  ;;  %v4642_v22 = vld [vmem:[%s4550_s2 + $0x20] sm:$0xff]  ;;  %v4659_v27 = vld [vmem:[%s4550_s2 + $0x30] sm:$0xff]  ;;  %v715_v28 = vmul.f32 %v4655_v26, %v4655_v26 }
  0x97   : > { %v713_v20 = vmul.f32 %v4629_v18, %v4629_v18  ;;  %v4646_v23 = vld [vmem:[%s543_s29 + $0x8] sm:$0xff]  ;;  %v714_v25 = vmul.f32 %v4642_v22, %v4642_v22  ;;  %v716_v29 = vmul.f32 %v4659_v27, %v4659_v27  ;;  %v638_v32 = vld [vmem:[%s4550_s2 + $0x40] sm:$0xff]  ;;  %v640_v36 = vld [vmem:[%s4550_s2 + $0x50] sm:$0xff] }
  0x98   : > { %v727_v24 = vmul.f32 %v4646_v23, %v4646_v23  ;;  %v637_v30 = vld [vmem:[%s4550_s2 + $0x38] sm:$0xff]  ;;  %v639_v33 = vld [vmem:[%s4550_s2 + $0x48] sm:$0xff]  ;;  %v718_v34 = vmul.f32 %v638_v32, %v638_v32  ;;  %v720_v39 = vmul.f32 %v640_v36, %v640_v36 }
  0x99   : > { %v717_v31 = vmul.f32 %v637_v30, %v637_v30  ;;  %v719_v35 = vmul.f32 %v639_v33, %v639_v33  ;;  %v1166_v37 = vld [vmem:[#allocation12 + $0xf0] sm:$0xff]  ;;  %v4670_v38 = vld [vmem:[#allocation12 + $0xf8] sm:$0xff]  ;;  %v1164_v40 = vld [vmem:[#allocation12 + $0xe0] sm:$0xff]  ;;  %p3434_p1 = scmp.ne.s32.totalorder %s7452_s19, 0 }
  0x9a   : > { %1174 = vmatpush.msra.mxu0 %v1166_v37  ;;  %1251 = vmatpush.msra.mxu1 %v4670_v38  ;;  %v4673_v41 = vld [vmem:[#allocation12 + $0xe8] sm:$0xff]  ;;  %v641_v42 = vld [vmem:[%s4550_s2 + $0x58] sm:$0xff]  ;;  %v1160_v45 = vld [vmem:[#allocation12 + $0xc0] sm:$0xff] }
  0x9b   : > { %676 = vadd.xlane.f32.xlu1 %v4585_v3  ;;  %728 = vadd.xlane.f32.xlu0 %v708_v4  ;;  %v1162_v43 = vld [vmem:[#allocation12 + $0xd0] sm:$0xff]  ;;  %v4677_v44 = vld [vmem:[#allocation12 + $0xd8] sm:$0xff]  ;;  %v4680_v46 = vld [vmem:[#allocation12 + $0xc8] sm:$0xff]  ;;  %v721_v49 = vmul.f32 %v641_v42, %v641_v42 }
  0x9c   : > { %3469 = vmatpush.msra.mxu3 %v1166_v37  ;;  %1175 = vmatpush.msra.mxu0 %v1164_v40  ;;  %v1158_v47 = vld [vmem:[#allocation12 + $0xb0] sm:$0xff]  ;;  %v4683_v48 = vld [vmem:[#allocation12 + $0xb8] sm:$0xff]  ;;  %v1156_v50 = vld [vmem:[#allocation12 + $0xa0] sm:$0xff] }
  0x9d   : > { %756 = vadd.xlane.f32.xlu2 %v722_v5  ;;  %1252 = vmatpush.msra.mxu1 %v4673_v41  ;;  %v4686_v51 = vld [vmem:[#allocation12 + $0xa8] sm:$0xff]  ;;  %v1154_v52 = vld [vmem:[#allocation12 + $0x90] sm:$0xff]  ;;  %v4689_v53 = vld [vmem:[#allocation12 + $0x98] sm:$0xff] }
  0x9e   : > { %3470 = vmatpush.msra.mxu3 %v1164_v40  ;;  %1176 = vmatpush.msra.mxu0 %v1162_v43  ;;  %v1152_v54 = vld [vmem:[#allocation12 + $0x80] sm:$0xff]  ;;  %v4692_v55 = vld [vmem:[#allocation12 + $0x88] sm:$0xff]  ;;  %v1150_v56 = vld [vmem:[#allocation12 + $0x70] sm:$0xff] }
  0x9f   : > { %1253 = vmatpush.msra.mxu1 %v4677_v44  ;;  %v4695_v57 = vld [vmem:[#allocation12 + $0x78] sm:$0xff]  ;;  %v1148_v58 = vld [vmem:[#allocation12 + $0x60] sm:$0xff]  ;;  %v4698_v59 = vld [vmem:[#allocation12 + $0x68] sm:$0xff] }
  0xa0   : > { %3471 = vmatpush.msra.mxu3 %v1162_v43  ;;  %1177 = vmatpush.msra.mxu0 %v1160_v45  ;;  %v1146_v60 = vld [vmem:[#allocation12 + $0x50] sm:$0xff]  ;;  %v4701_v61 = vld [vmem:[#allocation12 + $0x58] sm:$0xff]  ;;  %v1144_v62 = vld [vmem:[#allocation12 + $0x40] sm:$0xff] }
  0xa1   : > { %1254 = vmatpush.msra.mxu1 %v4680_v46  ;;  %v4704_v63 = vld [vmem:[#allocation12 + $0x48] sm:$0xff]  ;;  %v1142_v5 = vld [vmem:[#allocation12 + $0x30] sm:$0xff] }
  0xa2   : > { %3472 = vmatpush.msra.mxu3 %v1160_v45  ;;  %1178 = vmatpush.msra.mxu0 %v1158_v47 }
  0xa3   : > { %678 = vadd.xlane.f32.xlu1 %v4596_v7  ;;  %652 = vadd.xlane.f32.xlu0 %v4593_v6 }
  0xa4   : > { %1255 = vmatpush.msra.mxu1 %v4683_v48  ;;  %3473 = vmatpush.msra.mxu3 %v1158_v47 }
  0xa5   : > { %732 = vadd.xlane.f32.xlu2 %v710_v8  ;;  %1179 = vmatpush.msra.mxu0 %v1156_v50  ;;  %v4707_v8 = vld [vmem:[#allocation12 + $0x38] sm:$0xff] }
  0xa6   : > { %1256 = vmatpush.msra.mxu1 %v4686_v51  ;;  %3474 = vmatpush.msra.mxu3 %v1156_v50 }
  0xa7   : > { %1180 = vmatpush.msra.mxu0 %v1154_v52 }
  0xa8   : > { %1257 = vmatpush.msra.mxu1 %v4689_v53  ;;  %3475 = vmatpush.msra.mxu3 %v1154_v52 }
  0xa9   : > { %1181 = vmatpush.msra.mxu0 %v1152_v54 }
  0xaa   : > { %1258 = vmatpush.msra.mxu1 %v4692_v55  ;;  %3476 = vmatpush.msra.mxu3 %v1152_v54 }
  0xab   : > { %654 = vadd.xlane.f32.xlu1 %v4605_v10  ;;  %758 = vadd.xlane.f32.xlu0 %v723_v9 }
  0xac   : > { %1182 = vmatpush.msra.mxu0 %v1150_v56  ;;  %1259 = vmatpush.msra.mxu1 %v4695_v57 }
  0xad   : > { %680 = vadd.xlane.f32.xlu2 %v4608_v11  ;;  %3477 = vmatpush.msra.mxu3 %v1150_v56 }
  0xae   : > { %1183 = vmatpush.msra.mxu0 %v1148_v58  ;;  %1260 = vmatpush.msra.mxu1 %v4698_v59 }
  0xaf   : > { %3478 = vmatpush.msra.mxu3 %v1148_v58 }
  0xb0   : > { %1184 = vmatpush.msra.mxu0 %v1146_v60  ;;  %1261 = vmatpush.msra.mxu1 %v4701_v61 }
  0xb1   : > { %3479 = vmatpush.msra.mxu3 %v1146_v60 }
  0xb2   : > { %1185 = vmatpush.msra.mxu0 %v1144_v62  ;;  %1262 = vmatpush.msra.mxu1 %v4704_v63 }
  0xb3   : > { %760 = vadd.xlane.f32.xlu1 %v724_v12  ;;  %734 = vadd.xlane.f32.xlu0 %v711_v13  ;;  %v1140_v13 = vld [vmem:[#allocation12 + $0x20] sm:$0xff] }
  0xb4   : > { %3480 = vmatpush.msra.mxu3 %v1144_v62  ;;  %1186 = vmatpush.msra.mxu0 %v1142_v5 }
  0xb5   : > { %656 = vadd.xlane.f32.xlu2 %v4617_v14  ;;  %1263 = vmatpush.msra.mxu1 %v4707_v8 }
  0xb6   : > { %3481 = vmatpush.msra.mxu3 %v1142_v5  ;;  %1187 = vmatpush.msra.mxu0 %v1140_v13 }
  0xb8   : > { %3482 = vmatpush.msra.mxu3 %v1140_v13 }
  0xbb   : > { %736 = vadd.xlane.f32.xlu1 %v712_v16  ;;  %682 = vadd.xlane.f32.xlu0 %v4621_v15  ;;  %v4712_v16 = vld [vmem:[#allocation12 + $0x28] sm:$0xff] }
  0xbc   : > { %1264 = vmatpush.msra.mxu1 %v4712_v16 }
  0xbd   : > { %762 = vadd.xlane.f32.xlu2 %v725_v17 }
  0xc3   : > { %684 = vadd.xlane.f32.xlu1 %v4633_v19  ;;  %658 = vadd.xlane.f32.xlu0 %v4629_v18 }
  0xc5   : > { %738 = vadd.xlane.f32.xlu2 %v713_v20 }
  0xcb   : > { %660 = vadd.xlane.f32.xlu1 %v4642_v22  ;;  %764 = vadd.xlane.f32.xlu0 %v726_v21  ;;  %v1138_v21 = vld [vmem:[#allocation12 + $0x10] sm:$0xff] }
  0xcc   : > { %1188 = vmatpush.msra.mxu0 %v1138_v21  ;;  %3483 = vmatpush.msra.mxu3 %v1138_v21 }
  0xcd   : > { %686 = vadd.xlane.f32.xlu2 %v4646_v23 }
  0xd3   : > { %766 = vadd.xlane.f32.xlu1 %v727_v24  ;;  %740 = vadd.xlane.f32.xlu0 %v714_v25  ;;  %v4717_v24 = vld [vmem:[#allocation12 + $0x18] sm:$0xff] }
  0xd4   : > { %1265 = vmatpush.msra.mxu1 %v4717_v24 }
  0xd5   : > { %662 = vadd.xlane.f32.xlu2 %v4655_v26 }
  0xdb   : > { %664 = vadd.xlane.f32.xlu1 %v4659_v27  ;;  %742 = vadd.xlane.f32.xlu0 %v715_v28 }
  0xdd   : > { %744 = vadd.xlane.f32.xlu2 %v716_v29  ;;  %v1136_v29 = vld [vmem:[#allocation12] sm:$0xff] }
  0xde   : > { %1189 = vmatpush.msra.mxu0 %v1136_v29  ;;  %3484 = vmatpush.msra.mxu3 %v1136_v29 }
  0xe0   : > { %3485 = vmatpush.msrb.mxu3 %v4670_v38 }
  0xe2   : > { %3486 = vmatpush.msrb.mxu3 %v4673_v41 }
  0xe3   : > { %746 = vadd.xlane.f32.xlu1 %v717_v31  ;;  %666 = vadd.xlane.f32.xlu0 %v637_v30  ;;  %v4722_v30 = vld [vmem:[#allocation12 + $0x8] sm:$0xff] }
  0xe4   : > { %1266 = vmatpush.msra.mxu1 %v4722_v30  ;;  %3487 = vmatpush.msrb.mxu3 %v4677_v44 }
  0xe5   : > { %668 = vadd.xlane.f32.xlu2 %v638_v32 }
  0xe6   : > { %3488 = vmatpush.msrb.mxu3 %v4680_v46 }
  0xe8   : > { %3489 = vmatpush.msrb.mxu3 %v4683_v48 }
  0xea   : > { %3490 = vmatpush.msrb.mxu3 %v4686_v51 }
  0xeb   : > { %670 = vadd.xlane.f32.xlu1 %v639_v33  ;;  %748 = vadd.xlane.f32.xlu0 %v718_v34 }
  0xec   : > { %3491 = vmatpush.msrb.mxu3 %v4689_v53 }
  0xed   : > { %750 = vadd.xlane.f32.xlu2 %v719_v35 }
  0xee   : > { %3492 = vmatpush.msrb.mxu3 %v4692_v55 }
  0xf0   : > { %3493 = vmatpush.msrb.mxu3 %v4695_v57 }
  0xf2   : > { %3494 = vmatpush.msrb.mxu3 %v4698_v59 }
  0xf3   : > { %672 = vadd.xlane.f32.xlu0 %v640_v36  ;;  %752 = vadd.xlane.f32.xlu1 %v720_v39 }
  0xf4   : > { %3495 = vmatpush.msrb.mxu3 %v4701_v61 }
  0xf5   : > { %674 = vadd.xlane.f32.xlu2 %v641_v42 }
  0xf6   : > { %3496 = vmatpush.msrb.mxu3 %v4704_v63  ;;  %v4813_v63 = vld [vmem:[#allocation9] ss:$0 sm:$0xff] }
  0xf8   : > { %3497 = vmatpush.msrb.mxu3 %v4707_v8 }
  0xfa   : > { %3498 = vmatpush.msrb.mxu3 %v4712_v16 }
  0xfb   : > { %754 = vadd.xlane.f32.xlu0 %v721_v49 }
  0xfc   : > { %3499 = vmatpush.msrb.mxu3 %v4717_v24 }
  0xfe   : > { %3500 = vmatpush.msrb.mxu3 %v4722_v30 }
 0x106   : > { %v651_v2 = vpop.xlane.xlu1 %650  ;;  %v649_v4 = vpop.xlane.xlu0 %648 }
 0x107   : > { %v4709_v9 = vmul.f32 0.25, %v651_v2  ;;  %v4719_v25 = vmul.f32 0.25, %v649_v4 }
 0x108   : > { %v731_v12 = vpop.xlane.xlu2 %730 }
 0x109   : > { %v809_v17 = vmul.f32 %v4709_v9, %v4709_v9  ;;  %v769_v20 = vmul.f32 0.25, %v731_v12  ;;  %v808_v34 = vmul.f32 %v4719_v25, %v4719_v25 }
 0x10b   : > { %v829_v28 = vsub.f32 %v769_v20, %v809_v17 }
 0x10d   : > { %v4724_v31 = vadd.f32 1e-05, %v829_v28 }
 0x10e   : > { %v677_v32 = vpop.xlane.xlu1 %676  ;;  %v729_v33 = vpop.xlane.xlu0 %728 }
 0x10f   : > { %v4729_v35 = vmul.f32 0.25, %v677_v32  ;;  %v768_v36 = vmul.f32 0.25, %v729_v33  ;;  %3715 = vrsqrt.f32 %v4724_v31  ;;  %vm884_vm4 = vweird.f32 %v4724_v31 }
 0x110   : > { %v757_v37 = vpop.xlane.xlu2 %756 }
 0x111   : > { %v822_v39 = vmul.f32 %v4729_v35, %v4729_v35  ;;  %v828_v40 = vsub.f32 %v768_v36, %v808_v34  ;;  %v782_v42 = vmul.f32 0.25, %v757_v37 }
 0x113   : > { %v848_v43 = vadd.f32 1e-05, %v828_v40  ;;  %v842_v45 = vsub.f32 %v782_v42, %v822_v39 }
 0x115   : > { %3717 = vrsqrt.f32 %v848_v43  ;;  %v4737_v47 = vadd.f32 1e-05, %v842_v45  ;;  %v4739_v49 = vpop.eup %3715  ;;  %vm874_vm2 = vweird.f32 %v848_v43 }
 0x116   : > { %v679_v50 = vpop.xlane.xlu1 %678  ;;  %v653_v52 = vpop.xlane.xlu0 %652  ;;  %v879_v38 = vmul.f32 %v4739_v49, %v4724_v31  ;;  %vm885_vm1 = vweird.f32 %v4739_v49 }
 0x117   : > { %3719 = vrsqrt.f32 %v4737_v47  ;;  %v4745_v54 = vmul.f32 0.25, %v653_v52  ;;  %v4752_v46 = vmul.f32 0.25, %v679_v50  ;;  %v788_v50 = vsub.f32 %v4578_v1, %v4719_v25  ;;  %vm4792_vm6 = vmor %vm884_vm4, %vm885_vm1 }
 0x118   : > { %v733_v41 = vpop.xlane.xlu2 %732  ;;  %v880_v44 = vmul.f32 %v4739_v49, %v879_v38  ;;  %vm1014_vm7 = vweird.f32 %v4737_v47 }
 0x119   : > { %v770_v56 = vmul.f32 0.25, %v733_v41  ;;  %v810_v58 = vmul.f32 %v4745_v54, %v4745_v54  ;;  %v823_v51 = vmul.f32 %v4752_v46, %v4752_v46 }
 0x11a   : > { %v881_v62 = vmul.f32 0.5, %v880_v44 }
 0x11b   : > { %v3718_v60 = vpop.eup %3717  ;;  %v830_v4 = vsub.f32 %v770_v56, %v810_v58  ;;  %v802_v58 = vsub.f32 %v4585_v3, %v4729_v35  ;;  %v789_v3 = vsub.f32 %v4576_v0, %v4709_v9 }
 0x11c   : > { %v869_v2 = vmul.f32 %v3718_v60, %v848_v43  ;;  %v882_v28 = vsub.f32 1.5, %v881_v62  ;;  %vm875_vm0 = vweird.f32 %v3718_v60 }
 0x11d   : > { %v4755_v5 = vpop.eup %3719  ;;  %v4759_v13 = vadd.f32 1e-05, %v830_v4  ;;  %vm4779_vm5 = vmor %vm874_vm2, %vm875_vm0 }
 0x11e   : > { %v870_v12 = vmul.f32 %v3718_v60, %v869_v2  ;;  %v1009_v48 = vmul.f32 %v4755_v5, %v4737_v47  ;;  %v655_v17 = vpop.xlane.xlu1 %654  ;;  %v759_v20 = vpop.xlane.xlu0 %758  ;;  %vm1015_vm3 = vweird.f32 %v4755_v5  ;;  %v883_v57 = vmul.f32 %v4739_v49, %v882_v28 }
 0x11f   : > { %v783_v21 = vmul.f32 0.25, %v759_v20  ;;  %3721 = vrsqrt.f32 %v4759_v13  ;;  %v4771_v55 = vmul.f32 0.25, %v655_v17  ;;  %vm4803_vm8 = vmor %vm1014_vm7, %vm1015_vm3  ;;  %vm894_vm10 = vweird.f32 %v4759_v13 }
 0x120   : > { %v871_v29 = vmul.f32 0.5, %v870_v12  ;;  %v1010_v53 = vmul.f32 %v4755_v5, %v1009_v48  ;;  %v681_v32 = vpop.xlane.xlu2 %680  ;;  %v887_v4 = vsel %vm4792_vm6, %v4739_v49, %v883_v57 }
 0x121   : > { %v843_v33 = vsub.f32 %v783_v21, %v823_v51  ;;  %v4767_v34 = vmul.f32 0.25, %v681_v32  ;;  %v811_v47 = vmul.f32 %v4771_v55, %v4771_v55  ;;  %v4828_v51 = vld [vmem:[#allocation11] ss:$0 sm:$0xff]  ;;  %v1069_v32 = vmul.f32 %v887_v4, %v789_v3 }
 0x122   : > { %v872_v36 = vsub.f32 1.5, %v871_v29  ;;  %v1011_v37 = vmul.f32 0.5, %v1010_v53 }
 0x123   : > { %v4773_v39 = vadd.f32 1e-05, %v843_v33  ;;  %v824_v59 = vmul.f32 %v4767_v34, %v4767_v34 }
 0x124   : > { %v1012_v40 = vsub.f32 1.5, %v1011_v37  ;;  %v873_v42 = vmul.f32 %v3718_v60, %v872_v36 }
 0x125   : > { %3723 = vrsqrt.f32 %v4773_v39  ;;  %v4786_v43 = vpop.eup %3721  ;;  %vm1024_vm13 = vweird.f32 %v4773_v39 }
 0x126   : > { %v761_v31 = vpop.xlane.xlu1 %760  ;;  %v735_v52 = vpop.xlane.xlu0 %734  ;;  %v877_v38 = vsel %vm4779_vm5, %v3718_v60, %v873_v42  ;;  %v1013_v41 = vmul.f32 %v4755_v5, %v1012_v40  ;;  %v889_v25 = vmul.f32 %v4786_v43, %v4759_v13  ;;  %vm895_vm9 = vweird.f32 %v4786_v43 }
 0x127   : > { %v784_v44 = vmul.f32 0.25, %v761_v31  ;;  %v771_v56 = vmul.f32 0.25, %v735_v52  ;;  %v1068_v62 = vmul.f32 %v877_v38, %v788_v50  ;;  %v1093_v50 = vmul.f32 %v4813_v63, %v1069_v32  ;;  %vm4855_vm11 = vmor %vm894_vm10, %vm895_vm9 }
 0x128   : > { %v657_v60 = vpop.xlane.xlu2 %656  ;;  %v1017_v2 = vsel %vm4803_vm8, %v4755_v5, %v1013_v41  ;;  %v890_v12 = vmul.f32 %v4786_v43, %v889_v25  ;;  %v790_v13 = vsub.f32 %v4593_v6, %v4745_v54 }
 0x129   : > { %v844_v48 = vsub.f32 %v784_v44, %v824_v59  ;;  %v831_v17 = vsub.f32 %v771_v56, %v811_v47  ;;  %v4823_v20 = vmul.f32 0.25, %v657_v60  ;;  %v1092_v35 = vmul.f32 %v4813_v63, %v1068_v62 }
 0x12a   : > { %v1082_v5 = vmul.f32 %v1017_v2, %v802_v58  ;;  %v891_v49 = vmul.f32 0.5, %v890_v12  ;;  %v1117_v54 = vadd.f32 %v4828_v51, %v1093_v50  ;;  %v803_v60 = vsub.f32 %v4596_v7, %v4752_v46 }
 0x12b   : > { %v3724_v21 = vpop.eup %3723  ;;  %v4831_v28 = vadd.f32 1e-05, %v844_v48  ;;  %v4833_v8 = vadd.f32 1e-05, %v831_v17  ;;  %v1116_v53 = vadd.f32 %v4828_v51, %v1092_v35  ;;  %v812_v9 = vmul.f32 %v4823_v20, %v4823_v20 }
 0x12c   : > { %v1019_v29 = vmul.f32 %v3724_v21, %v4773_v39  ;;  %v892_v0 = vsub.f32 1.5, %v891_v49  ;;  %v1106_v37 = vmul.f32 %v4813_v63, %v1082_v5  ;;  %vm1025_vm12 = vweird.f32 %v3724_v21 }
 0x12d   : > { %3725 = vrsqrt.f32 %v4831_v28  ;;  %1190 = vmatmul.f32.vlgmr.msra.gmra.mxu0 %v1116_v53  ;;  %1267 = vmatmul.f32.vlgmr.msra.gmra.mxu1 %v1116_v53  ;;  %vm1026_vm14 = vmor %vm1024_vm13, %vm1025_vm12  ;;  %vm904_vm0 = vweird.f32 %v4833_v8  ;;  %vm1034_vm3 = vweird.f32 %v4831_v28 }
 0x12e   : > { %v1020_v16 = vmul.f32 %v3724_v21, %v1019_v29  ;;  %3727 = vrsqrt.f32 %v4833_v8  ;;  %v737_v33 = vpop.xlane.xlu1 %736  ;;  %v683_v36 = vpop.xlane.xlu0 %682  ;;  %v893_v24 = vmul.f32 %v4786_v43, %v892_v0  ;;  %v4850_v45 = vadd.f32 %v4828_v51, %v1106_v37 }
 0x12f   : > { %v772_v40 = vmul.f32 0.25, %v737_v33  ;;  %v4844_v42 = vmul.f32 0.25, %v683_v36 }
 0x130   : > { %v1021_v57 = vmul.f32 0.5, %v1020_v16  ;;  %v763_v59 = vpop.xlane.xlu2 %762  ;;  %1232 = vmatmul.f32.vlgmr.msra.gmra.mxu3 %v4850_v45  ;;  %v897_v41 = vsel %vm4855_vm11, %v4786_v43, %v893_v24 }
 0x131   : > { %v832_v31 = vsub.f32 %v772_v40, %v812_v9  ;;  %v825_v52 = vmul.f32 %v4844_v42, %v4844_v42  ;;  %v785_v30 = vmul.f32 0.25, %v763_v59  ;;  %v1070_v56 = vmul.f32 %v897_v41, %v790_v13 }
 0x132   : > { %v1022_v38 = vsub.f32 1.5, %v1021_v57 }
 0x133   : > { %v4867_v1 = vpop.eup %3725  ;;  %v4870_v25 = vadd.f32 1e-05, %v832_v31  ;;  %v845_v47 = vsub.f32 %v785_v30, %v825_v52  ;;  %v1094_v35 = vmul.f32 %v4813_v63, %v1070_v56 }
 0x134   : > { %v4872_v44 = vpop.eup %3727  ;;  %v1029_v6 = vmul.f32 %v4867_v1, %v4831_v28  ;;  %v1023_v58 = vmul.f32 %v3724_v21, %v1022_v38  ;;  %vm1035_vm1 = vweird.f32 %v4867_v1 }
 0x135   : > { %v899_v43 = vmul.f32 %v4872_v44, %v4833_v8  ;;  %3729 = vrsqrt.f32 %v4870_v25  ;;  %v4883_v62 = vadd.f32 1e-05, %v845_v47  ;;  %1193 = vmatmul.f32.gmra.mxu0 %v1117_v54  ;;  %1270 = vmatmul.f32.gmra.mxu1 %v1117_v54  ;;  %vm905_vm15 = vweird.f32 %v4872_v44  ;;  %vm1036_vm4 = vmor %vm1034_vm3, %vm1035_vm1 }
 0x136   : > { %v1030_v39 = vmul.f32 %v4867_v1, %v1029_v6  ;;  %v685_v2 = vpop.xlane.xlu1 %684  ;;  %v659_v4 = vpop.xlane.xlu0 %658  ;;  %v1027_v12 = vsel %vm1026_vm14, %v3724_v21, %v1023_v58  ;;  %v1118_v36 = vadd.f32 %v4828_v51, %v1094_v35  ;;  %v791_v8 = vsub.f32 %v4605_v10, %v4771_v55  ;;  %vm4918_vm2 = vmor %vm904_vm0, %vm905_vm15 }
 0x137   : > { %v900_v48 = vmul.f32 %v4872_v44, %v899_v43  ;;  %v4886_v17 = vmul.f32 0.25, %v659_v4  ;;  %v1083_v7 = vmul.f32 %v1027_v12, %v803_v60  ;;  %3731 = vrsqrt.f32 %v4883_v62 }
 0x138   : > { %v1031_v46 = vmul.f32 0.5, %v1030_v39  ;;  %v739_v3 = vpop.xlane.xlu2 %738  ;;  %v4896_v9 = vmul.f32 0.25, %v685_v2  ;;  %v804_v47 = vsub.f32 %v4608_v11, %v4767_v34  ;;  %vm914_vm6 = vweird.f32 %v4870_v25 }
 0x139   : > { %v901_v5 = vmul.f32 0.5, %v900_v48  ;;  %v813_v29 = vmul.f32 %v4886_v17, %v4886_v17  ;;  %v773_v53 = vmul.f32 0.25, %v739_v3  ;;  %v1107_v32 = vmul.f32 %v4813_v63, %v1083_v7 }
 0x13a   : > { %v1032_v49 = vsub.f32 1.5, %v1031_v46  ;;  %v826_v13 = vmul.f32 %v4896_v9, %v4896_v9  ;;  %vm1044_vm9 = vweird.f32 %v4883_v62 }
 0x13b   : > { %v4893_v21 = vpop.eup %3729  ;;  %v902_v0 = vsub.f32 1.5, %v901_v5  ;;  %v833_v33 = vsub.f32 %v773_v53, %v813_v29  ;;  %v4902_v37 = vadd.f32 %v4828_v51, %v1107_v32 }
 0x13c   : > { %v909_v16 = vmul.f32 %v4893_v21, %v4870_v25  ;;  %v1033_v31 = vmul.f32 %v4867_v1, %v1032_v49  ;;  %vm915_vm5 = vweird.f32 %v4893_v21  ;;  %v792_v25 = vsub.f32 %v4617_v14, %v4823_v20 }
 0x13d   : > { %v903_v40 = vmul.f32 %v4872_v44, %v902_v0  ;;  %v4906_v24 = vpop.eup %3731  ;;  %v4910_v59 = vadd.f32 1e-05, %v833_v33  ;;  %1196 = vmatmul.f32.gmra.mxu0 %v1118_v36  ;;  %1235 = vmatmul.f32.gmra.mxu3 %v4902_v37  ;;  %vm4947_vm7 = vmor %vm914_vm6, %vm915_vm5 }
 0x13e   : > { %v910_v57 = vmul.f32 %v4893_v21, %v909_v16  ;;  %v661_v50 = vpop.xlane.xlu1 %660  ;;  %v765_v61 = vpop.xlane.xlu0 %764  ;;  %v1039_v30 = vmul.f32 %v4906_v24, %v4883_v62  ;;  %1273 = vmatmul.f32.gmra.mxu1 %v1118_v36  ;;  %v1037_v60 = vsel %vm1036_vm4, %v4867_v1, %v1033_v31  ;;  %vm1045_vm8 = vweird.f32 %v4906_v24 }
 0x13f   : > { %v786_v38 = vmul.f32 0.25, %v765_v61  ;;  %3733 = vrsqrt.f32 %v4910_v59  ;;  %v907_v55 = vsel %vm4918_vm2, %v4872_v44, %v903_v40  ;;  %v1084_v44 = vmul.f32 %v1037_v60, %v804_v47  ;;  %vm4975_vm10 = vmor %vm1044_vm9, %vm1045_vm8 }
 0x140   : > { %v911_v41 = vmul.f32 0.5, %v910_v57  ;;  %v687_v10 = vpop.xlane.xlu2 %686  ;;  %v1040_v6 = vmul.f32 %v4906_v24, %v1039_v30  ;;  %v1071_v58 = vmul.f32 %v907_v55, %v791_v8  ;;  %v4943_v11 = vmul.f32 0.25, %v661_v50 }
 0x141   : > { %v846_v54 = vsub.f32 %v786_v38, %v826_v13  ;;  %v4937_v56 = vmul.f32 0.25, %v687_v10  ;;  %v1108_v48 = vmul.f32 %v4813_v63, %v1084_v44  ;;  %v805_v31 = vsub.f32 %v4621_v15, %v4844_v42 }
 0x142   : > { %v912_v28 = vsub.f32 1.5, %v911_v41  ;;  %v1041_v43 = vmul.f32 0.5, %v1040_v6  ;;  %v1095_v34 = vmul.f32 %v4813_v63, %v1071_v58  ;;  %v814_v14 = vmul.f32 %v4943_v11, %v4943_v11 }
 0x143   : > { %v4940_v39 = vadd.f32 1e-05, %v846_v54  ;;  %v827_v1 = vmul.f32 %v4937_v56, %v4937_v56  ;;  %v4968_v29 = vadd.f32 %v4828_v51, %v1108_v48  ;;  %vm924_vm12 = vweird.f32 %v4910_v59 }
 0x144   : > { %v913_v2 = vmul.f32 %v4893_v21, %v912_v28  ;;  %v1042_v12 = vsub.f32 1.5, %v1041_v43  ;;  %v1119_v46 = vadd.f32 %v4828_v51, %v1095_v34  ;;  %v793_v43 = vsub.f32 %v4629_v18, %v4886_v17 }
 0x145   : > { %3735 = vrsqrt.f32 %v4940_v39  ;;  %v4955_v7 = vpop.eup %3733  ;;  %1238 = vmatmul.f32.gmra.mxu3 %v4968_v29  ;;  %vm1054_vm15 = vweird.f32 %v4940_v39 }
 0x146   : > { %v767_v3 = vpop.xlane.xlu1 %766  ;;  %v741_v35 = vpop.xlane.xlu0 %740  ;;  %v917_v5 = vsel %vm4947_vm7, %v4893_v21, %v913_v2  ;;  %v919_v49 = vmul.f32 %v4955_v7, %v4910_v59  ;;  %1199 = vmatmul.f32.gmra.mxu0 %v1119_v46  ;;  %1276 = vmatmul.f32.gmra.mxu1 %v1119_v46  ;;  %v1043_v16 = vmul.f32 %v4906_v24, %v1042_v12  ;;  %vm925_vm11 = vweird.f32 %v4955_v7 }
 0x147   : > { %v787_v53 = vmul.f32 0.25, %v767_v3  ;;  %v774_v20 = vmul.f32 0.25, %v741_v35  ;;  %v1072_v0 = vmul.f32 %v917_v5, %v792_v25  ;;  %vm926_vm13 = vmor %vm924_vm12, %vm925_vm11  ;;  %v806_v35 = vsub.f32 %v4633_v19, %v4896_v9 }
 0x148   : > { %v663_v32 = vpop.xlane.xlu2 %662  ;;  %v920_v21 = vmul.f32 %v4955_v7, %v919_v49  ;;  %v1047_v50 = vsel %vm4975_vm10, %v4906_v24, %v1043_v16 }
 0x149   : > { %v847_v33 = vsub.f32 %v787_v53, %v827_v1  ;;  %v4981_v36 = vmul.f32 0.25, %v663_v32  ;;  %v834_v40 = vsub.f32 %v774_v20, %v814_v14  ;;  %v1096_v57 = vmul.f32 %v4813_v63, %v1072_v0 }
 0x14a   : > { %v921_v8 = vmul.f32 0.5, %v920_v21  ;;  %v1085_v24 = vmul.f32 %v1047_v50, %v805_v31 }
 0x14b   : > { %v3736_v61 = vpop.eup %3735  ;;  %v4989_v52 = vadd.f32 1e-05, %v847_v33  ;;  %v4992_v13 = vadd.f32 1e-05, %v834_v40  ;;  %v1120_v38 = vadd.f32 %v4828_v51, %v1096_v57  ;;  %v815_v10 = vmul.f32 %v4981_v36, %v4981_v36 }
 0x14c   : > { %v1049_v30 = vmul.f32 %v3736_v61, %v4940_v39  ;;  %v922_v41 = vsub.f32 1.5, %v921_v8  ;;  %v1109_v54 = vmul.f32 %v4813_v63, %v1085_v24  ;;  %vm1055_vm14 = vweird.f32 %v3736_v61 }
 0x14d   : > { %3737 = vrsqrt.f32 %v4989_v52  ;;  %vm1056_vm0 = vmor %vm1054_vm15, %vm1055_vm14  ;;  %vm1064_vm2 = vweird.f32 %v4989_v52  ;;  %vm934_vm5 = vweird.f32 %v4992_v13 }
 0x14e   : > { %v1050_v55 = vmul.f32 %v3736_v61, %v1049_v30  ;;  %3739 = vrsqrt.f32 %v4992_v13  ;;  %v665_v15 = vpop.xlane.xlu1 %664  ;;  %v743_v42 = vpop.xlane.xlu0 %742  ;;  %v923_v28 = vmul.f32 %v4955_v7, %v922_v41  ;;  %1202 = vmatmul.f32.gmra.mxu0 %v1120_v38  ;;  %1279 = vmatmul.f32.gmra.mxu1 %v1120_v38  ;;  %v5012_v2 = vadd.f32 %v4828_v51, %v1109_v54 }
 0x14f   : > { %v5000_v47 = vmul.f32 0.25, %v665_v15  ;;  %v775_v6 = vmul.f32 0.25, %v743_v42 }
 0x150   : > { %v1051_v58 = vmul.f32 0.5, %v1050_v55  ;;  %v745_v60 = vpop.xlane.xlu2 %744  ;;  %v927_v12 = vsel %vm926_vm13, %v4955_v7, %v923_v28  ;;  %1241 = vmatmul.f32.gmra.mxu3 %v5012_v2 }
 0x151   : > { %v816_v44 = vmul.f32 %v5000_v47, %v5000_v47  ;;  %v835_v34 = vsub.f32 %v775_v6, %v815_v10  ;;  %v776_v59 = vmul.f32 0.25, %v745_v60  ;;  %v1073_v18 = vmul.f32 %v927_v12, %v793_v43 }
 0x152   : > { %v1052_v4 = vsub.f32 1.5, %v1051_v58  ;;  %v794_v60 = vsub.f32 %v4642_v22, %v4943_v11  ;;  %v807_v43 = vsub.f32 %v4646_v23, %v4937_v56  ;;  %v796_v24 = vsub.f32 %v4659_v27, %v5000_v47 }
 0x153   : > { %v5015_v1 = vpop.eup %3737  ;;  %v5017_v48 = vadd.f32 1e-05, %v835_v34  ;;  %v836_v46 = vsub.f32 %v776_v59, %v816_v44  ;;  %v1097_v14 = vmul.f32 %v4813_v63, %v1073_v18 }
 0x154   : > { %v5020_v17 = vpop.eup %3739  ;;  %v1059_v25 = vmul.f32 %v5015_v1, %v4989_v52  ;;  %v1053_v3 = vmul.f32 %v3736_v61, %v1052_v4  ;;  %vm1065_vm1 = vweird.f32 %v5015_v1 }
 0x155   : > { %v929_v7 = vmul.f32 %v5020_v17, %v4992_v13  ;;  %3741 = vrsqrt.f32 %v5017_v48  ;;  %v5031_v49 = vadd.f32 1e-05, %v836_v46  ;;  %v1121_v62 = vadd.f32 %v4828_v51, %v1097_v14  ;;  %vm5055_vm4 = vmor %vm1064_vm2, %vm1065_vm1 }
 0x156   : > { %v1060_v5 = vmul.f32 %v5015_v1, %v1059_v25  ;;  %v747_v53 = vpop.xlane.xlu1 %746  ;;  %v667_v39 = vpop.xlane.xlu0 %666  ;;  %v1057_v20 = vsel %vm1056_vm0, %v3736_v61, %v1053_v3  ;;  %vm935_vm3 = vweird.f32 %v5020_v17  ;;  %vm944_vm8 = vweird.f32 %v5017_v48 }
 0x157   : > { %v930_v32 = vmul.f32 %v5020_v17, %v929_v7  ;;  %v777_v0 = vmul.f32 0.25, %v747_v53  ;;  %v5035_v16 = vmul.f32 0.25, %v667_v39  ;;  %v1086_v19 = vmul.f32 %v1057_v20, %v806_v35  ;;  %1205 = vmatmul.f32.gmra.mxu0 %v1121_v62  ;;  %1282 = vmatmul.f32.gmra.mxu1 %v1121_v62  ;;  %vm936_vm6 = vmor %vm934_vm5, %vm935_vm3 }
 0x158   : > { %v1061_v9 = vmul.f32 0.5, %v1060_v5  ;;  %3743 = vrsqrt.f32 %v5031_v49  ;;  %v669_v21 = vpop.xlane.xlu2 %668  ;;  %vm954_vm10 = vweird.f32 %v5031_v49 }
 0x159   : > { %v931_v33 = vmul.f32 0.5, %v930_v32  ;;  %v817_v40 = vmul.f32 %v5035_v16, %v5035_v16  ;;  %v5042_v50 = vmul.f32 0.25, %v669_v21  ;;  %v1110_v61 = vmul.f32 %v4813_v63, %v1086_v19 }
 0x15a   : > { %v1062_v57 = vsub.f32 1.5, %v1061_v9 }
 0x15b   : > { %v5045_v31 = vpop.eup %3741  ;;  %v932_v8 = vsub.f32 1.5, %v931_v33  ;;  %v837_v30 = vsub.f32 %v777_v0, %v817_v40  ;;  %v5052_v41 = vadd.f32 %v4828_v51, %v1110_v61  ;;  %v818_v6 = vmul.f32 %v5042_v50, %v5042_v50 }
 0x15c   : > { %v939_v38 = vmul.f32 %v5045_v31, %v5017_v48  ;;  %v1063_v10 = vmul.f32 %v5015_v1, %v1062_v57  ;;  %vm945_vm7 = vweird.f32 %v5045_v31 }
 0x15d   : > { %v5059_v55 = vadd.f32 1e-05, %v837_v30  ;;  %v933_v52 = vmul.f32 %v5020_v17, %v932_v8  ;;  %1244 = vmatmul.f32.gmra.mxu3 %v5052_v41  ;;  %vm5102_vm9 = vmor %vm944_vm8, %vm945_vm7 }
 0x15e   : > { %v5062_v15 = vpop.eup %3743  ;;  %v940_v42 = vmul.f32 %v5045_v31, %v939_v38  ;;  %v671_v54 = vpop.xlane.xlu1 %670  ;;  %v1067_v58 = vsel %vm5055_vm4, %v5015_v1, %v1063_v10 }
 0x15f   : > { %v749_v28 = vpop.xlane.xlu0 %748  ;;  %v949_v13 = vmul.f32 %v5062_v15, %v5031_v49  ;;  %3745 = vrsqrt.f32 %v5059_v55  ;;  %v5081_v34 = vmul.f32 0.25, %v671_v54  ;;  %v937_v12 = vsel %vm936_vm6, %v5020_v17, %v933_v52 }
 0x160   : > { %v941_v44 = vmul.f32 0.5, %v940_v42  ;;  %v778_v4 = vmul.f32 0.25, %v749_v28  ;;  %v751_v59 = vpop.xlane.xlu2 %750  ;;  %v1074_v1 = vmul.f32 %v937_v12, %v794_v60  ;;  %v1087_v23 = vmul.f32 %v1067_v58, %v807_v43 }
 0x161   : > { %v950_v22 = vmul.f32 %v5062_v15, %v949_v13  ;;  %v779_v11 = vmul.f32 0.25, %v751_v59  ;;  %v819_v18 = vmul.f32 %v5081_v34, %v5081_v34  ;;  %v795_v17 = vsub.f32 %v4655_v26, %v4981_v36 }
 0x162   : > { %v942_v56 = vsub.f32 1.5, %v941_v44  ;;  %v838_v25 = vsub.f32 %v778_v4, %v818_v6  ;;  %v1098_v3 = vmul.f32 %v4813_v63, %v1074_v1  ;;  %v1111_v35 = vmul.f32 %v4813_v63, %v1087_v23 }
 0x163   : > { %v951_v46 = vmul.f32 0.5, %v950_v22  ;;  %v839_v5 = vsub.f32 %v779_v11, %v819_v18  ;;  %vm955_vm11 = vweird.f32 %v5062_v15  ;;  %vm964_vm13 = vweird.f32 %v5059_v55  ;;  %v3755_v11 = vld [vmem:[%s4550_s2 + $0x38] sm:$0xff] }
 0x164   : > { %v5092_v7 = vadd.f32 1e-05, %v838_v25  ;;  %v943_v53 = vmul.f32 %v5045_v31, %v942_v56  ;;  %v1122_v20 = vadd.f32 %v4828_v51, %v1098_v3  ;;  %v5100_v32 = vadd.f32 %v4828_v51, %v1111_v35  ;;  %vm956_vm12 = vmor %vm954_vm10, %vm955_vm11 }
 0x165   : > { %v5095_v39 = vpop.eup %3745  ;;  %v952_v14 = vsub.f32 1.5, %v951_v46  ;;  %v5111_v19 = vadd.f32 1e-05, %v839_v5  ;;  %v797_v1 = vsub.f32 %v3755_v11, %v5035_v16 }
 0x166   : > { %v959_v26 = vmul.f32 %v5095_v39, %v5059_v55  ;;  %3747 = vrsqrt.f32 %v5092_v7  ;;  %v753_v48 = vpop.xlane.xlu1 %752  ;;  %1208 = vmatmul.f32.gmra.mxu0 %v1122_v20  ;;  %1247 = vmatmul.f32.gmra.mxu3 %v5100_v32  ;;  %v947_v21 = vsel %vm5102_vm9, %v5045_v31, %v943_v53  ;;  %vm965_vm14 = vweird.f32 %v5095_v39 }
 0x167   : > { %v673_v36 = vpop.xlane.xlu0 %672  ;;  %v780_v62 = vmul.f32 0.25, %v753_v48  ;;  %1285 = vmatmul.f32.gmra.mxu1 %v1122_v20  ;;  %v1075_v57 = vmul.f32 %v947_v21, %v795_v17  ;;  %v953_v61 = vmul.f32 %v5062_v15, %v952_v14  ;;  %3749 = vrsqrt.f32 %v5111_v19  ;;  %vm966_vm15 = vmor %vm964_vm13, %vm965_vm14 }
 0x168   : > { %v5114_v9 = vmul.f32 0.25, %v673_v36  ;;  %v960_v33 = vmul.f32 %v5095_v39, %v959_v26  ;;  %v675_v40 = vpop.xlane.xlu2 %674  ;;  %vm974_vm0 = vweird.f32 %v5092_v7  ;;  %vm984_vm3 = vweird.f32 %v5111_v19 }
 0x169   : > { %v5128_v38 = vmul.f32 0.25, %v675_v40  ;;  %v1099_v31 = vmul.f32 %v4813_v63, %v1075_v57  ;;  %v957_v10 = vsel %vm956_vm12, %v5062_v15, %v953_v61 }
 0x16a   : > { %v820_v8 = vmul.f32 %v5114_v9, %v5114_v9  ;;  %v961_v30 = vmul.f32 0.5, %v960_v33  ;;  %v1076_v60 = vmul.f32 %v957_v10, %v796_v24  ;;  %v3757_v33 = vld [vmem:[%s4550_s2 + $0x48] sm:$0xff]  ;;  %v3758_v10 = vld [vmem:[%s4550_s2 + $0x50] sm:$0xff] }
 0x16b   : > { %v1123_v49 = vadd.f32 %v4828_v51, %v1099_v31  ;;  %v821_v58 = vmul.f32 %v5128_v38, %v5128_v38 }
 0x16c   : > { %v840_v52 = vsub.f32 %v780_v62, %v820_v8  ;;  %v3748_v42 = vpop.eup %3747  ;;  %v962_v6 = vsub.f32 1.5, %v961_v30  ;;  %v1100_v55 = vmul.f32 %v4813_v63, %v1076_v60 }
 0x16d   : > { %v969_v54 = vmul.f32 %v3748_v42, %v5092_v7  ;;  %v3750_v47 = vpop.eup %3749  ;;  %vm975_vm1 = vweird.f32 %v3748_v42 }
 0x16e   : > { %v5136_v28 = vadd.f32 1e-05, %v840_v52  ;;  %v963_v43 = vmul.f32 %v5095_v39, %v962_v6  ;;  %1211 = vmatmul.f32.gmra.mxu0 %v1123_v49  ;;  %1309 = vmatmul.f32.vlgmr.msrb.gmra.mxu3 %v4850_v45  ;;  %v979_v44 = vmul.f32 %v3750_v47, %v5111_v19  ;;  %v1124_v45 = vadd.f32 %v4828_v51, %v1100_v55  ;;  %vm976_vm2 = vmor %vm974_vm0, %vm975_vm1 }
 0x16f   : > { %v755_v27 = vpop.xlane.xlu0 %754  ;;  %v970_v15 = vmul.f32 %v3748_v42, %v969_v54  ;;  %1288 = vmatmul.f32.gmra.mxu1 %v1123_v49  ;;  %vm985_vm4 = vweird.f32 %v3750_v47  ;;  %v799_v19 = vsub.f32 %v3757_v33, %v5081_v34  ;;  %v800_v34 = vsub.f32 %v3758_v10, %v5114_v9  ;;  %v3759_v49 = vld [vmem:[%s4550_s2 + $0x58] sm:$0xff] }
 0x170   : > { %3751 = vrsqrt.f32 %v5136_v28  ;;  %v781_v13 = vmul.f32 0.25, %v755_v27  ;;  %v967_v12 = vsel %vm966_vm15, %v5095_v39, %v963_v43  ;;  %v980_v22 = vmul.f32 %v3750_v47, %v979_v44  ;;  %v3756_v39 = vld [vmem:[%s4550_s2 + $0x40] sm:$0xff]  ;;  %vm986_vm5 = vmor %vm984_vm3, %vm985_vm4 }
 0x171   : > { %v971_v4 = vmul.f32 0.5, %v970_v15  ;;  %v1077_v25 = vmul.f32 %v967_v12, %v797_v1  ;;  %v798_v14 = vsub.f32 %v3756_v39, %v5042_v50  ;;  %vm994_vm6 = vweird.f32 %v5136_v28 }
 0x172   : > { %v841_v59 = vsub.f32 %v781_v13, %v821_v58  ;;  %v981_v46 = vmul.f32 0.5, %v980_v22  ;;  %v801_v54 = vsub.f32 %v3759_v49, %v5128_v38 }
 0x173   : > { %v972_v23 = vsub.f32 1.5, %v971_v4  ;;  %v1101_v16 = vmul.f32 %v4813_v63, %v1077_v25 }
 0x174   : > { %v861_v56 = vadd.f32 1e-05, %v841_v59  ;;  %v982_v17 = vsub.f32 1.5, %v981_v46 }
 0x175   : > { %v973_v35 = vmul.f32 %v3748_v42, %v972_v23  ;;  %v1125_v20 = vadd.f32 %v4828_v51, %v1101_v16 }
 0x176   : > { %v3752_v18 = vpop.eup %3751  ;;  %3753 = vrsqrt.f32 %v861_v56  ;;  %1214 = vmatmul.f32.gmra.mxu0 %v1124_v45  ;;  %1312 = vmatmul.f32.gmra.mxu3 %v4902_v37  ;;  %v983_v36 = vmul.f32 %v3750_v47, %v982_v17  ;;  %vm1004_vm9 = vweird.f32 %v861_v56 }
 0x177   : > { %v989_v3 = vmul.f32 %v3752_v18, %v5136_v28  ;;  %1291 = vmatmul.f32.gmra.mxu1 %v1124_v45  ;;  %v977_v53 = vsel %vm976_vm2, %v3748_v42, %v973_v35  ;;  %vm995_vm7 = vweird.f32 %v3752_v18 }
 0x178   : > { %v1078_v0 = vmul.f32 %v977_v53, %v798_v14  ;;  %v987_v50 = vsel %vm986_vm5, %v3750_v47, %v983_v36  ;;  %vm996_vm8 = vmor %vm994_vm6, %vm995_vm7 }
 0x179   : > { %v990_v5 = vmul.f32 %v3752_v18, %v989_v3  ;;  %v1079_v57 = vmul.f32 %v987_v50, %v799_v19 }
 0x17a   : > { %v1102_v48 = vmul.f32 %v4813_v63, %v1078_v0 }
 0x17b   : > { %v991_v26 = vmul.f32 0.5, %v990_v5 }
 0x17c   : > { %v3754_v7 = vpop.eup %3753  ;;  %v1126_v40 = vadd.f32 %v4828_v51, %v1102_v48 }
 0x17d   : > { %v999_v37 = vmul.f32 %v3754_v7, %v861_v56  ;;  %v992_v62 = vsub.f32 1.5, %v991_v26  ;;  %vm1005_vm10 = vweird.f32 %v3754_v7 }
 0x17e   : > { %1217 = vmatmul.f32.gmra.mxu0 %v1125_v20  ;;  %1315 = vmatmul.f32.gmra.mxu3 %v4968_v29  ;;  %v1103_v29 = vmul.f32 %v4813_v63, %v1079_v57  ;;  %vm1006_vm11 = vmor %vm1004_vm9, %vm1005_vm10 }
 0x17f   : > { %1294 = vmatmul.f32.gmra.mxu1 %v1125_v20  ;;  %v1000_v21 = vmul.f32 %v3754_v7, %v999_v37  ;;  %v993_v8 = vmul.f32 %v3752_v18, %v992_v62 }
 0x180   : > { %v1127_v24 = vadd.f32 %v4828_v51, %v1103_v29 }
 0x181   : > { %v1001_v61 = vmul.f32 0.5, %v1000_v21  ;;  %v997_v31 = vsel %vm996_vm8, %v3752_v18, %v993_v8 }
 0x182   : > { %v1080_v52 = vmul.f32 %v997_v31, %v800_v34 }
 0x183   : > { %v1002_v30 = vsub.f32 1.5, %v1001_v61 }
 0x185   : > { %v1003_v42 = vmul.f32 %v3754_v7, %v1002_v30 }
 0x186   : > { %1220 = vmatmul.f32.gmra.mxu0 %v1126_v40  ;;  %1318 = vmatmul.f32.gmra.mxu3 %v5012_v2  ;;  %v1104_v2 = vmul.f32 %v4813_v63, %v1080_v52 }
 0x187   : > { %1297 = vmatmul.f32.gmra.mxu1 %v1126_v40  ;;  %v1007_v6 = vsel %vm1006_vm11, %v3754_v7, %v1003_v42 }
 0x188   : > { %v1128_v28 = vadd.f32 %v4828_v51, %v1104_v2  ;;  %v1081_v9 = vmul.f32 %v1007_v6, %v801_v54 }
 0x18a   : > { %v1105_v58 = vmul.f32 %v4813_v63, %v1081_v9 }
 0x18c   : > { %v1129_v60 = vadd.f32 %v4828_v51, %v1105_v58 }
 0x18e   : > { %1223 = vmatmul.f32.gmra.mxu0 %v1127_v24  ;;  %1321 = vmatmul.f32.gmra.mxu3 %v5052_v41  ;;  %v1168_v41 = vld [vmem:[%s7451_s5] sm:$0x3] }
 0x18f   : > { %1300 = vmatmul.f32.gmra.mxu1 %v1127_v24  ;;  %v5181_v43 = vperm.slane %v1168_v41, 0  ;;  %v5183_v38 = vperm.slane %v1168_v41, 1 }
 0x196   : > { %1226 = vmatmul.f32.gmra.mxu0 %v1128_v28  ;;  %1324 = vmatmul.f32.gmra.mxu3 %v5100_v32 }
 0x197   : > { %1303 = vmatmul.f32.gmra.mxu1 %v1128_v28 }
 0x19e   : > { %1229 = vmatmul.f32.gmra.mxu0 %v1129_v60 }
 0x19f   : > { %1306 = vmatmul.f32.gmra.mxu1 %v1129_v60 }
 0x1aa   : > { %v1191_v27 = vpop.f32.mrf.mxu0  ;;  %v1268_v47 = vpop.f32.mrf.mxu1 }
 0x1ab   : > { %v1192_v15 = vadd.f32 %v1191_v27, %v5181_v43  ;;  %v1269_v32 = vadd.f32 %v1268_v47, %v5183_v38 }
 0x1ad   : > { %1328 = vst [vmem:[#allocation2 + $0xb0] sm:$0xff] %v1192_v15 }
 0x1ae   : > { %1329 = vst [vmem:[#allocation2 + $0xd0] sm:$0xff] %v1269_v32 }
 0x1b2   : > { %v1194_v63 = vpop.f32.mrf.mxu0  ;;  %v1271_v51 = vpop.f32.mrf.mxu1 }
 0x1b3   : > { %v1195_v13 = vadd.f32 %v1194_v63, %v5181_v43  ;;  %v1272_v44 = vadd.f32 %v1271_v51, %v5183_v38  ;;  %v1233_v4 = vpop.f32.mrf.mxu3 }
 0x1b4   : > { %v1234_v59 = vadd.f32 %v1233_v4, %v5181_v43 }
 0x1b5   : > { %1330 = vst [vmem:[#allocation2 + $0x10] sm:$0xff] %v1195_v13 }
 0x1b6   : > { %1331 = vst [vmem:[#allocation2 + $0x48] sm:$0xff] %v1272_v44 }
 0x1b7   : > { %1356 = vst [vmem:[#allocation2 + $0x68] sm:$0xff] %v1234_v59 }
 0x1ba   : > { %v1197_v55 = vpop.f32.mrf.mxu0 }
 0x1bb   : > { %v1198_v12 = vadd.f32 %v1197_v55, %v5181_v43  ;;  %v1274_v22 = vpop.f32.mrf.mxu1 }
 0x1bc   : > { %v1275_v11 = vadd.f32 %v1274_v22, %v5183_v38 }
 0x1bd   : > { %1332 = vst [vmem:[#allocation2 + $0x120] sm:$0xff] %v1198_v12 }
 0x1be   : > { %1333 = vst [vmem:[#allocation2 + $0x38] sm:$0xff] %v1275_v11 }
 0x1c0   : > { %v1236_v1 = vpop.f32.mrf.mxu3 }
 0x1c1   : > { %v1237_v23 = vadd.f32 %v1236_v1, %v5181_v43 }
 0x1c3   : > { %1358 = vst [vmem:[#allocation2 + $0x50] sm:$0xff] %v1237_v23  ;;  %v1200_v56 = vpop.f32.mrf.mxu0  ;;  %v1277_v18 = vpop.f32.mrf.mxu1 }
 0x1c4   : > { %v1201_v25 = vadd.f32 %v1200_v56, %v5181_v43  ;;  %v1278_v45 = vadd.f32 %v1277_v18, %v5183_v38 }
 0x1c6   : > { %1334 = vst [vmem:[#allocation2 + $0xf8] sm:$0xff] %v1201_v25 }
 0x1c7   : > { %1335 = vst [vmem:[#allocation2 + $0x100] sm:$0xff] %v1278_v45 }
 0x1c8   : > { %v1239_v46 = vpop.f32.mrf.mxu3 }
 0x1c9   : > { %v1240_v3 = vadd.f32 %v1239_v46, %v5181_v43 }
 0x1cb   : > { %v1203_v35 = vpop.f32.mrf.mxu0  ;;  %v1280_v16 = vpop.f32.mrf.mxu1  ;;  %1360 = vst [vmem:[#allocation2 + $0x58] sm:$0xff] %v1240_v3 }
 0x1cc   : > { %v1204_v17 = vadd.f32 %v1203_v35, %v5181_v43  ;;  %v1281_v5 = vadd.f32 %v1280_v16, %v5183_v38 }
 0x1ce   : > { %1336 = vst [vmem:[#allocation2 + $0x80] sm:$0xff] %v1204_v17 }
 0x1cf   : > { %1337 = vst [vmem:[#allocation2 + $0x108] sm:$0xff] %v1281_v5 }
 0x1d3   : > { %v1242_v53 = vpop.f32.mrf.mxu3 }
 0x1d4   : > { %v1243_v7 = vadd.f32 %v1242_v53, %v5181_v43  ;;  %v1206_v39 = vpop.f32.mrf.mxu0  ;;  %v1283_v14 = vpop.f32.mrf.mxu1 }
 0x1d5   : > { %v1207_v20 = vadd.f32 %v1206_v39, %v5181_v43  ;;  %v1284_v0 = vadd.f32 %v1283_v14, %v5183_v38 }
 0x1d6   : > { %1362 = vst [vmem:[#allocation2 + $0x30] sm:$0xff] %v1243_v7 }
 0x1d7   : > { %1338 = vst [vmem:[#allocation2 + $0x138] sm:$0xff] %v1207_v20 }
 0x1d8   : > { %1339 = vst [vmem:[#allocation2 + $0xf0] sm:$0xff] %v1284_v0 }
 0x1e0   : > { %v1245_v26 = vpop.f32.mrf.mxu3 }
 0x1e1   : > { %v1246_v37 = vadd.f32 %v1245_v26, %v5181_v43 }
 0x1e3   : > { %1364 = vst [vmem:[#allocation2 + $0x28] sm:$0xff] %v1246_v37  ;;  %v1209_v36 = vpop.f32.mrf.mxu0 }
 0x1e4   : > { %v1210_v48 = vadd.f32 %v1209_v36, %v5181_v43  ;;  %v1286_v62 = vpop.f32.mrf.mxu1 }
 0x1e5   : > { %v1287_v21 = vadd.f32 %v1286_v62, %v5183_v38 }
 0x1e6   : > { %1340 = vst [vmem:[#allocation2 + $0x18] sm:$0xff] %v1210_v48 }
 0x1e7   : > { %1341 = vst [vmem:[#allocation2 + $0xc8] sm:$0xff] %v1287_v21 }
 0x1e9   : > { %v1248_v50 = vpop.f32.mrf.mxu3 }
 0x1ea   : > { %v1249_v33 = vadd.f32 %v1248_v50, %v5181_v43 }
 0x1eb   : > { %v1212_v19 = vpop.f32.mrf.mxu0 }
 0x1ec   : > { %1366 = vst [vmem:[#allocation2 + $0xb8] sm:$0xff] %v1249_v33  ;;  %v1213_v40 = vadd.f32 %v1212_v19, %v5181_v43  ;;  %v1289_v57 = vpop.f32.mrf.mxu1 }
 0x1ed   : > { %v1290_v61 = vadd.f32 %v1289_v57, %v5183_v38 }
 0x1ee   : > { %1342 = vst [vmem:[#allocation2 + $0x70] sm:$0xff] %v1213_v40 }
 0x1ef   : > { %1343 = vst [vmem:[#allocation2 + $0x20] sm:$0xff] %v1290_v61 }
 0x1f1   : > { %v1310_v8 = vpop.f32.mrf.mxu3 }
 0x1f2   : > { %v1311_v29 = vadd.f32 %v1310_v8, %v5183_v38 }
 0x1f3   : > { %v1215_v30 = vpop.f32.mrf.mxu0 }
 0x1f4   : > { %1357 = vst [vmem:[#allocation2 + $0x130] sm:$0xff] %v1311_v29  ;;  %v1216_v31 = vadd.f32 %v1215_v30, %v5181_v43  ;;  %v1292_v10 = vpop.f32.mrf.mxu1 }
 0x1f5   : > { %v1293_v34 = vadd.f32 %v1292_v10, %v5183_v38 }
 0x1f6   : > { %1344 = vst [vmem:[#allocation2 + $0x128] sm:$0xff] %v1216_v31 }
 0x1f7   : > { %1345 = vst [vmem:[#allocation2 + $0x110] sm:$0xff] %v1293_v34 }
 0x1f9   : > { %v1313_v24 = vpop.f32.mrf.mxu3 }
 0x1fa   : > { %v1314_v52 = vadd.f32 %v1313_v24, %v5183_v38 }
 0x1fb   : > { %v1218_v42 = vpop.f32.mrf.mxu0 }
 0x1fc   : > { %1359 = vst [vmem:[#allocation2 + $0xe8] sm:$0xff] %v1314_v52  ;;  %v1219_v2 = vadd.f32 %v1218_v42, %v5181_v43  ;;  %v1295_v6 = vpop.f32.mrf.mxu1 }
 0x1fd   : > { %v1296_v49 = vadd.f32 %v1295_v6, %v5183_v38 }
 0x1fe   : > { %1346 = vst [vmem:[#allocation2 + $0x8] sm:$0xff] %v1219_v2 }
 0x1ff   : > { %1347 = vst [vmem:[#allocation2 + $0x98] sm:$0xff] %v1296_v49 }
 0x201   : > { %v1316_v54 = vpop.f32.mrf.mxu3 }
 0x202   : > { %v1317_v28 = vadd.f32 %v1316_v54, %v5183_v38 }
 0x203   : > { %v1221_v9 = vpop.f32.mrf.mxu0 }
 0x204   : > { %1361 = vst [vmem:[#allocation2 + $0x78] sm:$0xff] %v1317_v28  ;;  %v1222_v58 = vadd.f32 %v1221_v9, %v5181_v43  ;;  %v1298_v60 = vpop.f32.mrf.mxu1 }
 0x205   : > { %v1299_v41 = vadd.f32 %v1298_v60, %v5183_v38 }
 0x206   : > { %1348 = vst [vmem:[#allocation2 + $0xa8] sm:$0xff] %v1222_v58 }
 0x207   : > { %1349 = vst [vmem:[#allocation2 + $0x90] sm:$0xff] %v1299_v41 }
 0x209   : > { %v1319_v27 = vpop.f32.mrf.mxu3 }
 0x20a   : > { %v1320_v47 = vadd.f32 %v1319_v27, %v5183_v38 }
 0x20b   : > { %v1224_v15 = vpop.f32.mrf.mxu0 }
 0x20c   : > { %1363 = vst [vmem:[#allocation2 + $0x40] sm:$0xff] %v1320_v47  ;;  %v1225_v32 = vadd.f32 %v1224_v15, %v5181_v43  ;;  %v1301_v63 = vpop.f32.mrf.mxu1 }
 0x20d   : > { %v1302_v51 = vadd.f32 %v1301_v63, %v5183_v38 }
 0x20e   : > { %1350 = vst [vmem:[#allocation2 + $0xe0] sm:$0xff] %v1225_v32 }
 0x20f   : > { %1351 = vst [vmem:[#allocation2 + $0x88] sm:$0xff] %v1302_v51 }
 0x211   : > { %v1322_v13 = vpop.f32.mrf.mxu3 }
 0x212   : > { %v1323_v44 = vadd.f32 %v1322_v13, %v5183_v38 }
 0x213   : > { %v1227_v4 = vpop.f32.mrf.mxu0 }
 0x214   : > { %1365 = vst [vmem:[#allocation2] sm:$0xff] %v1323_v44  ;;  %v1228_v59 = vadd.f32 %v1227_v4, %v5181_v43  ;;  %v1304_v55 = vpop.f32.mrf.mxu1 }
 0x215   : > { %v1305_v12 = vadd.f32 %v1304_v55, %v5183_v38 }
 0x216   : > { %1352 = vst [vmem:[#allocation2 + $0xc0] sm:$0xff] %v1228_v59 }
 0x217   : > { %1353 = vst [vmem:[#allocation2 + $0x118] sm:$0xff] %v1305_v12 }
 0x219   : > { %v1325_v22 = vpop.f32.mrf.mxu3 }
 0x21a   : > { %v1326_v11 = vadd.f32 %v1325_v22, %v5183_v38 }
 0x21b   : > { %v1230_v1 = vpop.f32.mrf.mxu0  ;;  %1371 = sbr.rel (%p3434_p1) target bundleno = 549 (0x225), region = 100 }
 0x21c   : > { %1367 = vst [vmem:[#allocation2 + $0x60] sm:$0xff] %v1326_v11  ;;  %v1231_v23 = vadd.f32 %v1230_v1, %v5181_v43  ;;  %v1307_v56 = vpop.f32.mrf.mxu1 }
 0x21d   : > { %v1308_v18 = vadd.f32 %v1307_v56, %v5183_v38 }
 0x21e   : > { %1354 = vst [vmem:[#allocation2 + $0xd8] sm:$0xff] %v1231_v23 }
 0x21f   : > { %1355 = vst [vmem:[#allocation2 + $0xa0] sm:$0xff] %v1308_v18 }
 0x220   : > { %v4215_v25 = vmov 0.0  }
 0x221   : > { %1372 = vst [vmem:[#allocation2 + $0xb0] sm:$0xff] %v4215_v25 }
 0x222   : > { %1373 = vst [vmem:[#allocation2 + $0xd0] sm:$0xff] %v4215_v25 }
 0x223   : > { %1374 = vst [vmem:[#allocation2 + $0x10] sm:$0xff] %v4215_v25 }
 0x224   : > { %1375 = vst [vmem:[#allocation2 + $0x48] sm:$0xff] %v4215_v25 }
 0x225 PF: > { %s7453_s18 = sld [smem:[#allocation30_spill]] }
 0x22b   : > { %p3435_p3 = scmp.ne.s32.totalorder %s7453_s18, 1 }
 0x22d   : > { %1379 = sbr.rel (%p3435_p3) target bundleno = 567 (0x237), region = 104 }
 0x232   : > { %v4216_v43 = vmov 0.0  }
 0x233   : > { %1381 = vst [vmem:[#allocation2 + $0x28] sm:$0xff] %v4216_v43 }
 0x234   : > { %1382 = vst [vmem:[#allocation2] sm:$0xff] %v4216_v43 }
 0x235   : > { %1383 = vst [vmem:[#allocation2 + $0xb8] sm:$0xff] %v4216_v43 }
 0x236   : > { %1384 = vst [vmem:[#allocation2 + $0x60] sm:$0xff] %v4216_v43 }
 0x237 PF: > { %v3069_v38 = vld [vmem:[#allocation15 + $0x78] sm:$0xff]  ;;  %v3068_v45 = vld [vmem:[#allocation15 + $0x70] sm:$0xff]  ;;  %v3067_v46 = vld [vmem:[#allocation15 + $0x68] sm:$0xff]  ;;  %v2023_v14 = vlaneseq  ;;  %s7469_s15 = sld [smem:[#allocation66_spill]]  ;;  %s3203_s19 = sshll.u32 %s5226_s27, 4  ;;  %s3204_s19 = int_to_ptr.vmem [resolvable:$true] %s3203_s19 }
 0x238   : > { %3074 = vmatpush.msra.mxu2 %v3069_v38  ;;  %3501 = vmatpush.msra.mxu3 %v3069_v38  ;;  %v3066_v3 = vld [vmem:[#allocation15 + $0x60] sm:$0xff]  ;;  %v5230_v35 = vld [vmem:[#allocation14] sm:$0x77]  ;;  %v5232_v16 = vld [vmem:[#allocation14 + $0x8] sm:$0x77]  ;;  %s7614_s3 = sld [smem:[#allocation68_spill]] }
 0x239   : > { %v3065_v17 = vld [vmem:[#allocation15 + $0x58] sm:$0xff]  ;;  %v3064_v5 = vld [vmem:[#allocation15 + $0x50] sm:$0xff]  ;;  %v1487_v7 = vperm.slane %v5230_v35, 0  ;;  %v1488_v39 = vperm.slane %v5230_v35, 4  ;;  %v1526_v37 = vperm.slane %v5232_v16, 0  ;;  %v1527_v36 = vperm.slane %v5232_v16, 4 }
 0x23a   : > { %3075 = vmatpush.msra.mxu2 %v3068_v45  ;;  %3502 = vmatpush.msra.mxu3 %v3068_v45  ;;  %v5234_v53 = vld [vmem:[#allocation14 + $0x10] sm:$0x77]  ;;  %v5247_v62 = vld [vmem:[#allocation2 + $0x120] sm:$0xff]  ;;  %v5258_v57 = vld [vmem:[#allocation2 + $0x48] sm:$0xff]  ;;  %v5274_v52 = vshrl.u32 %v2023_v14, 7  ;;  %v1667_v41 = vperm.slane %v5230_v35, 1 }
 0x23b   : > { %v5238_v20 = vld [vmem:[#allocation2 + $0xb0] sm:$0xff]  ;;  %v1597_v48 = vperm.slane %v5234_v53, 0  ;;  %v5249_v21 = vld [vmem:[#allocation2 + $0x38] sm:$0xff]  ;;  %v5253_v33 = vperm.slane %v1487_v7, 0  ;;  %v5255_v19 = vperm.slane %v1488_v39, 0  ;;  %v1598_v40 = vperm.slane %v5234_v53, 4 }
 0x23c   : > { %3076 = vmatpush.msra.mxu2 %v3067_v46  ;;  %3503 = vmatpush.msra.mxu3 %v3067_v46  ;;  %v5240_v0 = vld [vmem:[#allocation2 + $0xd0] sm:$0xff]  ;;  %v5251_v50 = vld [vmem:[#allocation2 + $0xf8] sm:$0xff]  ;;  %v5260_v61 = vld [vmem:[#allocation2 + $0x100] sm:$0xff]  ;;  %v5262_v8 = vperm.slane %v1526_v37, 0  ;;  %v5264_v29 = vperm.slane %v1527_v36, 0  ;;  %v1668_v13 = vperm.slane %v5230_v35, 5 }
 0x23d   : > { %v5242_v26 = vld [vmem:[#allocation2 + $0x10] sm:$0xff]  ;;  %7454 = vst [vmem:[#allocation39_spill] sm:$0xff] %v5253_v33  ;;  %v5266_v30 = vperm.slane %v1597_v48, 0  ;;  %v3063_v31 = vld [vmem:[#allocation15 + $0x48] sm:$0xff]  ;;  %v1493_v34 = vmul.f32 %v5253_v33, %v5238_v20  ;;  %v1494_v24 = vmul.f32 %v5255_v19, %v5240_v0  ;;  %v5276_v42 = vld [vmem:[#allocation2 + $0x138] sm:$0xff]  ;;  %v1496_v9 = vmul.f32 %v5255_v19, %v5258_v57  ;;  %s7615_s9 = sld [smem:[#allocation30_spill]] }
 0x23e   : > { %3077 = vmatpush.msra.mxu2 %v3066_v3  ;;  %3504 = vmatpush.msra.mxu3 %v3066_v3  ;;  %7455 = vst [vmem:[#allocation40_spill] sm:$0xff] %v5255_v19  ;;  %v5268_v10 = vld [vmem:[#allocation2 + $0x80] sm:$0xff]  ;;  %v1495_v2 = vmul.f32 %v5253_v33, %v5242_v26  ;;  %v1532_v6 = vmul.f32 %v5262_v8, %v5247_v62  ;;  %v5290_v60 = vperm.slane %v1598_v40, 0  ;;  %v5293_v27 = vld [vmem:[#allocation2 + $0x108] sm:$0xff]  ;;  %v5295_v47 = vld [vmem:[#allocation2 + $0xf0] sm:$0xff]  ;;  %v5302_v44 = vperm.slane %v1667_v41, 1 }
 0x23f   : > { %7456 = vst [vmem:[#allocation41_spill] sm:$0xff] %v5262_v8  ;;  %v1533_v49 = vmul.f32 %v5264_v29, %v5249_v21  ;;  %v1534_v54 = vmul.f32 %v5262_v8, %v5251_v50  ;;  %v3062_v28 = vld [vmem:[#allocation15 + $0x40] sm:$0xff]  ;;  %v1535_v58 = vmul.f32 %v5264_v29, %v5260_v61  ;;  %v1603_v15 = vmul.f32 %v5266_v30, %v5268_v10  ;;  %v3061_v32 = vld [vmem:[#allocation15 + $0x38] sm:$0xff]  ;;  %v3060_v22 = vld [vmem:[#allocation15 + $0x30] sm:$0xff]  ;;  %s7616_s26 = sld [smem:[#allocation31_spill]]  ;;  %s3188_s4 = scalar_lea.sflag [#allocation5], %s531_s0 }
 0x240   : > { %3078 = vmatpush.msra.mxu2 %v3065_v17  ;;  %7457 = vst [vmem:[#allocation42_spill] sm:$0xff] %v5264_v29  ;;  %3505 = vmatpush.msra.mxu3 %v3065_v17  ;;  %v1564_v63 = vadd.f32 %v1532_v6, %v1493_v34  ;;  %v1605_v51 = vmul.f32 %v5266_v30, %v5276_v42  ;;  %v1705_v55 = vperm.slane %v5232_v16, 1  ;;  %v1706_v12 = vperm.slane %v5232_v16, 5  ;;  %v3059_v45 = vld [vmem:[#allocation15 + $0x28] sm:$0xff]  ;;  %v3058_v36 = vld [vmem:[#allocation15 + $0x20] sm:$0xff]  ;;  %s7618_s12 = sld [smem:[#allocation69_spill]] }
 0x241   : > { %7458 = vst [vmem:[#allocation43_spill] sm:$0xff] %v5266_v30  ;;  %v1565_v4 = vadd.f32 %v1533_v49, %v1494_v24  ;;  %v1566_v59 = vadd.f32 %v1534_v54, %v1495_v2  ;;  %v1567_v11 = vadd.f32 %v1535_v58, %v1496_v9  ;;  %v1604_v1 = vmul.f32 %v5290_v60, %v5293_v27  ;;  %v3057_v49 = vld [vmem:[#allocation15 + $0x18] sm:$0xff] }
 0x242   : > { %3079 = vmatpush.msra.mxu2 %v3064_v5  ;;  %7459 = vst [vmem:[#allocation44_spill] sm:$0xff] %v5290_v60  ;;  %3506 = vmatpush.msra.mxu3 %v3064_v5  ;;  %v1606_v23 = vmul.f32 %v5290_v60, %v5295_v47  ;;  %v5310_v56 = vperm.slane %v1668_v13, 1  ;;  %vm2026_vm12 = vcmp.ge.s32.totalorder %v5274_v52, 1  ;;  %v1673_v18 = vmul.f32 %v5302_v44, %v5238_v20 }
 0x243   : > { %v5315_v25 = vperm.slane %v1705_v55, 1  ;;  %v5317_v43 = vperm.slane %v1706_v12, 1  ;;  %v1775_v38 = vperm.slane %v5234_v53, 1  ;;  %v1776_v46 = vperm.slane %v5234_v53, 5  ;;  %s3468_s14 = sshll.u32 %s7615_s9, 4 }
 0x244   : > { %3080 = vmatpush.msra.mxu2 %v3063_v31  ;;  %3507 = vmatpush.msra.mxu3 %v3063_v31  ;;  %7460 = vst [vmem:[#allocation45_spill] sm:$0xff] %v5310_v56  ;;  %v1845_v3 = vperm.slane %v5230_v35, 2  ;;  %v1846_v17 = vperm.slane %v5230_v35, 6  ;;  %v1883_v5 = vperm.slane %v5232_v16, 2  ;;  %vm2070_vm13 = vcmp.lt.s32.totalorder %v5274_v52, 1 }
 0x245   : > { %7461 = vst [vmem:[#allocation46_spill] sm:$0xff] %v5317_v43  ;;  %v5325_v7 = vadd.f32 %v1603_v15, %v1564_v63  ;;  %v5327_v39 = vadd.f32 %v1605_v51, %v1566_v59  ;;  %v1711_v14 = vmul.f32 %v5315_v25, %v5247_v62  ;;  %v5331_v37 = vperm.slane %v1775_v38, 1  ;;  %v3056_v63 = vld [vmem:[#allocation15 + $0x10] sm:$0xff]  ;;  %s3457_s17 = sshll.u32 %s7616_s26, 5 }
 0x246   : > { %3081 = vmatpush.msra.mxu2 %v3062_v28  ;;  %3508 = vmatpush.msra.mxu3 %v3062_v28  ;;  %v5333_v48 = vperm.slane %v1845_v3, 2  ;;  %v5335_v40 = vperm.slane %v1846_v17, 2  ;;  %v1884_v35 = vperm.slane %v5232_v16, 6  ;;  %v5338_v31 = vperm.slane %v1883_v5, 2  ;;  %v3054_v3 = vld [vmem:[#allocation15] sm:$0xff]  ;;  %s3200_s16 = sadd.s32 %s3468_s14, %s3457_s17 }
 0x247   : > { %v5340_v34 = vadd.f32 %v1604_v1, %v1565_v4  ;;  %v5342_v24 = vadd.f32 %v1606_v23, %v1567_v11  ;;  %v1674_v2 = vmul.f32 %v5310_v56, %v5240_v0  ;;  %v1712_v6 = vmul.f32 %v5317_v43, %v5249_v21  ;;  %s3458_s10 = sshll.u32 %s3200_s16, 3 }
 0x248   : > { %3082 = vmatpush.msra.mxu2 %v3061_v32  ;;  %3509 = vmatpush.msra.mxu3 %v3061_v32  ;;  %7462 = vst [vmem:[#allocation47_spill] sm:$0xff] %v5333_v48  ;;  %v1743_v54 = vadd.f32 %v1711_v14, %v1673_v18  ;;  %v5348_v28 = vperm.slane %v1776_v46, 1  ;;  %v1851_v16 = vmul.f32 %v5333_v48, %v5238_v20  ;;  %v5358_v15 = vperm.slane %v1884_v35, 2  ;;  %s3202_s5 = scalar_lea.hbm %s7618_s12, %s3458_s10 }
 0x249   : > { %7463 = vst [vmem:[#allocation48_spill] sm:$0xff] %v5335_v40  ;;  %v1853_v9 = vmul.f32 %v5333_v48, %v5242_v26  ;;  %v1781_v58 = vmul.f32 %v5331_v37, %v5268_v10  ;;  %v1852_v41 = vmul.f32 %v5335_v40, %v5240_v0  ;;  %v1889_v32 = vmul.f32 %v5338_v31, %v5247_v62  ;;  %s3205_s18 = sshll.u32 %s3202_s5, 4  ;;  %s3206_s18 = int_to_ptr.hbm [resolvable:$true] %s3205_s18 }
 0x24a   : > { %3083 = vmatpush.msra.mxu2 %v3060_v22  ;;  %7464 = vst [vmem:[#allocation49_spill] sm:$0xff] %v5338_v31  ;;  %3510 = vmatpush.msra.mxu3 %v3060_v22  ;;  %v1854_v20 = vmul.f32 %v5335_v40, %v5258_v57  ;;  %v1891_v51 = vmul.f32 %v5338_v31, %v5251_v50  ;;  %v1953_v13 = vperm.slane %v5234_v53, 2  ;;  %v1954_v4 = vperm.slane %v5234_v53, 6  ;;  %v3055_v22 = vld [vmem:[#allocation15 + $0x8] sm:$0xff]  ;;  %s4052_s21 = sshra.s32 %s3206_s18, 4  ;;  %s4053_s21 = int_to_ptr.hbm [resolvable:$true] %s4052_s21 }
 0x24b   : > { %7465 = vst [vmem:[#allocation50_spill] sm:$0xff] %v5358_v15  ;;  %v1890_v0 = vmul.f32 %v5358_v15, %v5249_v21  ;;  %v1892_v59 = vmul.f32 %v5358_v15, %v5260_v61  ;;  %v1921_v55 = vadd.f32 %v1889_v32, %v1851_v16  ;;  %v2038_v12 = vrot.slane %v5325_v7, 7  ;;  %p4059_p11 = scmp.lt.s32.totalorder %s4053_s21, %s7618_s12 }
 0x24c   : > { %3084 = vmatpush.msra.mxu2 %v3059_v45  ;;  %3511 = vmatpush.msra.mxu3 %v3059_v45  ;;  %v1923_v11 = vadd.f32 %v1891_v51, %v1853_v9  ;;  %v5373_v1 = vperm.slane %v1953_v13, 2  ;;  %v5375_v23 = vperm.slane %v1954_v4, 2  ;;  %v2054_v18 = vrot.slane %v5327_v39, 7 }
 0x24d   : > { %v1744_v53 = vadd.f32 %v1712_v6, %v1674_v2  ;;  %v1782_v38 = vmul.f32 %v5348_v28, %v5293_v27  ;;  %v4217_v45 = vmov 0.0   ;;  %vm2199_vm14 = vcmp.lt.s32.totalorder %v5274_v52, 7  ;;  %v5396_v2 = vld [vmem:[%s7469_s15] sm:$0x3]  ;;  %s4054_s15 = scalar_lea.hbm %s4053_s21, 128 }
 0x24e   : > { %3085 = vmatpush.msra.mxu2 %v3058_v36  ;;  %3512 = vmatpush.msra.mxu3 %v3058_v36  ;;  %7466 = vst [vmem:[#allocation51_spill] sm:$0xff] %v5373_v1  ;;  %v5382_v46 = vsel %vm2026_vm12, 1.0, %v4217_v45  ;;  %v1813_v17 = vadd.f32 %v1781_v58, %v1743_v54  ;;  %v1959_v5 = vmul.f32 %v5373_v1, %v5268_v10  ;;  %v7296_v39 = vrot.slane %v5340_v34, 7  ;;  %p4055_p13 = scmp.ne.s32.totalorder %s4053_s21, %s4054_s15 }
 0x24f   : > { %7467 = vst [vmem:[#allocation52_spill] sm:$0xff] %v5375_v23  ;;  %v1961_v7 = vmul.f32 %v5373_v1, %v5276_v42  ;;  %v1922_v14 = vadd.f32 %v1890_v0, %v1852_v41  ;;  %v7297_v36 = vrot.slane %v5342_v24, 7  ;;  %v2087_v35 = vsel %vm2070_vm13, %v2054_v18, %v2038_v12 }
 0x250   : > { %3086 = vmatpush.msra.mxu2 %v3057_v49  ;;  %3513 = vmatpush.msra.mxu3 %v3057_v49  ;;  %7468 = vst [vmem:[#allocation53_spill] sm:$0xff] %v5382_v46  ;;  %v1675_v6 = vmul.f32 %v5302_v44, %v5242_v26  ;;  %v1924_v49 = vadd.f32 %v1892_v59, %v1854_v20  ;;  %v5410_v13 = vperm.slane %v5396_v2, 0  ;;  %p4056_p9 = pnand %p4055_p13, %p4407_p0 }
 0x251   : > { %v1960_v54 = vmul.f32 %v5375_v23, %v5293_v27  ;;  %v1991_v16 = vadd.f32 %v1959_v5, %v1921_v55  ;;  %v1993_v9 = vadd.f32 %v1961_v7, %v1923_v11  ;;  %v1962_v58 = vmul.f32 %v5375_v23, %v5295_v47 }
 0x252   : > { %3087 = vmatpush.msra.mxu2 %v3056_v63  ;;  %3514 = vmatpush.msra.mxu3 %v3056_v63  ;;  %v2103_v41 = vmul.f32 %v5382_v46, %v2087_v35  ;;  %v1713_v32 = vmul.f32 %v5315_v25, %v5251_v50  ;;  %v1783_v63 = vmul.f32 %v5331_v37, %v5276_v42  ;;  %v2025_v55 = vadd.s32 8, %v5274_v52  ;;  %v5431_v35 = vld [vmem:[#allocation2 + $0x70] sm:$0xff]  ;;  %p4057_p8 = pneg %p4056_p9 }
 0x253   : > { %v1814_v26 = vadd.f32 %v1782_v38, %v1744_v53  ;;  %v2167_v20 = vrot.slane %v1991_v16, 1  ;;  %v2183_v51 = vrot.slane %v1993_v9, 1  ;;  %7470 = vst [vmem:[#allocation54_spill] sm:$0xff] %v5410_v13  ;;  %v2088_v4 = vsel %vm2070_vm13, %v7297_v36, %v7296_v39 }
 0x254   : > { %3088 = vmatpush.msra.mxu2 %v3055_v22  ;;  %3515 = vmatpush.msra.mxu3 %v3055_v22  ;;  %v2135_v0 = vadd.f32 %v2103_v41, %v1813_v17  ;;  %v1745_v59 = vadd.f32 %v1713_v32, %v1675_v6  ;;  %v5419_v22 = vadd.f32 %v1960_v54, %v1922_v14  ;;  %vm2033_vm15 = vcmp.le.s32.totalorder %v2025_v55, 14  ;;  %v5429_v17 = vld [vmem:[#allocation2 + $0x18] sm:$0xff] }
 0x255   : > { %v2200_v11 = vsel %vm2199_vm14, %v2167_v20, %v2183_v51  ;;  %v2071_v53 = vsel %vm2070_vm13, %v2038_v12, %v2054_v18  ;;  %v2216_v38 = vsel %vm2199_vm14, %v2183_v51, %v2167_v20  ;;  %v5433_v14 = vsel %vm2033_vm15, 1.0, %v4217_v45 }
 0x256   : > { %3089 = vmatpush.msra.mxu2 %v3054_v3  ;;  %3516 = vmatpush.msra.mxu3 %v3054_v3  ;;  %v5427_v3 = vadd.f32 %v1962_v58, %v1924_v49  ;;  %v2264_v5 = vadd.f32 %v2200_v11, %v2135_v0  ;;  %v1815_v7 = vadd.f32 %v1783_v63, %v1745_v59 }
 0x257   : > { %v1497_v6 = vmul.f32 %v5253_v33, %v5247_v62  ;;  %v1499_v12 = vmul.f32 %v5253_v33, %v5251_v50  ;;  %v1536_v18 = vmul.f32 %v5262_v8, %v5268_v10  ;;  %v2104_v49 = vmul.f32 %v5382_v46, %v2088_v4 }
 0x258   : > { %v5443_v54 = vadd.f32 %v5410_v13, %v2264_v5  ;;  %v2137_v16 = vadd.f32 %v2071_v53, %v1815_v7  ;;  %v2234_v9 = vmul.f32 %v5433_v14, %v2216_v38  ;;  %v1538_v45 = vmul.f32 %v5262_v8, %v5276_v42 }
 0x259   : > { %v1568_v58 = vadd.f32 %v1536_v18, %v1497_v6  ;;  %v1607_v41 = vmul.f32 %v5266_v30, %v5429_v17  ;;  %v1609_v32 = vmul.f32 %v5266_v30, %v5431_v35  ;;  %v1677_v55 = vmul.f32 %v5302_v44, %v5247_v62 }
 0x25a   : > { %v5455_v51 = vmul.f32 0.70710677, %v5443_v54  ;;  %v2266_v4 = vadd.f32 %v2234_v9, %v2137_v16  ;;  %v1570_v0 = vadd.f32 %v1538_v45, %v1499_v12  ;;  %v1715_v11 = vmul.f32 %v5315_v25, %v5268_v10 }
 0x25b   : > { %v5457_v59 = vadd.f32 %v1607_v41, %v1568_v58  ;;  %v1855_v5 = vmul.f32 %v5333_v48, %v5247_v62  ;;  %v1857_v7 = vmul.f32 %v5333_v48, %v5251_v50  ;;  %v1785_v12 = vmul.f32 %v5331_v37, %v5429_v17 }
 0x25c   : > { %v2366_v53 = vmul.f32 %v5455_v51, %v5455_v51  ;;  %v5466_v38 = vadd.f32 %v5410_v13, %v2266_v4  ;;  %v1641_v6 = vadd.f32 %v1609_v32, %v1570_v0  ;;  %v1893_v18 = vmul.f32 %v5338_v31, %v5268_v10 }
 0x25d   : > { %v1895_v16 = vmul.f32 %v5338_v31, %v5276_v42  ;;  %v1963_v62 = vmul.f32 %v5373_v1, %v5429_v17  ;;  %v1965_v58 = vmul.f32 %v5373_v1, %v5431_v35  ;;  %v1747_v41 = vadd.f32 %v1715_v11, %v1677_v55 }
 0x25e   : > { %7471 = vst [vmem:[#allocation55_spill] sm:$0xff] %v5466_v38  ;;  %v5478_v9 = vmin.f32 %v2366_v53, 16.0  ;;  %v5481_v45 = vmul.f32 0.70710677, %v5466_v38  ;;  %v1925_v32 = vadd.f32 %v1893_v18, %v1855_v5  ;;  %v2040_v0 = vrot.slane %v5457_v59, 7 }
 0x25f   : > { %v1927_v4 = vadd.f32 %v1895_v16, %v1857_v7  ;;  %v2056_v63 = vrot.slane %v1641_v6, 7  ;;  %v2136_v20 = vadd.f32 %v2104_v49, %v1814_v26  ;;  %v7472_v31 = vrot.slane %v5427_v3, 1 }
 0x260   : > { %v2368_v39 = vmul.f32 2.1237322e-06, %v5478_v9  ;;  %v2379_v36 = vmul.f32 3.8918573e-05, %v5478_v9  ;;  %v2406_v53 = vmul.f32 %v5481_v45, %v5481_v45  ;;  %v7473_v48 = vrot.slane %v5419_v22, 1 }
 0x261   : > { %v1995_v11 = vadd.f32 %v1963_v62, %v1925_v32  ;;  %v1997_v5 = vadd.f32 %v1965_v58, %v1927_v4  ;;  %v2089_v16 = vsel %vm2070_vm13, %v2056_v63, %v2040_v0  ;;  %v1817_v1 = vadd.f32 %v1785_v12, %v1747_v41 }
 0x262   : > { %v2201_v55 = vsel %vm2199_vm14, %v7473_v48, %v7472_v31  ;;  %v2369_v7 = vadd.f32 0.00028619796, %v2368_v39  ;;  %v2380_v59 = vadd.f32 0.001143296, %v2379_v36  ;;  %v5498_v18 = vmin.f32 %v2406_v53, 16.0 }
 0x263   : > { %v2107_v6 = vmul.f32 %v5382_v46, %v2089_v16  ;;  %v2169_v26 = vrot.slane %v1995_v11, 1  ;;  %v2185_v49 = vrot.slane %v1997_v5, 1  ;;  %v1679_v39 = vmul.f32 %v5302_v44, %v5251_v50 }
 0x264   : > { %v2370_v30 = vmul.f32 %v2369_v7, %v5478_v9  ;;  %v2381_v38 = vmul.f32 %v2380_v59, %v5478_v9  ;;  %v2408_v48 = vmul.f32 2.1237322e-06, %v5498_v18  ;;  %v2419_v31 = vmul.f32 3.8918573e-05, %v5498_v18 }
 0x265   : > { %v1717_v36 = vmul.f32 %v5315_v25, %v5276_v42  ;;  %v2265_v41 = vadd.f32 %v2201_v55, %v2136_v20  ;;  %v5512_v32 = vperm.slane %v5396_v2, 1  ;;  %v2139_v53 = vadd.f32 %v2107_v6, %v1817_v1 }
 0x266   : > { %v2371_v62 = vadd.f32 0.0036580483, %v2370_v30  ;;  %v2382_v12 = vadd.f32 0.014752088, %v2381_v38  ;;  %v2409_v58 = vadd.f32 0.00028619796, %v2408_v48  ;;  %v2202_v50 = vsel %vm2199_vm14, %v2169_v26, %v2185_v49 }
 0x267   : > { %7474 = vst [vmem:[#allocation56_spill] sm:$0xff] %v5512_v32  ;;  %v2420_v4 = vadd.f32 0.001143296, %v2419_v31  ;;  %v1676_v30 = vmul.f32 %v5310_v56, %v5258_v57  ;;  %v1714_v20 = vmul.f32 %v5317_v43, %v5260_v61  ;;  %v1749_v38 = vadd.f32 %v1717_v36, %v1679_v39 }
 0x268   : > { %v2372_v11 = vmul.f32 %v2371_v62, %v5478_v9  ;;  %v2383_v5 = vmul.f32 %v2382_v12, %v5478_v9  ;;  %v2410_v7 = vmul.f32 %v2409_v58, %v5498_v18  ;;  %v1787_v16 = vmul.f32 %v5331_v37, %v5431_v35 }
 0x269   : > { %v2421_v2 = vmul.f32 %v2420_v4, %v5498_v18  ;;  %v1746_v6 = vadd.f32 %v1714_v20, %v1676_v30  ;;  %v1784_v48 = vmul.f32 %v5348_v28, %v5295_v47  ;;  %v2268_v62 = vadd.f32 %v2202_v50, %v2139_v53 }
 0x26a   : > { %v2373_v55 = vadd.f32 0.05243302, %v2372_v11  ;;  %v2384_v1 = vadd.f32 0.112945676, %v2383_v5  ;;  %v2411_v59 = vadd.f32 0.0036580483, %v2410_v7  ;;  %v2073_v39 = vsel %vm2070_vm13, %v2040_v0, %v2056_v63 }
 0x26b   : > { %v2422_v31 = vadd.f32 0.014752088, %v2421_v2  ;;  %v1816_v36 = vadd.f32 %v1784_v48, %v1746_v6  ;;  %v1498_v11 = vmul.f32 %v5255_v19, %v5249_v21  ;;  %v1537_v5 = vmul.f32 %v5264_v29, %v5293_v27 }
 0x26c   : > { %v2374_v57 = vmul.f32 %v2373_v55, %v5478_v9  ;;  %v2385_v12 = vmul.f32 %v2384_v1, %v5478_v9  ;;  %v2412_v58 = vmul.f32 %v2411_v59, %v5498_v18  ;;  %v7475_v50 = vrot.slane %v5342_v24, 7  ;;  %v5550_v1 = vld [vmem:[#allocation2 + $0xc8] sm:$0xff] }
 0x26d   : > { %v2423_v4 = vmul.f32 %v2422_v31, %v5498_v18  ;;  %v7476_v30 = vrot.slane %v5340_v34, 7  ;;  %v7477_v63 = vrot.slane %v5419_v22, 1  ;;  %v7478_v0 = vrot.slane %v5427_v3, 1 }
 0x26e   : > { %v2375_v7 = vadd.f32 0.18741608, %v2374_v57  ;;  %v2386_v53 = vadd.f32 0.4994258, %v2385_v12  ;;  %v2413_v55 = vadd.f32 0.05243302, %v2412_v58  ;;  %v5553_v59 = vadd.f32 %v5410_v13, %v2268_v62 }
 0x26f   : > { %v2072_v20 = vsel %vm2070_vm13, %v7476_v30, %v7475_v50  ;;  %v2217_v2 = vsel %vm2199_vm14, %v7478_v0, %v7477_v63  ;;  %v1819_v6 = vadd.f32 %v1787_v16, %v1749_v38  ;;  %v2218_v34 = vsel %vm2199_vm14, %v2185_v49, %v2169_v26  ;;  %v5566_v26 = vld [vmem:[#allocation2 + $0x20] sm:$0xff] }
 0x270   : > { %v2387_v24 = vmul.f32 %v2386_v53, %v5478_v9  ;;  %v2138_v48 = vadd.f32 %v2072_v20, %v1816_v36  ;;  %v2424_v31 = vadd.f32 0.112945676, %v2423_v4  ;;  %v1500_v22 = vmul.f32 %v5255_v19, %v5260_v61 }
 0x271   : > { %v2376_v3 = vmul.f32 %v2375_v7, %v5478_v9  ;;  %v2235_v57 = vmul.f32 %v5433_v14, %v2217_v2  ;;  %v2414_v12 = vmul.f32 %v2413_v55, %v5498_v18  ;;  %v1539_v62 = vmul.f32 %v5264_v29, %v5295_v47 }
 0x272   : > { %v2388_v38 = vadd.f32 1.0, %v2387_v24  ;;  %v2425_v16 = vmul.f32 %v2424_v31, %v5498_v18  ;;  %v1569_v49 = vadd.f32 %v1537_v5, %v1498_v11  ;;  %v1608_v58 = vmul.f32 %v5290_v60, %v5550_v1 }
 0x273   : > { %v5571_v36 = vadd.f32 %v5512_v32, %v2265_v41  ;;  %v5574_v9 = vmul.f32 0.5, %v5443_v54  ;;  %v2415_v4 = vadd.f32 0.18741608, %v2414_v12  ;;  %v2141_v7 = vadd.f32 %v2073_v39, %v1819_v6 }
 0x274   : > { %3761 = vrcp.f32 %v2388_v38  ;;  %v2238_v53 = vmul.f32 %v5433_v14, %v2218_v34  ;;  %v5579_v50 = vmul.f32 %v5253_v33, %v5268_v10  ;;  %v2377_v30 = vadd.f32 1.1283791, %v2376_v3 }
 0x275   : > { %v2426_v11 = vadd.f32 0.4994258, %v2425_v16  ;;  %v1571_v5 = vadd.f32 %v1539_v62, %v1500_v22  ;;  %v1610_v20 = vmul.f32 %v5290_v60, %v5566_v26  ;;  %v2398_v41 = vand.u32 2147483647, %v2388_v38 }
 0x276   : > { %v5583_v63 = vadd.f32 %v2235_v57, %v2138_v48  ;;  %v5585_v54 = vadd.f32 %v1608_v58, %v1569_v49  ;;  %v5588_v0 = vmul.f32 0.70710677, %v5553_v59  ;;  %v2416_v39 = vmul.f32 %v2415_v4, %v5498_v18 }
 0x277   : > { %v2427_v2 = vmul.f32 %v2426_v11, %v5498_v18  ;;  %v1678_v55 = vmul.f32 %v5310_v56, %v5249_v21  ;;  %v1856_v6 = vmul.f32 %v5335_v40, %v5249_v21  ;;  %v1716_v34 = vmul.f32 %v5317_v43, %v5293_v27 }
 0x278   : > { %v1858_v24 = vmul.f32 %v5335_v40, %v5260_v61  ;;  %v1894_v48 = vmul.f32 %v5358_v15, %v5293_v27  ;;  %v1896_v31 = vmul.f32 %v5358_v15, %v5295_v47  ;;  %v2378_v18 = vmul.f32 %v2377_v30, %v5455_v51 }
 0x279   : > { %v2400_v22 = vand.u32 2147483648, %v2388_v38  ;;  %v2428_v3 = vadd.f32 1.0, %v2427_v2  ;;  %v5605_v57 = vadd.f32 %v1610_v20, %v1571_v5  ;;  %v1964_v16 = vmul.f32 %v5375_v23, %v5550_v1 }
 0x27a   : > { %v3762_v12 = vpop.eup %3761  ;;  %v1926_v21 = vadd.f32 %v1894_v48, %v1856_v6  ;;  %v1928_v62 = vadd.f32 %v1896_v31, %v1858_v24  ;;  %v1966_v49 = vmul.f32 %v5375_v23, %v5566_v26  ;;  %vm2394_vm0 = vweird.f32 %v2388_v38 }
 0x27b   : > { %v2390_v58 = vmul.f32 %v3762_v12, %v2388_v38  ;;  %v2417_v4 = vadd.f32 1.1283791, %v2416_v39  ;;  %3763 = vrcp.f32 %v2428_v3  ;;  %vm5611_vm1 = vcmp.eq.f32.partialorder %v2398_v41, 8.507059e+37 }
 0x27c   : > { %v1748_v51 = vadd.f32 %v1716_v34, %v1678_v55  ;;  %v1786_v30 = vmul.f32 %v5348_v28, %v5550_v1  ;;  %vm2395_vm2 = vweird.f32 %v3762_v12  ;;  %v2446_v6 = vmul.f32 %v5588_v0, %v5588_v0 }
 0x27d   : > { %v2391_v20 = vsub.f32 1.0, %v2390_v58  ;;  %v2401_v24 = vor.u32 1.1754944e-38, %v2400_v22  ;;  %v2438_v39 = vand.u32 2147483647, %v2428_v3  ;;  %v5621_v48 = vadd.f32 %v1964_v16, %v1926_v21  ;;  %vm5629_vm3 = vmor %vm2394_vm0, %vm2395_vm2 }
 0x27e   : > { %v5623_v41 = vadd.f32 %v1966_v49, %v1928_v62  ;;  %v2418_v55 = vmul.f32 %v2417_v4, %v5481_v45  ;;  %v5626_v34 = vmin.f32 %v2446_v6, 16.0  ;;  %v2270_v23 = vadd.f32 %v2238_v53, %v2141_v7  ;;  %v7492_v4 = vld [vmem:[#allocation55_spill] sm:$0xff] }
 0x27f   : > { %v2392_v31 = vmul.f32 %v3762_v12, %v2391_v20  ;;  %vm2434_vm4 = vweird.f32 %v2428_v3  ;;  %v2440_v2 = vand.u32 2147483648, %v2428_v3  ;;  %v1818_v5 = vadd.f32 %v1786_v30, %v1748_v51 }
 0x280   : > { %v7483_v22 = vrot.slane %v5585_v54, 7  ;;  %v7484_v21 = vrot.slane %v5605_v57, 7  ;;  %v2448_v49 = vmul.f32 2.1237322e-06, %v5626_v34  ;;  %v2459_v38 = vmul.f32 3.8918573e-05, %v5626_v34 }
 0x281   : > { %v3764_v16 = vpop.eup %3763  ;;  %v2393_v45 = vadd.f32 %v3762_v12, %v2392_v31  ;;  %v5642_v7 = vadd.f32 %v5410_v13, %v2270_v23  ;;  %vm5644_vm5 = vcmp.eq.f32.partialorder %v2438_v39, 8.507059e+37 }
 0x282   : > { %v2090_v62 = vsel %vm2070_vm13, %v7484_v21, %v7483_v22  ;;  %v2430_v53 = vmul.f32 %v3764_v16, %v2428_v3  ;;  %v2449_v6 = vadd.f32 0.00028619796, %v2448_v49  ;;  %v2460_v31 = vadd.f32 0.001143296, %v2459_v38 }
 0x283   : > { %v2397_v20 = vsel %vm5629_vm3, %v3762_v12, %v2393_v45  ;;  %v5653_v22 = vmul.f32 0.70710677, %v5642_v7  ;;  %vm2435_vm6 = vweird.f32 %v3764_v16  ;;  %v2108_v39 = vmul.f32 %v5382_v46, %v2090_v62 }
 0x284   : > { %v2402_v23 = vsel %vm5611_vm1, %v2401_v24, %v2397_v20  ;;  %v2431_v21 = vsub.f32 1.0, %v2430_v53  ;;  %v2450_v51 = vmul.f32 %v2449_v6, %v5626_v34  ;;  %v2461_v30 = vmul.f32 %v2460_v31, %v5626_v34  ;;  %vm5671_vm7 = vmor %vm2434_vm4, %vm2435_vm6 }
 0x285   : > { %7487 = vst [vmem:[#allocation57_spill] sm:$0xff] %v5653_v22  ;;  %v2403_v13 = vmul.f32 %v2402_v23, %v2378_v18  ;;  %v2486_v12 = vmul.f32 %v5653_v22, %v5653_v22  ;;  %v2441_v45 = vor.u32 1.1754944e-38, %v2440_v2  ;;  %v7488_v49 = vrot.slane %v5623_v41, 1  ;;  %v5699_v22 = vld [vmem:[#allocation2 + $0x128] sm:$0xff] }
 0x286   : > { %v2432_v58 = vmul.f32 %v3764_v16, %v2431_v21  ;;  %v7489_v38 = vrot.slane %v5621_v48, 1  ;;  %v1503_v24 = vmul.f32 %v5253_v33, %v5276_v42  ;;  %v2451_v53 = vadd.f32 0.0036580483, %v2450_v51 }
 0x287   : > { %v3438_v18 = vclamps-f32 %v2403_v13, 1.0  ;;  %v2462_v20 = vadd.f32 0.014752088, %v2461_v30  ;;  %v5675_v6 = vmin.f32 %v2486_v12, 16.0  ;;  %v2140_v31 = vadd.f32 %v2108_v39, %v1818_v5 }
 0x288   : > { %v2203_v11 = vsel %vm2199_vm14, %v7489_v38, %v7488_v49  ;;  %v2433_v2 = vadd.f32 %v3764_v16, %v2432_v58  ;;  %v1540_v23 = vmul.f32 %v5262_v8, %v5429_v17  ;;  %v1542_v21 = vmul.f32 %v5262_v8, %v5431_v35 }
 0x289   : > { %v3006_v49 = vadd.f32 1.0, %v3438_v18  ;;  %v2452_v13 = vmul.f32 %v2451_v53, %v5626_v34  ;;  %v2463_v3 = vmul.f32 %v2462_v20, %v5626_v34  ;;  %v2488_v38 = vmul.f32 2.1237322e-06, %v5675_v6 }
 0x28a   : > { %v2437_v51 = vsel %vm5671_vm7, %v3764_v16, %v2433_v2  ;;  %v1680_v30 = vmul.f32 %v5310_v56, %v5260_v61  ;;  %v1718_v5 = vmul.f32 %v5317_v43, %v5295_v47  ;;  %v2499_v39 = vmul.f32 3.8918573e-05, %v5675_v6 }
 0x28b   : > { %v3022_v12 = vmul.f32 %v3006_v49, %v5574_v9  ;;  %v2442_v58 = vsel %vm5644_vm5, %v2441_v45, %v2437_v51  ;;  %v2453_v18 = vadd.f32 0.05243302, %v2452_v13  ;;  %v2464_v53 = vadd.f32 0.112945676, %v2463_v3 }
 0x28c   : > { %v2443_v20 = vmul.f32 %v2442_v58, %v2418_v55  ;;  %v1750_v8 = vadd.f32 %v1718_v5, %v1680_v30  ;;  %v1788_v16 = vmul.f32 %v5348_v28, %v5566_v26  ;;  %v2489_v62 = vadd.f32 0.00028619796, %v2488_v38 }
 0x28d   : > { %v3038_v61 = vmul.f32 %v3022_v12, %v5571_v36  ;;  %v2454_v2 = vmul.f32 %v2453_v18, %v5626_v34  ;;  %v2465_v33 = vmul.f32 %v2464_v53, %v5626_v34  ;;  %v2500_v46 = vadd.f32 0.001143296, %v2499_v39  ;;  %v5705_v36 = vld [vmem:[#allocation2 + $0x8] sm:$0xff]  ;;  %v7493_v12 = vld [vmem:[#allocation43_spill] sm:$0xff] }
 0x28e   : > { %v2305_v9 = vadd.f32 %v5512_v32, %v5583_v63  ;;  %v2335_v45 = vmul.f32 0.5, %v7492_v4  ;;  %v3439_v55 = vclamps-f32 %v2443_v20, 1.0  ;;  %v2490_v49 = vmul.f32 %v2489_v62, %v5675_v6 }
 0x28f   : > { %3090 = vmatmul.f32.vlgmr.msra.gmra.mxu2 %v3038_v61  ;;  %v2269_v13 = vadd.f32 %v2203_v11, %v2140_v31  ;;  %v2455_v3 = vadd.f32 0.18741608, %v2454_v2  ;;  %v2466_v38 = vadd.f32 0.4994258, %v2465_v33  ;;  %v1572_v51 = vadd.f32 %v1540_v23, %v5579_v50 }
 0x290   : > { %v3007_v30 = vadd.f32 1.0, %v3439_v55  ;;  %v1820_v5 = vadd.f32 %v1788_v16, %v1750_v8  ;;  %v1574_v39 = vadd.f32 %v1542_v21, %v1503_v24  ;;  %v1611_v58 = vmul.f32 %v7493_v12, %v5699_v22 }
 0x291   : > { %v2456_v63 = vmul.f32 %v2455_v3, %v5626_v34  ;;  %v2467_v18 = vmul.f32 %v2466_v38, %v5626_v34  ;;  %v2491_v53 = vadd.f32 0.0036580483, %v2490_v49  ;;  %v2501_v20 = vmul.f32 %v2500_v46, %v5675_v6 }
 0x292   : > { %v3023_v11 = vmul.f32 %v3007_v30, %v2335_v45  ;;  %v7494_v33 = vrot.slane %v5605_v57, 7  ;;  %v7495_v31 = vrot.slane %v5585_v54, 7  ;;  %v7496_v8 = vrot.slane %v5621_v48, 1 }
 0x293   : > { %v7497_v24 = vrot.slane %v5623_v41, 1  ;;  %v1613_v34 = vmul.f32 %v7493_v12, %v5705_v36  ;;  %v5728_v46 = vmul.f32 0.5, %v5553_v59  ;;  %v2468_v21 = vadd.f32 1.0, %v2467_v18 }
 0x294   : > { %v2074_v50 = vsel %vm2070_vm13, %v7495_v31, %v7494_v33  ;;  %v2492_v57 = vmul.f32 %v2491_v53, %v5675_v6  ;;  %v2502_v54 = vadd.f32 0.014752088, %v2501_v20  ;;  %v3039_v16 = vmul.f32 %v3023_v11, %v2305_v9  ;;  %v5759_v53 = vld [vmem:[#allocation2 + $0x110] sm:$0xff] }
 0x295   : > { %v2219_v23 = vsel %vm2199_vm14, %v7497_v24, %v7496_v8  ;;  %v5732_v62 = vadd.f32 %v5512_v32, %v2269_v13  ;;  %v5734_v48 = vadd.f32 %v1611_v58, %v1572_v51  ;;  %v1681_v41 = vmul.f32 %v5302_v44, %v5268_v10 }
 0x296   : > { %v2457_v61 = vadd.f32 1.1283791, %v2456_v63  ;;  %3765 = vrcp.f32 %v2468_v21  ;;  %v2142_v2 = vadd.f32 %v2074_v50, %v1820_v5  ;;  %v2239_v4 = vmul.f32 %v5433_v14, %v2219_v23  ;;  %v7500_v23 = vld [vmem:[#allocation47_spill] sm:$0xff] }
 0x297   : > { %v2493_v59 = vadd.f32 0.05243302, %v2492_v57  ;;  %v2503_v45 = vmul.f32 %v2502_v54, %v5675_v6  ;;  %v5740_v55 = vadd.f32 %v1613_v34, %v1574_v39  ;;  %v1719_v9 = vmul.f32 %v5315_v25, %v5429_v17  ;;  %3093 = vmatmul.f32.gmra.mxu2 %v3039_v16  ;;  %v5770_v54 = vld [vmem:[#allocation2 + $0x98] sm:$0xff] }
 0x298   : > { %v2478_v49 = vand.u32 2147483647, %v2468_v21  ;;  %v2480_v13 = vand.u32 2147483648, %v2468_v21  ;;  %v1502_v3 = vmul.f32 %v5255_v19, %v5293_v27  ;;  %v1541_v38 = vmul.f32 %v5264_v29, %v5550_v1 }
 0x299   : > { %v2494_v51 = vmul.f32 %v2493_v59, %v5675_v6  ;;  %v2504_v30 = vadd.f32 0.112945676, %v2503_v45  ;;  %v1504_v5 = vmul.f32 %v5255_v19, %v5295_v47  ;;  %v1543_v39 = vmul.f32 %v5264_v29, %v5566_v26 }
 0x29a   : > { %v2458_v58 = vmul.f32 %v2457_v61, %v5588_v0  ;;  %vm2474_vm8 = vweird.f32 %v2468_v21  ;;  %v5754_v63 = vadd.f32 %v2239_v4, %v2142_v2  ;;  %v5757_v18 = vmul.f32 0.5, %v5642_v7  ;;  %v7501_v4 = vld [vmem:[#allocation49_spill] sm:$0xff] }
 0x29b   : > { %v2495_v20 = vadd.f32 0.18741608, %v2494_v51  ;;  %v2505_v11 = vmul.f32 %v2504_v30, %v5675_v6  ;;  %v1751_v33 = vadd.f32 %v1719_v9, %v1681_v41  ;;  %v1789_v31 = vmul.f32 %v5331_v37, %v5699_v22 }
 0x29c   : > { %v3766_v50 = vpop.eup %3765  ;;  %vm5764_vm9 = vcmp.eq.f32.partialorder %v2478_v49, 8.507059e+37  ;;  %v2481_v0 = vor.u32 1.1754944e-38, %v2480_v13  ;;  %v1573_v24 = vadd.f32 %v1541_v38, %v1502_v3  ;;  %v1859_v7 = vmul.f32 %v7500_v23, %v5268_v10  ;;  %v7502_v3 = vld [vmem:[#allocation51_spill] sm:$0xff] }
 0x29d   : > { %v2470_v34 = vmul.f32 %v3766_v50, %v2468_v21  ;;  %v2506_v57 = vadd.f32 0.4994258, %v2505_v11  ;;  %v1575_v16 = vadd.f32 %v1543_v39, %v1504_v5  ;;  %v1612_v41 = vmul.f32 %v5290_v60, %v5759_v53  ;;  %v7506_v11 = vld [vmem:[#allocation52_spill] sm:$0xff] }
 0x29e   : > { %v2496_v61 = vmul.f32 %v2495_v20, %v5675_v6  ;;  %v1861_v2 = vmul.f32 %v7500_v23, %v5276_v42  ;;  %v1897_v59 = vmul.f32 %v7501_v4, %v5429_v17  ;;  %v1899_v45 = vmul.f32 %v7501_v4, %v5431_v35 }
 0x29f   : > { %v2471_v10 = vsub.f32 1.0, %v2470_v34  ;;  %vm2475_vm10 = vweird.f32 %v3766_v50  ;;  %v2507_v9 = vmul.f32 %v2506_v57, %v5675_v6  ;;  %v1821_v49 = vadd.f32 %v1789_v31, %v1751_v33 }
 0x2a0   : > { %v1614_v13 = vmul.f32 %v5290_v60, %v5770_v54  ;;  %v1967_v38 = vmul.f32 %v7502_v3, %v5699_v22  ;;  %v1969_v51 = vmul.f32 %v7502_v3, %v5705_v36  ;;  %v2042_v30 = vrot.slane %v5734_v48, 7  ;;  %vm5794_vm11 = vmor %vm2474_vm8, %vm2475_vm10 }
 0x2a1   : > { %v2472_v5 = vmul.f32 %v3766_v50, %v2471_v10  ;;  %v2508_v39 = vadd.f32 1.0, %v2507_v9  ;;  %v1682_v20 = vmul.f32 %v5310_v56, %v5293_v27  ;;  %v1720_v6 = vmul.f32 %v5317_v43, %v5550_v1 }
 0x2a2   : > { %v2497_v33 = vadd.f32 1.1283791, %v2496_v61  ;;  %v5798_v31 = vadd.f32 %v1612_v41, %v1573_v24  ;;  %v1929_v34 = vadd.f32 %v1897_v59, %v1859_v7  ;;  %v1931_v57 = vadd.f32 %v1899_v45, %v1861_v2  ;;  %v7505_v59 = vld [vmem:[#allocation57_spill] sm:$0xff] }
 0x2a3   : > { %v2473_v60 = vadd.f32 %v3766_v50, %v2472_v5  ;;  %3767 = vrcp.f32 %v2508_v39  ;;  %v1860_v48 = vmul.f32 %v5335_v40, %v5293_v27  ;;  %v1898_v10 = vmul.f32 %v5358_v15, %v5550_v1 }
 0x2a4   : > { %v5804_v9 = vadd.f32 %v1614_v13, %v1575_v16  ;;  %v5808_v21 = vmul.f32 %v5348_v28, %v5759_v53  ;;  %v1862_v24 = vmul.f32 %v5335_v40, %v5295_v47  ;;  %v1900_v7 = vmul.f32 %v5358_v15, %v5566_v26 }
 0x2a5   : > { %v2477_v41 = vsel %vm5794_vm11, %v3766_v50, %v2473_v60  ;;  %v5816_v61 = vadd.f32 %v1720_v6, %v1682_v20  ;;  %v1999_v27 = vadd.f32 %v1967_v38, %v1929_v34  ;;  %v2001_v2 = vadd.f32 %v1969_v51, %v1931_v57  ;;  %v7509_v34 = vld [vmem:[#allocation53_spill] sm:$0xff] }
 0x2a6   : > { %v2482_v16 = vsel %vm5764_vm9, %v2481_v0, %v2477_v41  ;;  %v2498_v45 = vmul.f32 %v2497_v33, %v7505_v59  ;;  %v2518_v13 = vand.u32 2147483647, %v2508_v39  ;;  %v2520_v5 = vand.u32 2147483648, %v2508_v39 }
 0x2a7   : > { %v2483_v29 = vmul.f32 %v2482_v16, %v2458_v58  ;;  %vm2514_vm12 = vweird.f32 %v2508_v39  ;;  %v1930_v47 = vadd.f32 %v1898_v10, %v1860_v48  ;;  %v2058_v40 = vrot.slane %v5740_v55, 7 }
 0x2a8   : > { %v1932_v15 = vadd.f32 %v1900_v7, %v1862_v24  ;;  %v1968_v60 = vmul.f32 %v7506_v11, %v5759_v53  ;;  %v2171_v50 = vrot.slane %v1999_v27, 1  ;;  %v2187_v20 = vrot.slane %v2001_v2, 1 }
 0x2a9   : > { %v3768_v38 = vpop.eup %3767  ;;  %v3440_v51 = vclamps-f32 %v2483_v29, 1.0  ;;  %v1970_v8 = vmul.f32 %v7506_v11, %v5770_v54  ;;  %v2091_v0 = vsel %vm2070_vm13, %v2058_v40, %v2042_v30  ;;  %v1683_v58 = vmul.f32 %v5302_v44, %v5276_v42 }
 0x2aa   : > { %v2510_v6 = vmul.f32 %v3768_v38, %v2508_v39  ;;  %vm5830_vm15 = vcmp.eq.f32.partialorder %v2518_v13, 8.507059e+37  ;;  %v2521_v33 = vor.u32 1.1754944e-38, %v2520_v5  ;;  %v2111_v57 = vmul.f32 %v7509_v34, %v2091_v0 }
 0x2ab   : > { %v3008_v48 = vadd.f32 1.0, %v3440_v51  ;;  %v7326_v29 = vrot.slane %v5798_v31, 7  ;;  %v2204_v10 = vsel %vm2199_vm14, %v2171_v50, %v2187_v20  ;;  %v1721_v24 = vmul.f32 %v5315_v25, %v5431_v35 }
 0x2ac   : > { %v2511_v7 = vsub.f32 1.0, %v2510_v6  ;;  %vm2515_vm0 = vweird.f32 %v3768_v38  ;;  %v2143_v42 = vadd.f32 %v2111_v57, %v1821_v49  ;;  %v1791_v41 = vmul.f32 %v5331_v37, %v5705_v36  ;;  %v5857_v57 = vld [vmem:[#allocation2 + $0xa8] sm:$0xff] }
 0x2ad   : > { %v3024_v27 = vmul.f32 %v3008_v48, %v5728_v46  ;;  %v7327_v2 = vrot.slane %v5804_v9, 7  ;;  %v1753_v16 = vadd.f32 %v1721_v24, %v1683_v58  ;;  %v2220_v59 = vsel %vm2199_vm14, %v2187_v20, %v2171_v50  ;;  %vm5852_vm1 = vmor %vm2514_vm12, %vm2515_vm0  ;;  %v7512_v50 = vld [vmem:[#allocation39_spill] sm:$0xff]  ;;  %v7513_v20 = vld [vmem:[#allocation54_spill] sm:$0xff] }
 0x2ae   : > { %v2512_v13 = vmul.f32 %v3768_v38, %v2511_v7  ;;  %v5846_v5 = vadd.f32 %v1968_v60, %v1930_v47  ;;  %v2272_v51 = vadd.f32 %v2204_v10, %v2143_v42  ;;  %v2075_v0 = vsel %vm2070_vm13, %v2042_v30, %v2058_v40  ;;  %v5876_v7 = vld [vmem:[#allocation2 + $0xe0] sm:$0xff] }
 0x2af   : > { %v3040_v49 = vmul.f32 %v3024_v27, %v5732_v62  ;;  %v1823_v46 = vadd.f32 %v1791_v41, %v1753_v16  ;;  %v2242_v58 = vmul.f32 %v5433_v14, %v2220_v59  ;;  %v1505_v47 = vmul.f32 %v7512_v50, %v5429_v17  ;;  %v7514_v62 = vld [vmem:[#allocation41_spill] sm:$0xff] }
 0x2b0   : > { %v2513_v60 = vadd.f32 %v3768_v38, %v2512_v13  ;;  %v5862_v48 = vadd.f32 %v7513_v20, %v2272_v51  ;;  %v1507_v40 = vmul.f32 %v7512_v50, %v5431_v35  ;;  %v1544_v30 = vmul.f32 %v7514_v62, %v5699_v22 }
 0x2b1   : > { %3096 = vmatmul.f32.gmra.mxu2 %v3040_v49  ;;  %v5868_v39 = vadd.f32 %v1970_v8, %v1932_v15  ;;  %v2092_v10 = vsel %vm2070_vm13, %v7327_v2, %v7326_v29  ;;  %v2145_v24 = vadd.f32 %v2075_v0, %v1823_v46  ;;  %v1546_v42 = vmul.f32 %v7514_v62, %v5705_v36 }
 0x2b2   : > { %v2517_v41 = vsel %vm5852_vm1, %v3768_v38, %v2513_v60  ;;  %v5883_v27 = vmul.f32 0.70710677, %v5862_v48  ;;  %v1576_v15 = vadd.f32 %v1544_v30, %v1505_v47  ;;  %v1615_v8 = vmul.f32 %v7493_v12, %v5857_v57 }
 0x2b3   : > { %v2309_v16 = vadd.f32 %v5512_v32, %v5754_v63  ;;  %v2522_v59 = vsel %vm5830_vm15, %v2521_v33, %v2517_v41  ;;  %v1822_v13 = vadd.f32 %v5808_v21, %v5816_v61  ;;  %v2274_v51 = vadd.f32 %v2242_v58, %v2145_v24 }
 0x2b4   : > { %v2523_v0 = vmul.f32 %v2522_v59, %v2498_v45  ;;  %v2526_v38 = vmul.f32 %v5883_v27, %v5883_v27  ;;  %v1578_v49 = vadd.f32 %v1546_v42, %v1507_v40  ;;  %v1617_v6 = vmul.f32 %v7493_v12, %v5876_v7 }
 0x2b5   : > { %v2112_v46 = vmul.f32 %v7509_v34, %v2092_v10  ;;  %v5901_v55 = vadd.f32 %v7513_v20, %v2274_v51  ;;  %v5905_v61 = vadd.f32 %v1615_v8, %v1576_v15  ;;  %v1863_v45 = vmul.f32 %v7500_v23, %v5429_v17 }
 0x2b6   : > { %v3441_v33 = vclamps-f32 %v2523_v0, 1.0  ;;  %v5903_v21 = vmin.f32 %v2526_v38, 16.0  ;;  %v1865_v60 = vmul.f32 %v7500_v23, %v5431_v35  ;;  %v1901_v40 = vmul.f32 %v7501_v4, %v5699_v22 }
 0x2b7   : > { %v5910_v58 = vmul.f32 0.70710677, %v5901_v55  ;;  %v1903_v30 = vmul.f32 %v7501_v4, %v5705_v36  ;;  %v5920_v41 = vadd.f32 %v1617_v6, %v1578_v49  ;;  %v1685_v8 = vmul.f32 %v5302_v44, %v5429_v17 }
 0x2b8   : > { %v3009_v10 = vadd.f32 1.0, %v3441_v33  ;;  %v2528_v24 = vmul.f32 2.1237322e-06, %v5903_v21  ;;  %v2539_v42 = vmul.f32 3.8918573e-05, %v5903_v21  ;;  %v1723_v59 = vmul.f32 %v5315_v25, %v5699_v22 }
 0x2b9   : > { %v2566_v15 = vmul.f32 %v5910_v58, %v5910_v58  ;;  %v1971_v51 = vmul.f32 %v7502_v3, %v5857_v57  ;;  %v1933_v29 = vadd.f32 %v1901_v40, %v1863_v45  ;;  %v1935_v49 = vadd.f32 %v1903_v30, %v1865_v60 }
 0x2ba   : > { %v3025_v0 = vmul.f32 %v3009_v10, %v5757_v18  ;;  %v2529_v38 = vadd.f32 0.00028619796, %v2528_v24  ;;  %v2540_v33 = vadd.f32 0.001143296, %v2539_v42  ;;  %v1973_v6 = vmul.f32 %v7502_v3, %v5876_v7 }
 0x2bb   : > { %v5931_v2 = vmin.f32 %v2566_v15, 16.0  ;;  %v7331_v47 = vrot.slane %v5905_v61, 7  ;;  %v7332_v23 = vrot.slane %v5920_v41, 7  ;;  %v2144_v12 = vadd.f32 %v2112_v46, %v1822_v13 }
 0x2bc   : > { %v3041_v17 = vmul.f32 %v3025_v0, %v2309_v16  ;;  %v2530_v63 = vmul.f32 %v2529_v38, %v5903_v21  ;;  %v2541_v4 = vmul.f32 %v2540_v33, %v5903_v21  ;;  %v1755_v30 = vadd.f32 %v1723_v59, %v1685_v8  ;;  %v3793_v59 = vld [vmem:[#allocation2 + $0xf0] sm:$0xff] }
 0x2bd   : > { %v2568_v18 = vmul.f32 2.1237322e-06, %v5931_v2  ;;  %v2579_v45 = vmul.f32 3.8918573e-05, %v5931_v2  ;;  %v1793_v10 = vmul.f32 %v5331_v37, %v5857_v57  ;;  %v7515_v16 = vrot.slane %v5868_v39, 1 }
 0x2be   : > { %3099 = vmatmul.f32.gmra.mxu2 %v3041_v17  ;;  %v2531_v40 = vadd.f32 0.0036580483, %v2530_v63  ;;  %v2542_v60 = vadd.f32 0.014752088, %v2541_v4  ;;  %v7516_v24 = vrot.slane %v5846_v5, 1  ;;  %v5949_v46 = vadd.f32 %v1971_v51, %v1933_v29 }
 0x2bf   : > { %v2569_v15 = vadd.f32 0.00028619796, %v2568_v18  ;;  %v2580_v13 = vadd.f32 0.001143296, %v2579_v45  ;;  %v5953_v4 = vadd.f32 %v1973_v6, %v1935_v49  ;;  %v2093_v8 = vsel %vm2070_vm13, %v7332_v23, %v7331_v47 }
 0x2c0   : > { %v2205_v42 = vsel %vm2199_vm14, %v7516_v24, %v7515_v16  ;;  %v2532_v0 = vmul.f32 %v2531_v40, %v5903_v21  ;;  %v2543_v63 = vmul.f32 %v2542_v60, %v5903_v21  ;;  %v1684_v38 = vmul.f32 %v3793_v59, %v5310_v56 }
 0x2c1   : > { %v1722_v29 = vmul.f32 %v5317_v43, %v5566_v26  ;;  %v2570_v51 = vmul.f32 %v2569_v15, %v5931_v2  ;;  %v2581_v33 = vmul.f32 %v2580_v13, %v5931_v2  ;;  %v2273_v17 = vadd.f32 %v2205_v42, %v2144_v12 }
 0x2c2   : > { %v2533_v49 = vadd.f32 0.05243302, %v2532_v0  ;;  %v2544_v6 = vadd.f32 0.112945676, %v2543_v63  ;;  %v1825_v18 = vadd.f32 %v1793_v10, %v1755_v30  ;;  %v1792_v40 = vmul.f32 %v5348_v28, %v5770_v54 }
 0x2c3   : > { %v1754_v45 = vadd.f32 %v1722_v29, %v1684_v38  ;;  %v2571_v60 = vadd.f32 0.0036580483, %v2570_v51  ;;  %v2582_v16 = vadd.f32 0.014752088, %v2581_v33  ;;  %v2115_v47 = vmul.f32 %v7509_v34, %v2093_v8  ;;  %v7517_v38 = vld [vmem:[#allocation42_spill] sm:$0xff] }
 0x2c4   : > { %v2534_v24 = vmul.f32 %v2533_v49, %v5903_v21  ;;  %v2545_v59 = vmul.f32 %v2544_v6, %v5903_v21  ;;  %v1687_v15 = vmul.f32 %v5302_v44, %v5431_v35  ;;  %v7335_v30 = vrot.slane %v5949_v46, 1 }
 0x2c5   : > { %v2572_v12 = vmul.f32 %v2571_v60, %v5931_v2  ;;  %v2583_v42 = vmul.f32 %v2582_v16, %v5931_v2  ;;  %v7334_v10 = vrot.slane %v5953_v4, 1  ;;  %v1824_v0 = vadd.f32 %v1792_v40, %v1754_v45 }
 0x2c6   : > { %v2546_v13 = vadd.f32 0.4994258, %v2545_v59  ;;  %v1506_v63 = vmul.f32 %v5255_v19, %v5550_v1  ;;  %v1545_v29 = vmul.f32 %v7517_v38, %v5759_v53  ;;  %v2535_v8 = vadd.f32 0.18741608, %v2534_v24  ;;  %v5994_v59 = vld [vmem:[#allocation2 + $0x90] sm:$0xff] }
 0x2c7   : > { %v7518_v51 = vrot.slane %v5804_v9, 7  ;;  %v7519_v35 = vrot.slane %v5798_v31, 7  ;;  %v7520_v49 = vrot.slane %v5846_v5, 1  ;;  %v7521_v6 = vrot.slane %v5868_v39, 1  ;;  %7522 = vst [vmem:[#allocation55_spill] sm:$0xff] %v5994_v59 }
 0x2c8   : > { %v2573_v40 = vadd.f32 0.05243302, %v2572_v12  ;;  %v2547_v60 = vmul.f32 %v2546_v13, %v5903_v21  ;;  %v2584_v16 = vadd.f32 0.112945676, %v2583_v42  ;;  %v2147_v24 = vadd.f32 %v2115_v47, %v1825_v18 }
 0x2c9   : > { %v2076_v33 = vsel %vm2070_vm13, %v7519_v35, %v7518_v51  ;;  %v2221_v45 = vsel %vm2199_vm14, %v7521_v6, %v7520_v49  ;;  %v1725_v31 = vmul.f32 %v5315_v25, %v5705_v36  ;;  %v1508_v5 = vmul.f32 %v5255_v19, %v5566_v26  ;;  %v6011_v51 = vld [vmem:[#allocation2 + $0x88] sm:$0xff] }
 0x2ca   : > { %v2574_v9 = vmul.f32 %v2573_v40, %v5931_v2  ;;  %v1547_v39 = vmul.f32 %v7517_v38, %v5770_v54  ;;  %v2206_v12 = vsel %vm2199_vm14, %v7335_v30, %v7334_v10  ;;  %v2548_v42 = vadd.f32 1.0, %v2547_v60  ;;  %v7523_v40 = vld [vmem:[#allocation44_spill] sm:$0xff] }
 0x2cb   : > { %v2146_v47 = vadd.f32 %v2076_v33, %v1824_v0  ;;  %v2243_v18 = vmul.f32 %v5433_v14, %v2221_v45  ;;  %v2585_v13 = vmul.f32 %v2584_v16, %v5931_v2  ;;  %v6014_v35 = vadd.f32 %v5512_v32, %v2273_v17 }
 0x2cc   : > { %v2536_v49 = vmul.f32 %v2535_v8, %v5903_v21  ;;  %v1577_v6 = vadd.f32 %v1545_v29, %v1506_v63  ;;  %v1616_v23 = vmul.f32 %v7523_v40, %v5994_v59  ;;  %v6020_v3 = vmul.f32 0.5, %v5862_v48 }
 0x2cd   : > { %3769 = vrcp.f32 %v2548_v42  ;;  %v2276_v0 = vadd.f32 %v2206_v12, %v2147_v24  ;;  %v1795_v33 = vmul.f32 %v5331_v37, %v5876_v7  ;;  %v2575_v45 = vadd.f32 0.18741608, %v2574_v9  ;;  %v7524_v9 = vld [vmem:[#allocation48_spill] sm:$0xff] }
 0x2ce   : > { %v2586_v60 = vadd.f32 0.4994258, %v2585_v13  ;;  %v1579_v16 = vadd.f32 %v1547_v39, %v1508_v5  ;;  %v1618_v17 = vmul.f32 %v7523_v40, %v6011_v51  ;;  %v6026_v10 = vadd.f32 %v2243_v18, %v2146_v47  ;;  %v7525_v47 = vld [vmem:[#allocation50_spill] sm:$0xff] }
 0x2cf   : > { %v1686_v21 = vmul.f32 %v5310_v56, %v5550_v1  ;;  %v1724_v48 = vmul.f32 %v5317_v43, %v5759_v53  ;;  %v1757_v63 = vadd.f32 %v1725_v31, %v1687_v15  ;;  %v2537_v29 = vadd.f32 1.1283791, %v2536_v49 }
 0x2d0   : > { %v2587_v8 = vmul.f32 %v2586_v60, %v5931_v2  ;;  %v6033_v24 = vadd.f32 %v1616_v23, %v1577_v6  ;;  %v1864_v5 = vmul.f32 %v7524_v9, %v5550_v1  ;;  %v2558_v39 = vand.u32 2147483647, %v2548_v42 }
 0x2d1   : > { %v1866_v12 = vmul.f32 %v7524_v9, %v5566_v26  ;;  %v1902_v18 = vmul.f32 %v7525_v47, %v5759_v53  ;;  %v1904_v13 = vmul.f32 %v7525_v47, %v5770_v54  ;;  %v2560_v30 = vand.u32 2147483648, %v2548_v42 }
 0x2d2   : > { %v2576_v15 = vmul.f32 %v2575_v45, %v5931_v2  ;;  %v6044_v31 = vadd.f32 1.0, %v2587_v8  ;;  %v6046_v23 = vadd.f32 %v1618_v17, %v1579_v16  ;;  %v1756_v6 = vadd.f32 %v1724_v48, %v1686_v21 }
 0x2d3   : > { %v3770_v49 = vpop.eup %3769  ;;  %v1794_v1 = vmul.f32 %v5348_v28, %v5994_v59  ;;  %v1934_v60 = vadd.f32 %v1902_v18, %v1864_v5  ;;  %v1972_v9 = vmul.f32 %v7506_v11, %v5994_v59  ;;  %v1936_v47 = vadd.f32 %v1904_v13, %v1866_v12 }
 0x2d4   : > { %v2550_v40 = vmul.f32 %v3770_v49, %v2548_v42  ;;  %3771 = vrcp.f32 %v6044_v31  ;;  %v1974_v2 = vmul.f32 %v7506_v11, %v6011_v51  ;;  %v2538_v45 = vmul.f32 %v2537_v29, %v5883_v27 }
 0x2d5   : > { %vm2554_vm2 = vweird.f32 %v2548_v42  ;;  %vm2555_vm3 = vweird.f32 %v3770_v49  ;;  %v7340_v16 = vrot.slane %v6033_v24, 7  ;;  %v2061_v21 = vrot.slane %v6046_v23, 7 }
 0x2d6   : > { %v2551_v17 = vsub.f32 1.0, %v2550_v40  ;;  %v6059_v48 = vadd.f32 %v7513_v20, %v2276_v0  ;;  %v1827_v8 = vadd.f32 %v1795_v33, %v1757_v63  ;;  %vm6061_vm4 = vcmp.eq.f32.partialorder %v2558_v39, 8.507059e+37  ;;  %vm6073_vm5 = vmor %vm2554_vm2, %vm2555_vm3 }
 0x2d7   : > { %v2561_v12 = vor.u32 1.1754944e-38, %v2560_v30  ;;  %v2577_v18 = vadd.f32 1.1283791, %v2576_v15  ;;  %v6065_v13 = vadd.f32 %v1972_v9, %v1934_v60  ;;  %v1826_v29 = vadd.f32 %v1794_v1, %v1756_v6 }
 0x2d8   : > { %v2552_v27 = vmul.f32 %v3770_v49, %v2551_v17  ;;  %v6067_v11 = vadd.f32 %v1974_v2, %v1936_v47  ;;  %v6070_v40 = vmul.f32 0.70710677, %v6059_v48  ;;  %vm2594_vm6 = vweird.f32 %v6044_v31 }
 0x2d9   : > { %v2094_v30 = vsel %vm2070_vm13, %v2061_v21, %v7340_v16  ;;  %v7530_v33 = vrot.slane %v5920_v41, 7  ;;  %v7531_v63 = vrot.slane %v5905_v61, 7  ;;  %v7532_v9 = vrot.slane %v5949_v46, 1 }
 0x2da   : > { %v7533_v39 = vrot.slane %v5953_v4, 1  ;;  %v3772_v15 = vpop.eup %3771  ;;  %v2553_v6 = vadd.f32 %v3770_v49, %v2552_v27  ;;  %v2606_v1 = vmul.f32 %v6070_v40, %v6070_v40  ;;  %v2598_v2 = vand.u32 2147483647, %v6044_v31 }
 0x2db   : > { %v2077_v42 = vsel %vm2070_vm13, %v7531_v63, %v7530_v33  ;;  %v2590_v61 = vmul.f32 %v3772_v15, %v6044_v31  ;;  %v2600_v17 = vand.u32 2147483648, %v6044_v31  ;;  %v2174_v46 = vrot.slane %v6065_v13, 1 }
 0x2dc   : > { %v2222_v47 = vsel %vm2199_vm14, %v7533_v39, %v7532_v9  ;;  %v2149_v60 = vadd.f32 %v2077_v42, %v1827_v8  ;;  %v2557_v4 = vsel %vm6073_vm5, %v3770_v49, %v2553_v6  ;;  %v2190_v33 = vrot.slane %v6067_v11, 1 }
 0x2dd   : > { %v2246_v41 = vmul.f32 %v5433_v14, %v2222_v47  ;;  %v6106_v27 = vmin.f32 %v2606_v1, 16.0  ;;  %v2562_v8 = vsel %vm6061_vm4, %v2561_v12, %v2557_v4  ;;  %v2591_v42 = vsub.f32 1.0, %v2590_v61 }
 0x2de   : > { %vm2595_vm7 = vweird.f32 %v3772_v15  ;;  %v2116_v9 = vmul.f32 %v7509_v34, %v2094_v30  ;;  %v2563_v39 = vmul.f32 %v2562_v8, %v2538_v45  ;;  %v2313_v49 = vadd.f32 %v5512_v32, %v6026_v10 }
 0x2df   : > { %v2278_v63 = vadd.f32 %v2246_v41, %v2149_v60  ;;  %v2608_v47 = vmul.f32 2.1237322e-06, %v6106_v27  ;;  %v2619_v16 = vmul.f32 3.8918573e-05, %v6106_v27  ;;  %v2339_v6 = vmul.f32 0.5, %v5901_v55  ;;  %vm6122_vm8 = vmor %vm2594_vm6, %vm2595_vm7 }
 0x2e0   : > { %v2578_v5 = vmul.f32 %v2577_v18, %v5910_v58  ;;  %v2592_v12 = vmul.f32 %v3772_v15, %v2591_v42  ;;  %v3442_v1 = vclamps-f32 %v2563_v39, 1.0  ;;  %v2601_v30 = vor.u32 1.1754944e-38, %v2600_v17 }
 0x2e1   : > { %v6114_v0 = vadd.f32 %v7513_v20, %v2278_v63  ;;  %v2609_v60 = vadd.f32 0.00028619796, %v2608_v47  ;;  %v2620_v41 = vadd.f32 0.001143296, %v2619_v16  ;;  %vm2599_vm9 = vcmp.eq.f32.partialorder %v2598_v2, 8.507059e+37 }
 0x2e2   : > { %v2593_v61 = vadd.f32 %v3772_v15, %v2592_v12  ;;  %v2148_v4 = vadd.f32 %v2116_v9, %v1826_v29  ;;  %v3010_v55 = vadd.f32 1.0, %v3442_v1  ;;  %v2207_v58 = vsel %vm2199_vm14, %v2174_v46, %v2190_v33 }
 0x2e3   : > { %v6127_v10 = vmul.f32 0.70710677, %v6114_v0  ;;  %v2610_v31 = vmul.f32 %v2609_v60, %v6106_v27  ;;  %v2621_v18 = vmul.f32 %v2620_v41, %v6106_v27  ;;  %v1509_v2 = vmul.f32 %v7512_v50, %v5699_v22 }
 0x2e4   : > { %v2597_v16 = vsel %vm6122_vm8, %v3772_v15, %v2593_v61  ;;  %v1548_v17 = vmul.f32 %v7514_v62, %v5857_v57  ;;  %v3026_v63 = vmul.f32 %v3010_v55, %v6020_v3  ;;  %v2277_v47 = vadd.f32 %v2207_v58, %v2148_v4 }
 0x2e5   : > { %v2646_v29 = vmul.f32 %v6127_v10, %v6127_v10  ;;  %v2602_v8 = vsel %vm2599_vm9, %v2601_v30, %v2597_v16  ;;  %v2611_v42 = vadd.f32 0.0036580483, %v2610_v31  ;;  %v2622_v9 = vadd.f32 0.014752088, %v2621_v18 }
 0x2e6   : > { %v2603_v39 = vmul.f32 %v2602_v8, %v2578_v5  ;;  %v1511_v15 = vmul.f32 %v7512_v50, %v5705_v36  ;;  %v3042_v1 = vmul.f32 %v3026_v63, %v6014_v35  ;;  %v1550_v41 = vmul.f32 %v7514_v62, %v5876_v7  ;;  %v6163_v63 = vld [vmem:[#allocation2 + $0xc0] sm:$0xff] }
 0x2e7   : > { %v6146_v12 = vmin.f32 %v2646_v29, 16.0  ;;  %v2612_v45 = vmul.f32 %v2611_v42, %v6106_v27  ;;  %v2623_v60 = vmul.f32 %v2622_v9, %v6106_v27  ;;  %v1688_v30 = vmul.f32 %v5310_v56, %v5566_v26  ;;  %v6167_v9 = vld [vmem:[#allocation2 + $0xd8] sm:$0xff] }
 0x2e8   : > { %v3443_v3 = vclamps-f32 %v2603_v39, 1.0  ;;  %v1726_v5 = vmul.f32 %v5317_v43, %v5770_v54  ;;  %3102 = vmatmul.f32.gmra.mxu2 %v3042_v1  ;;  %v1580_v58 = vadd.f32 %v1548_v17, %v1509_v2  ;;  %v1796_v16 = vmul.f32 %v5348_v28, %v6011_v51 }
 0x2e9   : > { %v2648_v61 = vmul.f32 2.1237322e-06, %v6146_v12  ;;  %v2613_v4 = vadd.f32 0.05243302, %v2612_v45  ;;  %v2624_v55 = vadd.f32 0.112945676, %v2623_v60  ;;  %v1689_v39 = vmul.f32 %v5302_v44, %v5699_v22 }
 0x2ea   : > { %v2659_v35 = vmul.f32 3.8918573e-05, %v6146_v12  ;;  %v3011_v31 = vadd.f32 1.0, %v3443_v3  ;;  %v1758_v18 = vadd.f32 %v1726_v5, %v1688_v30  ;;  %v1727_v45 = vmul.f32 %v5315_v25, %v5857_v57 }
 0x2eb   : > { %v2649_v29 = vadd.f32 0.00028619796, %v2648_v61  ;;  %v2614_v26 = vmul.f32 %v2613_v4, %v6106_v27  ;;  %v2625_v8 = vmul.f32 %v2624_v55, %v6106_v27  ;;  %v7536_v30 = vrot.slane %v6033_v24, 7  ;;  %v7537_v61 = vld [vmem:[#allocation43_spill] sm:$0xff] }
 0x2ec   : > { %v2660_v42 = vadd.f32 0.001143296, %v2659_v35  ;;  %v3027_v1 = vmul.f32 %v3011_v31, %v2339_v6  ;;  %v1828_v2 = vadd.f32 %v1796_v16, %v1758_v18  ;;  %v1619_v4 = vmul.f32 %v7537_v61, %v6163_v63 }
 0x2ed   : > { %v2650_v17 = vmul.f32 %v2649_v29, %v6146_v12  ;;  %v2615_v60 = vadd.f32 0.18741608, %v2614_v26  ;;  %v2626_v3 = vadd.f32 0.4994258, %v2625_v8  ;;  %v2078_v5 = vsel %vm2070_vm13, %v7536_v30, %v2061_v21 }
 0x2ee   : > { %v3043_v55 = vmul.f32 %v3027_v1, %v2313_v49  ;;  %v2223_v6 = vsel %vm2199_vm14, %v2190_v33, %v2174_v46  ;;  %v1582_v35 = vadd.f32 %v1550_v41, %v1511_v15  ;;  %v1621_v23 = vmul.f32 %v7537_v61, %v6167_v9  ;;  %v7539_v1 = vld [vmem:[#allocation49_spill] sm:$0xff] }
 0x2ef   : > { %v6191_v24 = vmul.f32 0.5, %v6059_v48  ;;  %v2627_v21 = vmul.f32 %v2626_v3, %v6106_v27  ;;  %v2651_v31 = vadd.f32 0.0036580483, %v2650_v17  ;;  %v2661_v18 = vmul.f32 %v2660_v42, %v6146_v12 }
 0x2f0   : > { %v2616_v49 = vmul.f32 %v2615_v60, %v6106_v27  ;;  %v2150_v13 = vadd.f32 %v2078_v5, %v1828_v2  ;;  %v1759_v16 = vadd.f32 %v1727_v45, %v1689_v39  ;;  %v1797_v11 = vmul.f32 %v5331_v37, %v6163_v63  ;;  %3105 = vmatmul.f32.gmra.mxu2 %v3043_v55  ;;  %v7538_v27 = vld [vmem:[#allocation47_spill] sm:$0xff] }
 0x2f1   : > { %v2628_v46 = vadd.f32 1.0, %v2627_v21  ;;  %v2247_v33 = vmul.f32 %v5433_v14, %v2223_v6  ;;  %v2652_v15 = vmul.f32 %v2651_v31, %v6146_v12  ;;  %v2662_v48 = vadd.f32 0.014752088, %v2661_v18  ;;  %v6216_v45 = vld [vmem:[#allocation2 + $0x118] sm:$0xff]  ;;  %v7540_v18 = vld [vmem:[#allocation44_spill] sm:$0xff] }
 0x2f2   : > { %v6201_v41 = vadd.f32 %v5512_v32, %v2277_v47  ;;  %v6203_v29 = vadd.f32 %v1619_v4, %v1580_v58  ;;  %v6205_v26 = vadd.f32 %v1621_v23, %v1582_v35  ;;  %v1867_v8 = vmul.f32 %v7538_v27, %v5699_v22  ;;  %v6227_v35 = vld [vmem:[#allocation2 + $0xa0] sm:$0xff] }
 0x2f3   : > { %3773 = vrcp.f32 %v2628_v46  ;;  %v1510_v42 = vmul.f32 %v5255_v19, %v5759_v53  ;;  %v1549_v39 = vmul.f32 %v7517_v38, %v5994_v59  ;;  %v1905_v2 = vmul.f32 %v7539_v1, %v5857_v57 }
 0x2f4   : > { %v2617_v17 = vadd.f32 1.1283791, %v2616_v49  ;;  %v2653_v47 = vadd.f32 0.05243302, %v2652_v15  ;;  %v2663_v58 = vmul.f32 %v2662_v48, %v6146_v12  ;;  %v6218_v60 = vadd.f32 %v1797_v11, %v1759_v16 }
 0x2f5   : > { %v2638_v3 = vand.u32 2147483647, %v2628_v46  ;;  %v6220_v22 = vadd.f32 %v2247_v33, %v2150_v13  ;;  %v1512_v30 = vmul.f32 %v5255_v19, %v5770_v54  ;;  %v1869_v5 = vmul.f32 %v7538_v27, %v5705_v36 }
 0x2f6   : > { %v2640_v4 = vand.u32 2147483648, %v2628_v46  ;;  %v2654_v55 = vmul.f32 %v2653_v47, %v6146_v12  ;;  %v2664_v6 = vadd.f32 0.112945676, %v2663_v58  ;;  %v1907_v23 = vmul.f32 %v7539_v1, %v5876_v7 }
 0x2f7   : > { %v1551_v21 = vmul.f32 %v7517_v38, %v6011_v51  ;;  %v1581_v31 = vadd.f32 %v1549_v39, %v1510_v42  ;;  %v1620_v49 = vmul.f32 %v7540_v18, %v6216_v45  ;;  %v1937_v13 = vadd.f32 %v1905_v2, %v1867_v8 }
 0x2f8   : > { %v2618_v16 = vmul.f32 %v2617_v17, %v6070_v40  ;;  %vm2634_vm10 = vweird.f32 %v2628_v46  ;;  %v2655_v11 = vadd.f32 0.18741608, %v2654_v55  ;;  %v2665_v33 = vmul.f32 %v2664_v6, %v6146_v12  ;;  %v7543_v6 = vld [vmem:[#allocation51_spill] sm:$0xff] }
 0x2f9   : > { %v3774_v15 = vpop.eup %3773  ;;  %vm6237_vm11 = vcmp.eq.f32.partialorder %v2638_v3, 8.507059e+37  ;;  %v1622_v47 = vmul.f32 %v7540_v18, %v6227_v35  ;;  %v1690_v42 = vmul.f32 %v5310_v56, %v5759_v53  ;;  %v1728_v8 = vmul.f32 %v5317_v43, %v5994_v59 }
 0x2fa   : > { %v2630_v39 = vmul.f32 %v3774_v15, %v2628_v46  ;;  %v2641_v40 = vor.u32 1.1754944e-38, %v2640_v4  ;;  %v2656_v2 = vmul.f32 %v2655_v11, %v6146_v12  ;;  %v2666_v17 = vadd.f32 0.4994258, %v2665_v33  ;;  %v7544_v11 = vld [vmem:[#allocation48_spill] sm:$0xff] }
 0x2fb   : > { %v1583_v58 = vadd.f32 %v1551_v21, %v1512_v30  ;;  %v6248_v55 = vadd.f32 %v1620_v49, %v1581_v31  ;;  %v1939_v3 = vadd.f32 %v1907_v23, %v1869_v5  ;;  %v1975_v38 = vmul.f32 %v7543_v6, %v6163_v63  ;;  %v7545_v49 = vld [vmem:[#allocation50_spill] sm:$0xff]  ;;  %v7548_v46 = vld [vmem:[#allocation52_spill] sm:$0xff] }
 0x2fc   : > { %v2631_v19 = vsub.f32 1.0, %v2630_v39  ;;  %vm2635_vm12 = vweird.f32 %v3774_v15  ;;  %v2667_v18 = vmul.f32 %v2666_v17, %v6146_v12  ;;  %v1977_v56 = vmul.f32 %v7543_v6, %v6167_v9 }
 0x2fd   : > { %v1760_v43 = vadd.f32 %v1728_v8, %v1690_v42  ;;  %v1798_v4 = vmul.f32 %v5348_v28, %v6216_v45  ;;  %v1868_v30 = vmul.f32 %v7544_v11, %v5759_v53  ;;  %v2046_v21 = vrot.slane %v6203_v29, 7  ;;  %vm6263_vm15 = vmor %vm2634_vm10, %vm2635_vm12 }
 0x2fe   : > { %v2632_v5 = vmul.f32 %v3774_v15, %v2631_v19  ;;  %v2657_v23 = vadd.f32 1.1283791, %v2656_v2  ;;  %v2668_v31 = vadd.f32 1.0, %v2667_v18  ;;  %v1906_v33 = vmul.f32 %v7545_v49, %v5994_v59 }
 0x2ff   : > { %v1870_v42 = vmul.f32 %v7544_v11, %v5770_v54  ;;  %v1908_v8 = vmul.f32 %v7545_v49, %v6011_v51  ;;  %v2007_v53 = vadd.f32 %v1975_v38, %v1937_v13  ;;  %v2062_v29 = vrot.slane %v6205_v26, 7 }
 0x300   : > { %v2633_v19 = vadd.f32 %v3774_v15, %v2632_v5  ;;  %3775 = vrcp.f32 %v2668_v31  ;;  %v6272_v18 = vadd.f32 %v1622_v47, %v1583_v58  ;;  %v2009_v39 = vadd.f32 %v1977_v56, %v1939_v3 }
 0x301   : > { %v6274_v2 = vadd.f32 %v1798_v4, %v1760_v43  ;;  %v1976_v17 = vmul.f32 %v7548_v46, %v6216_v45  ;;  %v1978_v59 = vmul.f32 %v7548_v46, %v6227_v35  ;;  %v2095_v54 = vsel %vm2070_vm13, %v2062_v29, %v2046_v21 }
 0x302   : > { %v2637_v38 = vsel %vm6263_vm15, %v3774_v15, %v2633_v19  ;;  %v6285_v26 = vmul.f32 %v2657_v23, %v6127_v10  ;;  %v1938_v13 = vadd.f32 %v1906_v33, %v1868_v30  ;;  %v2119_v56 = vmul.f32 %v7509_v34, %v2095_v54 }
 0x303   : > { %v2642_v43 = vsel %vm6237_vm11, %v2641_v40, %v2637_v38  ;;  %v1940_v47 = vadd.f32 %v1908_v8, %v1870_v42  ;;  %v7354_v58 = vrot.slane %v6248_v55, 7  ;;  %v2175_v3 = vrot.slane %v2007_v53, 1 }
 0x304   : > { %v2643_v4 = vmul.f32 %v2642_v43, %v2618_v16  ;;  %v7355_v5 = vrot.slane %v6272_v18, 7  ;;  %v2151_v46 = vadd.f32 %v2119_v56, %v6218_v60  ;;  %v2191_v12 = vrot.slane %v2009_v39, 1 }
 0x305   : > { %vm2674_vm0 = vweird.f32 %v2668_v31  ;;  %v2678_v15 = vand.u32 2147483647, %v2668_v31  ;;  %v1691_v10 = vmul.f32 %v5302_v44, %v5705_v36  ;;  %v1729_v30 = vmul.f32 %v5315_v25, %v5876_v7 }
 0x306   : > { %v3776_v48 = vpop.eup %3775  ;;  %v3444_v40 = vclamps-f32 %v2643_v4, 1.0  ;;  %v2680_v23 = vand.u32 2147483648, %v2668_v31  ;;  %v2208_v33 = vsel %vm2199_vm14, %v2175_v3, %v2191_v12  ;;  %v1799_v16 = vmul.f32 %v5331_v37, %v6167_v9 }
 0x307   : > { %v2670_v42 = vmul.f32 %v3776_v48, %v2668_v31  ;;  %v6301_v60 = vadd.f32 %v1976_v17, %v1938_v13  ;;  %v6303_v8 = vadd.f32 %v1978_v59, %v1940_v47  ;;  %v2280_v53 = vadd.f32 %v2208_v33, %v2151_v46 }
 0x308   : > { %v3012_v19 = vadd.f32 1.0, %v3444_v40  ;;  %v2096_v36 = vsel %vm2070_vm13, %v7355_v5, %v7354_v58  ;;  %v1761_v39 = vadd.f32 %v1729_v30, %v1691_v10  ;;  %v2224_v54 = vsel %vm2199_vm14, %v2191_v12, %v2175_v3 }
 0x309   : > { %v2671_v38 = vsub.f32 1.0, %v2670_v42  ;;  %vm2675_vm1 = vweird.f32 %v3776_v48  ;;  %v6314_v17 = vadd.f32 %v7513_v20, %v2280_v53  ;;  %v2079_v59 = vsel %vm2070_vm13, %v2046_v21, %v2062_v29 }
 0x30a   : > { %v3028_v46 = vmul.f32 %v3012_v19, %v6191_v24  ;;  %vm6319_vm2 = vcmp.eq.f32.partialorder %v2678_v15, 8.507059e+37  ;;  %v1831_v56 = vadd.f32 %v1799_v16, %v1761_v39  ;;  %v2250_v43 = vmul.f32 %v5433_v14, %v2224_v54  ;;  %vm6330_vm3 = vmor %vm2674_vm0, %vm2675_vm1 }
 0x30b   : > { %v2672_v47 = vmul.f32 %v3776_v48, %v2671_v38  ;;  %v2681_v4 = vor.u32 1.1754944e-38, %v2680_v23  ;;  %v2120_v3 = vmul.f32 %v7509_v34, %v2096_v36  ;;  %v6326_v12 = vmul.f32 0.70710677, %v6314_v17  ;;  %v6338_v23 = vld [vmem:[#allocation2 + $0x68] sm:$0xff]  ;;  %v6358_v38 = vld [vmem:[#allocation2 + $0x50] sm:$0xff] }
 0x30c   : > { %v3044_v10 = vmul.f32 %v3028_v46, %v6201_v41  ;;  %v7353_v24 = vrot.slane %v6301_v60, 1  ;;  %v7352_v29 = vrot.slane %v6303_v8, 1  ;;  %v2153_v15 = vadd.f32 %v2079_v59, %v1831_v56 }
 0x30d   : > { %v2673_v30 = vadd.f32 %v3776_v48, %v2672_v47  ;;  %v2686_v40 = vmul.f32 %v6326_v12, %v6326_v12  ;;  %v1513_v33 = vmul.f32 %v7512_v50, %v5857_v57  ;;  %v1552_v41 = vmul.f32 %v7514_v62, %v6163_v63 }
 0x30e   : > { %3108 = vmatmul.f32.gmra.mxu2 %v3044_v10  ;;  %v2341_v31 = vmul.f32 0.5, %v6114_v0  ;;  %v2282_v16 = vadd.f32 %v2250_v43, %v2153_v15  ;;  %v1515_v42 = vmul.f32 %v7512_v50, %v5876_v7  ;;  %v1554_v53 = vmul.f32 %v7514_v62, %v6167_v9 }
 0x30f   : > { %v2317_v19 = vadd.f32 %v5512_v32, %v6220_v22  ;;  %v2677_v36 = vsel %vm6330_vm3, %v3776_v48, %v2673_v30  ;;  %v6354_v39 = vadd.f32 %v2120_v3, %v6274_v2  ;;  %v6356_v54 = vmin.f32 %v2686_v40, 16.0 }
 0x310   : > { %v2682_v0 = vsel %vm6319_vm2, %v2681_v4, %v2677_v36  ;;  %v6368_v22 = vsel %vm2199_vm14, %v7353_v24, %v7352_v29  ;;  %v6371_v48 = vadd.f32 %v7513_v20, %v2282_v16  ;;  %v1623_v2 = vmul.f32 %v7537_v61, %v6338_v23 }
 0x311   : > { %v2683_v59 = vmul.f32 %v2682_v0, %v6285_v26  ;;  %v2688_v46 = vmul.f32 2.1237322e-06, %v6356_v54  ;;  %v2699_v13 = vmul.f32 3.8918573e-05, %v6356_v54  ;;  %v1584_v56 = vadd.f32 %v1552_v41, %v1513_v33 }
 0x312   : > { %v6379_v43 = vmul.f32 0.70710677, %v6371_v48  ;;  %v1586_v47 = vadd.f32 %v1554_v53, %v1515_v42  ;;  %v1625_v4 = vmul.f32 %v7537_v61, %v6358_v38  ;;  %v1871_v3 = vmul.f32 %v7538_v27, %v5857_v57 }
 0x313   : > { %v3445_v10 = vclamps-f32 %v2683_v59, 1.0  ;;  %v2689_v21 = vadd.f32 0.00028619796, %v2688_v46  ;;  %v2700_v15 = vadd.f32 0.001143296, %v2699_v13  ;;  %v1909_v26 = vmul.f32 %v7539_v1, %v6163_v63 }
 0x314   : > { %v2726_v30 = vmul.f32 %v6379_v43, %v6379_v43  ;;  %v1693_v40 = vmul.f32 %v5302_v44, %v5857_v57  ;;  %v1731_v33 = vmul.f32 %v5315_v25, %v6163_v63  ;;  %v1873_v41 = vmul.f32 %v7538_v27, %v5876_v7 }
 0x315   : > { %v3013_v16 = vadd.f32 1.0, %v3445_v10  ;;  %v2690_v42 = vmul.f32 %v2689_v21, %v6356_v54  ;;  %v2701_v53 = vmul.f32 %v2700_v15, %v6356_v54  ;;  %v1911_v36 = vmul.f32 %v7539_v1, %v6167_v9 }
 0x316   : > { %v6399_v0 = vmin.f32 %v2726_v30, 16.0  ;;  %v6401_v59 = vadd.f32 %v1623_v2, %v1584_v56  ;;  %v6403_v46 = vadd.f32 %v1625_v4, %v1586_v47  ;;  %v1801_v57 = vmul.f32 %v5331_v37, %v6338_v23 }
 0x317   : > { %v3029_v13 = vmul.f32 %v3013_v16, %v2341_v31  ;;  %v2691_v29 = vadd.f32 0.0036580483, %v2690_v42  ;;  %v2702_v24 = vadd.f32 0.014752088, %v2701_v53  ;;  %v1941_v10 = vadd.f32 %v1909_v26, %v1871_v3  ;;  %v3794_v31 = vld [vmem:[#allocation2 + $0x98] sm:$0xff]  ;;  %v7553_v16 = vld [vmem:[#allocation45_spill] sm:$0xff] }
 0x318   : > { %v2728_v21 = vmul.f32 2.1237322e-06, %v6399_v0  ;;  %v2739_v15 = vmul.f32 3.8918573e-05, %v6399_v0  ;;  %v1979_v58 = vmul.f32 %v7543_v6, %v6338_v23  ;;  %v1981_v2 = vmul.f32 %v7543_v6, %v6358_v38  ;;  %v7554_v3 = vld [vmem:[#allocation46_spill] sm:$0xff] }
 0x319   : > { %v3045_v56 = vmul.f32 %v3029_v13, %v2317_v19  ;;  %v2692_v47 = vmul.f32 %v2691_v29, %v6356_v54  ;;  %v2703_v4 = vmul.f32 %v2702_v24, %v6356_v54  ;;  %v1943_v30 = vadd.f32 %v1911_v36, %v1873_v41 }
 0x31a   : > { %v1692_v42 = vmul.f32 %v3794_v31, %v7553_v16  ;;  %v1730_v26 = vmul.f32 %v7554_v3, %v6011_v51  ;;  %v2729_v53 = vadd.f32 0.00028619796, %v2728_v21  ;;  %v2740_v5 = vadd.f32 0.001143296, %v2739_v15 }
 0x31b   : > { %3111 = vmatmul.f32.gmra.mxu2 %v3045_v56  ;;  %v2693_v1 = vadd.f32 0.05243302, %v2692_v47  ;;  %v2704_v27 = vadd.f32 0.112945676, %v2703_v4  ;;  %v7361_v61 = vrot.slane %v6401_v59, 7  ;;  %v1800_v24 = vmul.f32 %v5348_v28, %v6227_v35 }
 0x31c   : > { %v1762_v13 = vadd.f32 %v1730_v26, %v1692_v42  ;;  %v2730_v29 = vmul.f32 %v2729_v53, %v6399_v0  ;;  %v2741_v41 = vmul.f32 %v2740_v5, %v6399_v0  ;;  %v1763_v15 = vadd.f32 %v1731_v33, %v1693_v40 }
 0x31d   : > { %v2694_v36 = vmul.f32 %v2693_v1, %v6356_v54  ;;  %v2705_v21 = vmul.f32 %v2704_v27, %v6356_v54  ;;  %v6426_v56 = vadd.f32 %v1979_v58, %v1941_v10  ;;  %v6428_v31 = vadd.f32 %v1981_v2, %v1943_v30 }
 0x31e   : > { %v2731_v47 = vadd.f32 0.0036580483, %v2730_v29  ;;  %v2742_v4 = vadd.f32 0.014752088, %v2741_v41  ;;  %v1832_v26 = vadd.f32 %v1800_v24, %v1762_v13  ;;  %v7555_v53 = vrot.slane %v6403_v46, 7 }
 0x31f   : > { %v2695_v19 = vadd.f32 0.18741608, %v2694_v36  ;;  %v2706_v42 = vadd.f32 0.4994258, %v2705_v21  ;;  %v2281_v27 = vadd.f32 %v6368_v22, %v6354_v39  ;;  %v7556_v1 = vrot.slane %v6272_v18, 7 }
 0x320   : > { %v2097_v5 = vsel %vm2070_vm13, %v7555_v53, %v7361_v61  ;;  %v7557_v58 = vrot.slane %v6248_v55, 7  ;;  %v7558_v33 = vrot.slane %v6301_v60, 1  ;;  %v7559_v10 = vrot.slane %v6303_v8, 1  ;;  %v7561_v53 = vld [vmem:[#allocation40_spill] sm:$0xff] }
 0x321   : > { %v2732_v30 = vmul.f32 %v2731_v47, %v6399_v0  ;;  %v2707_v13 = vmul.f32 %v2706_v42, %v6356_v54  ;;  %v2743_v39 = vmul.f32 %v2742_v4, %v6399_v0  ;;  %v1833_v22 = vadd.f32 %v1801_v57, %v1763_v15  ;;  %v7560_v47 = vld [vmem:[#allocation55_spill] sm:$0xff]  ;;  %v7562_v15 = vld [vmem:[#allocation42_spill] sm:$0xff] }
 0x322   : > { %v2080_v40 = vsel %vm2070_vm13, %v7557_v58, %v7556_v1  ;;  %v2225_v2 = vsel %vm2199_vm14, %v7559_v10, %v7558_v33  ;;  %v7360_v18 = vrot.slane %v6426_v56, 1  ;;  %v2696_v55 = vmul.f32 %v2695_v19, %v6356_v54  ;;  %v6476_v33 = vld [vmem:[#allocation2 + $0xe8] sm:$0xff] }
 0x323   : > { %v2733_v24 = vadd.f32 0.05243302, %v2732_v30  ;;  %v2123_v29 = vmul.f32 %v7509_v34, %v2097_v5  ;;  %v7359_v60 = vrot.slane %v6428_v31, 1  ;;  %v2708_v8 = vadd.f32 1.0, %v2707_v13  ;;  %v6467_v5 = vld [vmem:[#allocation2 + $0x130] sm:$0xff] }
 0x324   : > { %v2154_v41 = vadd.f32 %v2080_v40, %v1832_v26  ;;  %v2251_v36 = vmul.f32 %v5433_v14, %v2225_v2  ;;  %v2744_v21 = vadd.f32 0.112945676, %v2743_v39  ;;  %v1514_v42 = vmul.f32 %v7561_v53, %v7560_v47 }
 0x325   : > { %v1516_v57 = vmul.f32 %v7561_v53, %v6011_v51  ;;  %v1553_v4 = vmul.f32 %v7562_v15, %v6216_v45  ;;  %v1555_v54 = vmul.f32 %v7562_v15, %v6227_v35  ;;  %3777 = vrcp.f32 %v2708_v8 }
 0x326   : > { %v2734_v19 = vmul.f32 %v2733_v24, %v6399_v0  ;;  %v6470_v26 = vadd.f32 %v5512_v32, %v2281_v27  ;;  %v6473_v1 = vmul.f32 0.5, %v6314_v17  ;;  %v2697_v58 = vadd.f32 1.1283791, %v2696_v55  ;;  %v7563_v55 = vld [vmem:[#allocation44_spill] sm:$0xff] }
 0x327   : > { %v2745_v40 = vmul.f32 %v2744_v21, %v6399_v0  ;;  %v6478_v10 = vadd.f32 %v2251_v36, %v2154_v41  ;;  %v2155_v2 = vadd.f32 %v2123_v29, %v1833_v22  ;;  %v2210_v30 = vsel %vm2199_vm14, %v7360_v18, %v7359_v60 }
 0x328   : > { %v1695_v27 = vmul.f32 %v5302_v44, %v5876_v7  ;;  %v1585_v13 = vadd.f32 %v1553_v4, %v1514_v42  ;;  %v1587_v39 = vadd.f32 %v1555_v54, %v1516_v57  ;;  %v1624_v24 = vmul.f32 %v7563_v55, %v6467_v5 }
 0x329   : > { %v2746_v17 = vadd.f32 0.4994258, %v2745_v40  ;;  %v2735_v21 = vadd.f32 0.18741608, %v2734_v19  ;;  %v1626_v22 = vmul.f32 %v7563_v55, %v6476_v33  ;;  %v1694_v29 = vmul.f32 %v7553_v16, %v7560_v47 }
 0x32a   : > { %v1732_v41 = vmul.f32 %v7554_v3, %v6216_v45  ;;  %v2698_v36 = vmul.f32 %v2697_v58, %v6326_v12  ;;  %vm2714_vm4 = vweird.f32 %v2708_v8  ;;  %v2718_v7 = vand.u32 2147483647, %v2708_v8 }
 0x32b   : > { %v2747_v42 = vmul.f32 %v2746_v17, %v6399_v0  ;;  %v3778_v57 = vpop.eup %3777  ;;  %v1872_v4 = vmul.f32 %v7544_v11, %v7560_v47  ;;  %v1874_v54 = vmul.f32 %v7544_v11, %v6011_v51  ;;  %v1910_v19 = vmul.f32 %v7545_v49, %v6216_v45 }
 0x32c   : > { %v1912_v40 = vmul.f32 %v7545_v49, %v6227_v35  ;;  %v2710_v60 = vmul.f32 %v3778_v57, %v2708_v8  ;;  %v2720_v18 = vand.u32 2147483648, %v2708_v8  ;;  %v6508_v58 = vadd.f32 %v1624_v24, %v1585_v13 }
 0x32d   : > { %v6506_v12 = vadd.f32 1.0, %v2747_v42  ;;  %v2736_v17 = vmul.f32 %v2735_v21, %v6399_v0  ;;  %v6511_v61 = vadd.f32 %v1626_v22, %v1587_v39  ;;  %v1764_v47 = vadd.f32 %v1732_v41, %v1694_v29  ;;  %v7564_v42 = vld [vmem:[#allocation52_spill] sm:$0xff] }
 0x32e   : > { %v2284_v55 = vadd.f32 %v2210_v30, %v2155_v2  ;;  %v2711_v6 = vsub.f32 1.0, %v2710_v60  ;;  %vm2715_vm5 = vweird.f32 %v3778_v57  ;;  %v1802_v11 = vmul.f32 %v5348_v28, %v6467_v5 }
 0x32f   : > { %3779 = vrcp.f32 %v6506_v12  ;;  %v1942_v49 = vadd.f32 %v1910_v19, %v1872_v4  ;;  %v1944_v15 = vadd.f32 %v1912_v40, %v1874_v54  ;;  %v1980_v53 = vmul.f32 %v7564_v42, %v6467_v5  ;;  %vm6528_vm7 = vmor %vm2714_vm4, %vm2715_vm5 }
 0x330   : > { %v1982_v13 = vmul.f32 %v7564_v42, %v6476_v33  ;;  %v2712_v0 = vmul.f32 %v3778_v57, %v2711_v6  ;;  %vm6520_vm6 = vcmp.eq.f32.partialorder %v2718_v7, 8.507059e+37  ;;  %v2721_v60 = vor.u32 1.1754944e-38, %v2720_v18 }
 0x331   : > { %v6525_v2 = vadd.f32 %v7513_v20, %v2284_v55  ;;  %v2737_v24 = vadd.f32 1.1283791, %v2736_v17  ;;  %v2049_v21 = vrot.slane %v6508_v58, 7  ;;  %v2065_v22 = vrot.slane %v6511_v61, 7 }
 0x332   : > { %v1733_v6 = vmul.f32 %v5315_v25, %v6167_v9  ;;  %v2713_v29 = vadd.f32 %v3778_v57, %v2712_v0  ;;  %vm2754_vm8 = vweird.f32 %v6506_v12  ;;  %v1834_v18 = vadd.f32 %v1802_v11, %v1764_v47 }
 0x333   : > { %v6538_v55 = vmul.f32 0.70710677, %v6525_v2  ;;  %v6540_v8 = vadd.f32 %v1980_v53, %v1942_v49  ;;  %v6542_v41 = vadd.f32 %v1982_v13, %v1944_v15  ;;  %v1803_v4 = vmul.f32 %v5331_v37, %v6358_v38 }
 0x334   : > { %v1765_v7 = vadd.f32 %v1733_v6, %v1695_v27  ;;  %v2717_v19 = vsel %vm6528_vm7, %v3778_v57, %v2713_v29  ;;  %v7569_v11 = vrot.slane %v6403_v46, 7  ;;  %v7570_v17 = vrot.slane %v6401_v59, 7 }
 0x335   : > { %v3780_v54 = vpop.eup %3779  ;;  %v2766_v40 = vmul.f32 %v6538_v55, %v6538_v55  ;;  %v7571_v53 = vrot.slane %v6426_v56, 1  ;;  %v7572_v15 = vrot.slane %v6428_v31, 1  ;;  %v2722_v57 = vsel %vm6520_vm6, %v2721_v60, %v2717_v19 }
 0x336   : > { %v2081_v49 = vsel %vm2070_vm13, %v7570_v17, %v7569_v11  ;;  %v2750_v47 = vmul.f32 %v3780_v54, %v6506_v12  ;;  %v2098_v59 = vsel %vm2070_vm13, %v2065_v22, %v2049_v21  ;;  %v1835_v46 = vadd.f32 %v1803_v4, %v1765_v7 }
 0x337   : > { %v2226_v27 = vsel %vm2199_vm14, %v7572_v15, %v7571_v53  ;;  %v2723_v13 = vmul.f32 %v2722_v57, %v2698_v36  ;;  %v2760_v56 = vand.u32 2147483648, %v6506_v12  ;;  %v6572_v31 = vmin.f32 %v2766_v40, 16.0 }
 0x338   : > { %v2254_v0 = vmul.f32 %v5433_v14, %v2226_v27  ;;  %v2751_v30 = vsub.f32 1.0, %v2750_v47  ;;  %vm2755_vm9 = vweird.f32 %v3780_v54  ;;  %v2758_v39 = vand.u32 2147483647, %v6506_v12 }
 0x339   : > { %v2157_v60 = vadd.f32 %v2081_v49, %v1835_v46  ;;  %v3446_v6 = vclamps-f32 %v2723_v13, 1.0  ;;  %v2124_v29 = vmul.f32 %v7509_v34, %v2098_v59  ;;  %v2768_v19 = vmul.f32 2.1237322e-06, %v6572_v31  ;;  %vm6583_vm10 = vmor %vm2754_vm8, %vm2755_vm9 }
 0x33a   : > { %v2779_v11 = vmul.f32 3.8918573e-05, %v6572_v31  ;;  %v2752_v7 = vmul.f32 %v3780_v54, %v2751_v30  ;;  %v7369_v36 = vrot.slane %v6540_v8, 1  ;;  %v7368_v4 = vrot.slane %v6542_v41, 1 }
 0x33b   : > { %v2286_v40 = vadd.f32 %v2254_v0, %v2157_v60  ;;  %v3014_v17 = vadd.f32 1.0, %v3446_v6  ;;  %v2761_v49 = vor.u32 1.1754944e-38, %v2760_v56  ;;  %v2769_v15 = vadd.f32 0.00028619796, %v2768_v19 }
 0x33c   : > { %v2780_v27 = vadd.f32 0.001143296, %v2779_v11  ;;  %v2738_v57 = vmul.f32 %v2737_v24, %v6379_v43  ;;  %v2753_v47 = vadd.f32 %v3780_v54, %v2752_v7  ;;  %vm2759_vm11 = vcmp.eq.f32.partialorder %v2758_v39, 8.507059e+37 }
 0x33d   : > { %v6589_v59 = vadd.f32 %v7513_v20, %v2286_v40  ;;  %v3030_v46 = vmul.f32 %v3014_v17, %v6473_v1  ;;  %v2156_v13 = vadd.f32 %v2124_v29, %v1834_v18  ;;  %v2770_v0 = vmul.f32 %v2769_v15, %v6572_v31 }
 0x33e   : > { %v2781_v12 = vmul.f32 %v2780_v27, %v6572_v31  ;;  %v2757_v30 = vsel %vm6583_vm10, %v3780_v54, %v2753_v47  ;;  %v2211_v43 = vsel %vm2199_vm14, %v7369_v36, %v7368_v4  ;;  %v2343_v60 = vmul.f32 0.5, %v6371_v48  ;;  %v6641_v4 = vld [vmem:[#allocation2 + $0x30] sm:$0xff] }
 0x33f   : > { %v6603_v24 = vmul.f32 0.70710677, %v6589_v59  ;;  %v3046_v1 = vmul.f32 %v3030_v46, %v6470_v26  ;;  %v2762_v18 = vsel %vm2759_vm11, %v2761_v49, %v2757_v30  ;;  %v2771_v56 = vadd.f32 0.0036580483, %v2770_v0 }
 0x340   : > { %v2782_v39 = vadd.f32 0.014752088, %v2781_v12  ;;  %v2763_v6 = vmul.f32 %v2762_v18, %v2738_v57  ;;  %v2321_v29 = vadd.f32 %v5512_v32, %v6478_v10  ;;  %v2285_v19 = vadd.f32 %v2211_v43, %v2156_v13 }
 0x341   : > { %v2806_v54 = vmul.f32 %v6603_v24, %v6603_v24  ;;  %3114 = vmatmul.f32.gmra.mxu2 %v3046_v1  ;;  %v2772_v11 = vmul.f32 %v2771_v56, %v6572_v31  ;;  %v1517_v17 = vmul.f32 %v7512_v50, %v6163_v63  ;;  %v1519_v48 = vmul.f32 %v7512_v50, %v6167_v9  ;;  %v6633_v56 = vld [vmem:[#allocation2 + $0x58] sm:$0xff] }
 0x342   : > { %v2783_v7 = vmul.f32 %v2782_v39, %v6572_v31  ;;  %v3447_v40 = vclamps-f32 %v2763_v6, 1.0  ;;  %v1556_v15 = vmul.f32 %v7514_v62, %v6338_v23  ;;  %v1558_v10 = vmul.f32 %v7514_v62, %v6358_v38 }
 0x343   : > { %v6613_v26 = vmin.f32 %v2806_v54, 16.0  ;;  %v2773_v53 = vadd.f32 0.05243302, %v2772_v11  ;;  %v1696_v57 = vmul.f32 %v7553_v16, %v6011_v51  ;;  %v1734_v12 = vmul.f32 %v7554_v3, %v6227_v35  ;;  %v7575_v11 = vld [vmem:[#allocation43_spill] sm:$0xff] }
 0x344   : > { %v2784_v49 = vadd.f32 0.112945676, %v2783_v7  ;;  %v3015_v27 = vadd.f32 1.0, %v3447_v40  ;;  %v1697_v30 = vmul.f32 %v5302_v44, %v6163_v63  ;;  %v1735_v51 = vmul.f32 %v5315_v25, %v6338_v23 }
 0x345   : > { %v2808_v47 = vmul.f32 2.1237322e-06, %v6613_v26  ;;  %v2819_v46 = vmul.f32 3.8918573e-05, %v6613_v26  ;;  %v2774_v13 = vmul.f32 %v2773_v53, %v6572_v31  ;;  %v1588_v54 = vadd.f32 %v1556_v15, %v1517_v17  ;;  %v7576_v17 = vld [vmem:[#allocation47_spill] sm:$0xff] }
 0x346   : > { %v2785_v0 = vmul.f32 %v2784_v49, %v6572_v31  ;;  %v3031_v43 = vmul.f32 %v3015_v27, %v2343_v60  ;;  %v1627_v7 = vmul.f32 %v7575_v11, %v6633_v56  ;;  %v1766_v53 = vadd.f32 %v1734_v12, %v1696_v57  ;;  %v7577_v12 = vld [vmem:[#allocation49_spill] sm:$0xff] }
 0x347   : > { %v2809_v1 = vadd.f32 0.00028619796, %v2808_v47  ;;  %v2820_v18 = vadd.f32 0.001143296, %v2819_v46  ;;  %v2775_v39 = vadd.f32 0.18741608, %v2774_v13  ;;  %v1804_v49 = vmul.f32 %v5348_v28, %v6476_v33 }
 0x348   : > { %v2786_v6 = vadd.f32 0.4994258, %v2785_v0  ;;  %v3047_v40 = vmul.f32 %v3031_v43, %v2321_v29  ;;  %v1590_v60 = vadd.f32 %v1558_v10, %v1519_v48  ;;  %v1629_v47 = vmul.f32 %v7575_v11, %v6641_v4 }
 0x349   : > { %v1805_v46 = vmul.f32 %v5331_v37, %v6633_v56  ;;  %v1875_v15 = vmul.f32 %v7576_v17, %v6163_v63  ;;  %v2810_v29 = vmul.f32 %v2809_v1, %v6613_v26  ;;  %v2821_v57 = vmul.f32 %v2820_v18, %v6613_v26 }
 0x34a   : > { %v2787_v27 = vmul.f32 %v2786_v6, %v6572_v31  ;;  %3117 = vmatmul.f32.gmra.mxu2 %v3047_v40  ;;  %v1767_v13 = vadd.f32 %v1735_v51, %v1697_v30  ;;  %v1877_v48 = vmul.f32 %v7576_v17, %v6167_v9  ;;  %v2776_v10 = vmul.f32 %v2775_v39, %v6572_v31 }
 0x34b   : > { %v1913_v43 = vmul.f32 %v7577_v12, %v6338_v23  ;;  %v1915_v6 = vmul.f32 %v7577_v12, %v6358_v38  ;;  %v6660_v63 = vmul.f32 0.5, %v6525_v2  ;;  %v1836_v40 = vadd.f32 %v1804_v49, %v1766_v53 }
 0x34c   : > { %v2788_v0 = vadd.f32 1.0, %v2787_v27  ;;  %v2811_v1 = vadd.f32 0.0036580483, %v2810_v29  ;;  %v2822_v36 = vadd.f32 0.014752088, %v2821_v57  ;;  %v6663_v30 = vadd.f32 %v5512_v32, %v2285_v19  ;;  %v7580_v57 = vld [vmem:[#allocation40_spill] sm:$0xff] }
 0x34d   : > { %v2082_v9 = vsel %vm2070_vm13, %v2049_v21, %v2065_v22  ;;  %v7578_v31 = vrot.slane %v6540_v8, 1  ;;  %v7579_v18 = vrot.slane %v6542_v41, 1  ;;  %v6679_v39 = vadd.f32 %v1627_v7, %v1588_v54  ;;  %v7581_v54 = vld [vmem:[#allocation42_spill] sm:$0xff] }
 0x34e   : > { %3781 = vrcp.f32 %v2788_v0  ;;  %v2812_v51 = vmul.f32 %v2811_v1, %v6613_v26  ;;  %v2823_v19 = vmul.f32 %v2822_v36, %v6613_v26  ;;  %v6681_v53 = vadd.f32 %v1629_v47, %v1590_v60  ;;  %v7582_v60 = vld [vmem:[#allocation51_spill] sm:$0xff] }
 0x34f   : > { %v2227_v2 = vsel %vm2199_vm14, %v7579_v18, %v7578_v31  ;;  %v2777_v61 = vadd.f32 1.1283791, %v2776_v10  ;;  %v6683_v58 = vadd.f32 %v1805_v46, %v1767_v13  ;;  %v1945_v49 = vadd.f32 %v1913_v43, %v1875_v15 }
 0x350   : > { %v1947_v21 = vadd.f32 %v1915_v6, %v1877_v48  ;;  %v2158_v22 = vadd.f32 %v2082_v9, %v1836_v40  ;;  %v2255_v8 = vmul.f32 %v5433_v14, %v2227_v2  ;;  %v2813_v41 = vadd.f32 0.05243302, %v2812_v51  ;;  %v6704_v2 = vld [vmem:[#allocation2 + $0x78] sm:$0xff] }
 0x351   : > { %v2824_v27 = vadd.f32 0.112945676, %v2823_v19  ;;  %v6687_v29 = vmul.f32 0.5, %v6589_v59  ;;  %v1518_v36 = vmul.f32 %v7580_v57, %v6216_v45  ;;  %v1557_v7 = vmul.f32 %v7581_v54, %v6467_v5  ;;  %v7583_v19 = vld [vmem:[#allocation44_spill] sm:$0xff] }
 0x352   : > { %v1983_v47 = vmul.f32 %v7582_v60, %v6633_v56  ;;  %v2814_v46 = vmul.f32 %v2813_v41, %v6613_v26  ;;  %v1520_v13 = vmul.f32 %v7580_v57, %v6227_v35  ;;  %v1985_v59 = vmul.f32 %v7582_v60, %v6641_v4 }
 0x353   : > { %v2825_v15 = vmul.f32 %v2824_v27, %v6613_v26  ;;  %v2778_v10 = vmul.f32 %v2777_v61, %v6538_v55  ;;  %v2798_v43 = vand.u32 2147483647, %v2788_v0  ;;  %v2800_v6 = vand.u32 2147483648, %v2788_v0 }
 0x354   : > { %v3782_v48 = vpop.eup %3781  ;;  %v1559_v40 = vmul.f32 %v7581_v54, %v6476_v33  ;;  %v2287_v9 = vadd.f32 %v2255_v8, %v2158_v22  ;;  %v2815_v31 = vadd.f32 0.18741608, %v2814_v46  ;;  %v1589_v51 = vadd.f32 %v1557_v7, %v1518_v36  ;;  %v6711_v54 = vld [vmem:[#allocation2 + $0x40] sm:$0xff] }
 0x355   : > { %v2790_v1 = vmul.f32 %v3782_v48, %v2788_v0  ;;  %v2826_v18 = vadd.f32 0.4994258, %v2825_v15  ;;  %v1628_v41 = vmul.f32 %v7583_v19, %v6704_v2  ;;  %vm2794_vm12 = vweird.f32 %v2788_v0 }
 0x356   : > { %vm2795_vm15 = vweird.f32 %v3782_v48  ;;  %vm6713_vm0 = vcmp.eq.f32.partialorder %v2798_v43, 8.507059e+37  ;;  %v2816_v8 = vmul.f32 %v2815_v31, %v6613_v26  ;;  %v1591_v36 = vadd.f32 %v1559_v40, %v1520_v13  ;;  %v7591_v31 = vld [vmem:[#allocation50_spill] sm:$0xff] }
 0x357   : > { %v2791_v55 = vsub.f32 1.0, %v2790_v1  ;;  %v2827_v61 = vmul.f32 %v2826_v18, %v6613_v26  ;;  %v1630_v7 = vmul.f32 %v7583_v19, %v6711_v54  ;;  %v2801_v15 = vor.u32 1.1754944e-38, %v2800_v6  ;;  %vm6722_vm1 = vmor %vm2794_vm12, %vm2795_vm15 }
 0x358   : > { %v6720_v1 = vadd.f32 %v1983_v47, %v1945_v49  ;;  %v6727_v43 = vadd.f32 %v5512_v32, %v2287_v9  ;;  %v6729_v18 = vadd.f32 %v1628_v41, %v1589_v51  ;;  %v6731_v27 = vadd.f32 %v1985_v59, %v1947_v21  ;;  %v7590_v47 = vld [vmem:[#allocation48_spill] sm:$0xff] }
 0x359   : > { %v2792_v46 = vmul.f32 %v3782_v48, %v2791_v55  ;;  %v2828_v57 = vadd.f32 1.0, %v2827_v61  ;;  %v7588_v26 = vrot.slane %v6679_v39, 7  ;;  %v7589_v13 = vrot.slane %v6681_v53, 7 }
 0x35a   : > { %v1876_v40 = vmul.f32 %v7590_v47, %v6216_v45  ;;  %v1914_v9 = vmul.f32 %v7591_v31, %v6467_v5  ;;  %v2817_v55 = vadd.f32 1.1283791, %v2816_v8  ;;  %v6743_v51 = vadd.f32 %v1630_v7, %v1591_v36 }
 0x35b   : > { %v2099_v6 = vsel %vm2070_vm13, %v7589_v13, %v7588_v26  ;;  %v2793_v49 = vadd.f32 %v3782_v48, %v2792_v46  ;;  %3783 = vrcp.f32 %v2828_v57  ;;  %v6747_v21 = vmul.f32 %v7553_v16, %v6216_v45 }
 0x35c   : > { %v6751_v59 = vmul.f32 %v7554_v3, %v6467_v5  ;;  %v6757_v61 = vmul.f32 %v7590_v47, %v6227_v35  ;;  %v2127_v46 = vmul.f32 %v7509_v34, %v2099_v6  ;;  %v6765_v45 = vmul.f32 %v7591_v31, %v6476_v33 }
 0x35d   : > { %v2797_v41 = vsel %vm6722_vm1, %v3782_v48, %v2793_v49  ;;  %v6769_v7 = vmul.f32 %v7564_v42, %v6704_v2  ;;  %v6773_v48 = vmul.f32 %v7564_v42, %v6711_v54  ;;  %v6775_v0 = vadd.f32 %v1914_v9, %v1876_v40  ;;  %v1482_v40 = vld [vmem:[#allocation2 + $0x28] sm:$0xff]  ;;  %v6790_v9 = vld [vmem:[#allocation2 + $0xb8] sm:$0xff] }
 0x35e   : > { %v2802_v36 = vsel %vm6713_vm0, %v2801_v15, %v2797_v41  ;;  %v2159_v26 = vadd.f32 %v2127_v46, %v6683_v58  ;;  %v7376_v22 = vrot.slane %v6731_v27, 1  ;;  %v2818_v15 = vmul.f32 %v2817_v55, %v6603_v24 }
 0x35f   : > { %v2803_v35 = vmul.f32 %v2802_v36, %v2778_v10  ;;  %v2838_v13 = vand.u32 2147483647, %v2828_v57  ;;  %v1521_v6 = vmul.f32 %v7512_v50, %v6338_v23  ;;  %v1523_v49 = vmul.f32 %v7512_v50, %v6358_v38 }
 0x360   : > { %v7592_v10 = vrot.slane %v6720_v1, 1  ;;  %v1560_v24 = vmul.f32 %v7514_v62, %v6633_v56  ;;  %v1562_v55 = vmul.f32 %v7514_v62, %v6641_v4  ;;  %vm2834_vm2 = vweird.f32 %v2828_v57 }
 0x361   : > { %v3784_v41 = vpop.eup %3783  ;;  %v3448_v8 = vclamps-f32 %v2803_v35, 1.0  ;;  %v2840_v50 = vand.u32 2147483648, %v2828_v57  ;;  %v1633_v31 = vmul.f32 %v7575_v11, %v6790_v9  ;;  %vm6803_vm4 = vcmp.eq.f32.partialorder %v2838_v13, 8.507059e+37 }
 0x362   : > { %v2212_v58 = vsel %vm2199_vm14, %v7592_v10, %v7376_v22  ;;  %v2830_v46 = vmul.f32 %v3784_v41, %v2828_v57  ;;  %vm2835_vm3 = vweird.f32 %v3784_v41  ;;  %v1592_v32 = vadd.f32 %v1560_v24, %v1521_v6 }
 0x363   : > { %v2288_v36 = vadd.f32 %v2212_v58, %v2159_v26  ;;  %v3016_v35 = vadd.f32 1.0, %v3448_v8  ;;  %v1594_v42 = vadd.f32 %v1562_v55, %v1523_v49  ;;  %v1631_v22 = vmul.f32 %v7575_v11, %v1482_v40  ;;  %vm6819_vm5 = vmor %vm2834_vm2, %vm2835_vm3 }
 0x364   : > { %v2831_v3 = vsub.f32 1.0, %v2830_v46  ;;  %v1701_v8 = vmul.f32 %v5302_v44, %v6338_v23  ;;  %v1739_v26 = vmul.f32 %v5315_v25, %v6633_v56  ;;  %v2841_v49 = vor.u32 1.1754944e-38, %v2840_v50 }
 0x365   : > { %v6797_v10 = vadd.f32 %v7513_v20, %v2288_v36  ;;  %v3032_v47 = vmul.f32 %v3016_v35, %v6660_v63  ;;  %v6814_v24 = vadd.f32 %v1631_v22, %v1592_v32  ;;  %v6823_v13 = vadd.f32 %v1633_v31, %v1594_v42 }
 0x366   : > { %v2832_v6 = vmul.f32 %v3784_v41, %v2831_v3  ;;  %v1771_v55 = vadd.f32 %v1739_v26, %v1701_v8  ;;  %v1809_v46 = vmul.f32 %v5331_v37, %v1482_v40  ;;  %v1879_v32 = vmul.f32 %v7576_v17, %v6338_v23 }
 0x367   : > { %v6812_v58 = vmul.f32 0.70710677, %v6797_v10  ;;  %v3048_v11 = vmul.f32 %v3032_v47, %v6663_v30  ;;  %v1881_v30 = vmul.f32 %v7576_v17, %v6358_v38  ;;  %v1917_v47 = vmul.f32 %v7577_v12, %v6633_v56 }
 0x368   : > { %v2833_v3 = vadd.f32 %v3784_v41, %v2832_v6  ;;  %v1841_v57 = vadd.f32 %v1809_v46, %v1771_v55  ;;  %v1919_v42 = vmul.f32 %v7577_v12, %v6641_v4  ;;  %v1987_v31 = vmul.f32 %v7582_v60, %v1482_v40 }
 0x369   : > { %v2846_v50 = vmul.f32 %v6812_v58, %v6812_v58  ;;  %3120 = vmatmul.f32.gmra.mxu2 %v3048_v11  ;;  %v1989_v23 = vmul.f32 %v7582_v60, %v6790_v9  ;;  %v2052_v17 = vrot.slane %v6814_v24, 7  ;;  %v1949_v8 = vadd.f32 %v1917_v47, %v1879_v32 }
 0x36a   : > { %v2837_v22 = vsel %vm6819_vm5, %v3784_v41, %v2833_v3  ;;  %v1951_v56 = vadd.f32 %v1919_v42, %v1881_v30  ;;  %v2068_v26 = vrot.slane %v6823_v13, 7  ;;  %v3795_v41 = vld [vmem:[#allocation2 + $0xd8] sm:$0xff]  ;;  %v1807_v47 = vmul.f32 %v5331_v37, %v6641_v4 }
 0x36b   : > { %v6839_v36 = vmin.f32 %v2846_v50, 16.0  ;;  %v2842_v35 = vsel %vm6803_vm4, %v2841_v49, %v2837_v22  ;;  %v1699_v11 = vmul.f32 %v3795_v41, %v5302_v44  ;;  %v6850_v63 = vadd.f32 %v1987_v31, %v1949_v8 }
 0x36c   : > { %v2843_v12 = vmul.f32 %v2842_v35, %v2818_v15  ;;  %v6852_v60 = vadd.f32 %v1989_v23, %v1951_v56  ;;  %v2101_v62 = vsel %vm2070_vm13, %v2068_v26, %v2052_v17  ;;  %v1737_v15 = vmul.f32 %v5315_v25, %v6358_v38 }
 0x36d   : > { %v2848_v40 = vmul.f32 2.1237322e-06, %v6839_v36  ;;  %v2859_v6 = vmul.f32 3.8918573e-05, %v6839_v36  ;;  %v2131_v3 = vmul.f32 %v7509_v34, %v2101_v62  ;;  %v2181_v50 = vrot.slane %v6850_v63, 1 }
 0x36e   : > { %v3449_v49 = vclamps-f32 %v2843_v12, 1.0  ;;  %v2197_v32 = vrot.slane %v6852_v60, 1  ;;  %v1769_v30 = vadd.f32 %v1737_v15, %v1699_v11  ;;  %v7597_v56 = vrot.slane %v6681_v53, 7 }
 0x36f   : > { %v2849_v55 = vadd.f32 0.00028619796, %v2848_v40  ;;  %v2860_v46 = vadd.f32 0.001143296, %v2859_v6  ;;  %v2163_v23 = vadd.f32 %v2131_v3, %v1841_v57  ;;  %v7598_v12 = vrot.slane %v6679_v39, 7 }
 0x370   : > { %v3017_v42 = vadd.f32 1.0, %v3449_v49  ;;  %v2214_v35 = vsel %vm2199_vm14, %v2181_v50, %v2197_v32  ;;  %v1839_v8 = vadd.f32 %v1807_v47, %v1769_v30  ;;  %v7599_v6 = vrot.slane %v6720_v1, 1 }
 0x371   : > { %v2850_v31 = vmul.f32 %v2849_v55, %v6839_v36  ;;  %v2861_v22 = vmul.f32 %v2860_v46, %v6839_v36  ;;  %v2083_v40 = vsel %vm2070_vm13, %v7598_v12, %v7597_v56  ;;  %v7600_v41 = vrot.slane %v6731_v27, 1 }
 0x372   : > { %v3033_v11 = vmul.f32 %v3017_v42, %v6687_v29  ;;  %v2292_v49 = vadd.f32 %v2214_v35, %v2163_v23  ;;  %v1948_v53 = vadd.f32 %v6765_v45, %v6757_v61  ;;  %v2051_v39 = vrot.slane %v6729_v18, 7 }
 0x373   : > { %v2228_v57 = vsel %vm2199_vm14, %v7600_v41, %v7599_v6  ;;  %v2851_v62 = vadd.f32 0.0036580483, %v2850_v31  ;;  %v2862_v15 = vadd.f32 0.014752088, %v2861_v22  ;;  %v2161_v55 = vadd.f32 %v2083_v40, %v1839_v8  ;;  %v7601_v6 = vld [vmem:[#allocation40_spill] sm:$0xff] }
 0x374   : > { %v2258_v46 = vmul.f32 %v5433_v14, %v2228_v57  ;;  %v3049_v1 = vmul.f32 %v3033_v11, %v6727_v43  ;;  %v2067_v27 = vrot.slane %v6743_v51, 7  ;;  %v6897_v47 = vadd.f32 %v7513_v20, %v2292_v49  ;;  %v7602_v11 = vld [vmem:[#allocation42_spill] sm:$0xff] }
 0x375   : > { %v2852_v3 = vmul.f32 %v2851_v62, %v6839_v36  ;;  %v2863_v30 = vmul.f32 %v2862_v15, %v6839_v36  ;;  %v1768_v61 = vadd.f32 %v6751_v59, %v6747_v21  ;;  %v1806_v45 = vmul.f32 %v5348_v28, %v6704_v2 }
 0x376   : > { %3123 = vmatmul.f32.gmra.mxu2 %v3049_v1  ;;  %v2290_v42 = vadd.f32 %v2258_v46, %v2161_v55  ;;  %v6905_v43 = vadd.f32 %v6769_v7, %v6775_v0  ;;  %v6908_v22 = vadd.f32 %v6773_v48, %v1948_v53  ;;  %v2100_v23 = vsel %vm2070_vm13, %v2067_v27, %v2051_v39  ;;  %v6936_v53 = vld [vmem:[#allocation2] sm:$0xff] }
 0x377   : > { %v2864_v29 = vadd.f32 0.112945676, %v2863_v30  ;;  %v2853_v31 = vadd.f32 0.05243302, %v2852_v3  ;;  %v6918_v35 = vmul.f32 0.70710677, %v6897_v47  ;;  %v1838_v7 = vadd.f32 %v1806_v45, %v1768_v61 }
 0x378   : > { %v6921_v8 = vadd.f32 %v7513_v20, %v2290_v42  ;;  %v2128_v48 = vmul.f32 %v7509_v34, %v2100_v23  ;;  %v2180_v56 = vrot.slane %v6905_v43, 1  ;;  %v2196_v12 = vrot.slane %v6908_v22, 1  ;;  %v6938_v55 = vld [vmem:[#allocation2 + $0x60] sm:$0xff] }
 0x379   : > { %v2865_v21 = vmul.f32 %v2864_v29, %v6839_v36  ;;  %v2854_v0 = vmul.f32 %v2853_v31, %v6839_v36  ;;  %v1522_v41 = vmul.f32 %v7601_v6, %v6467_v5  ;;  %v1524_v57 = vmul.f32 %v7601_v6, %v6476_v33 }
 0x37a   : > { %v1561_v62 = vmul.f32 %v7602_v11, %v6704_v2  ;;  %v1563_v15 = vmul.f32 %v7602_v11, %v6711_v54  ;;  %v2926_v46 = vmul.f32 %v6918_v35, %v6918_v35  ;;  %v6943_v1 = vmul.f32 0.70710677, %v6921_v8 }
 0x37b   : > { %v2866_v59 = vadd.f32 0.4994258, %v2865_v21  ;;  %v2160_v3 = vadd.f32 %v2128_v48, %v1838_v7  ;;  %v2855_v30 = vadd.f32 0.18741608, %v2854_v0  ;;  %v2213_v29 = vsel %vm2199_vm14, %v2180_v56, %v2196_v12 }
 0x37c   : > { %v1703_v42 = vmul.f32 %v5302_v44, %v6358_v38  ;;  %v1741_v61 = vmul.f32 %v5315_v25, %v6641_v4  ;;  %v1593_v45 = vadd.f32 %v1561_v62, %v1522_v41  ;;  %v1595_v31 = vadd.f32 %v1563_v15, %v1524_v57 }
 0x37d   : > { %v2867_v40 = vmul.f32 %v2866_v59, %v6839_v36  ;;  %v1632_v23 = vmul.f32 %v7583_v19, %v6936_v53  ;;  %v1634_v21 = vmul.f32 %v7583_v19, %v6938_v55  ;;  %v6959_v59 = vmin.f32 %v2926_v46, 16.0 }
 0x37e   : > { %v2886_v7 = vmul.f32 %v6943_v1, %v6943_v1  ;;  %v6963_v48 = vadd.f32 %v2213_v29, %v2160_v3  ;;  %v6966_v44 = vmul.f32 0.5, %v6797_v10  ;;  %v2856_v25 = vmul.f32 %v2855_v30, %v6839_v36 }
 0x37f   : > { %v2868_v49 = vadd.f32 1.0, %v2867_v40  ;;  %v2928_v38 = vmul.f32 2.1237322e-06, %v6959_v59  ;;  %v2939_v4 = vmul.f32 3.8918573e-05, %v6959_v59  ;;  %v1773_v40 = vadd.f32 %v1741_v61, %v1703_v42  ;;  %v7603_v42 = vld [vmem:[#allocation48_spill] sm:$0xff] }
 0x380   : > { %v6971_v0 = vmin.f32 %v2886_v7, 16.0  ;;  %v6973_v19 = vadd.f32 %v1632_v23, %v1593_v45  ;;  %v6975_v6 = vadd.f32 %v1634_v21, %v1595_v31  ;;  %v1811_v41 = vmul.f32 %v5331_v37, %v6790_v9 }
 0x381   : > { %3785 = vrcp.f32 %v2868_v49  ;;  %v2085_v10 = vsel %vm2070_vm13, %v2052_v17, %v2068_v26  ;;  %v6987_v57 = vmul.f32 %v7553_v16, %v6467_v5  ;;  %v2929_v11 = vadd.f32 0.00028619796, %v2928_v38 }
 0x382   : > { %v2940_v62 = vadd.f32 0.001143296, %v2939_v4  ;;  %v2888_v15 = vmul.f32 2.1237322e-06, %v6971_v0  ;;  %v2857_v46 = vadd.f32 1.1283791, %v2856_v25  ;;  %vm2874_vm6 = vweird.f32 %v2868_v49 }
 0x383   : > { %v2899_v37 = vmul.f32 3.8918573e-05, %v6971_v0  ;;  %v2880_v9 = vand.u32 2147483648, %v2868_v49  ;;  %v2930_v24 = vmul.f32 %v2929_v11, %v6959_v59  ;;  %v2878_v30 = vand.u32 2147483647, %v2868_v49 }
 0x384   : > { %v2941_v13 = vmul.f32 %v2940_v62, %v6959_v59  ;;  %v2889_v17 = vadd.f32 0.00028619796, %v2888_v15  ;;  %v1880_v61 = vmul.f32 %v7603_v42, %v6467_v5  ;;  %v2858_v21 = vmul.f32 %v2857_v46, %v6812_v58 }
 0x385   : > { %v2900_v29 = vadd.f32 0.001143296, %v2899_v37  ;;  %v2931_v45 = vadd.f32 0.0036580483, %v2930_v24  ;;  %v1843_v38 = vadd.f32 %v1811_v41, %v1773_v40  ;;  %v2881_v11 = vor.u32 1.1754944e-38, %v2880_v9  ;;  %v7606_v40 = vld [vmem:[#allocation50_spill] sm:$0xff] }
 0x386   : > { %v2942_v31 = vadd.f32 0.014752088, %v2941_v13  ;;  %v2890_v23 = vmul.f32 %v2889_v17, %v6971_v0  ;;  %vm2879_vm9 = vcmp.eq.f32.partialorder %v2878_v30, 8.507059e+37  ;;  %v2230_v58 = vsel %vm2199_vm14, %v2197_v32, %v2181_v50 }
 0x387   : > { %v3786_v36 = vpop.eup %3785  ;;  %v2901_v25 = vmul.f32 %v2900_v29, %v6971_v0  ;;  %v2932_v62 = vmul.f32 %v2931_v45, %v6959_v59  ;;  %v1918_v41 = vmul.f32 %v7606_v40, %v6704_v2  ;;  %v1920_v46 = vmul.f32 %v7606_v40, %v6711_v54  ;;  %v7607_v29 = vld [vmem:[#allocation46_spill] sm:$0xff]  ;;  %v7608_v45 = vld [vmem:[#allocation52_spill] sm:$0xff] }
 0x388   : > { %v2870_v3 = vmul.f32 %v3786_v36, %v2868_v49  ;;  %vm2875_vm7 = vweird.f32 %v3786_v36  ;;  %v2943_v5 = vmul.f32 %v2942_v31, %v6959_v59  ;;  %v2891_v15 = vadd.f32 0.0036580483, %v2890_v23 }
 0x389   : > { %vm6999_vm8 = vmor %vm2874_vm6, %vm2875_vm7  ;;  %v2902_v37 = vadd.f32 0.014752088, %v2901_v25  ;;  %v1882_v49 = vmul.f32 %v7603_v42, %v6476_v33  ;;  %v2933_v13 = vadd.f32 0.05243302, %v2932_v62  ;;  %v2165_v60 = vadd.f32 %v2085_v10, %v1843_v38 }
 0x38a   : > { %v2871_v26 = vsub.f32 1.0, %v2870_v3  ;;  %v2944_v9 = vadd.f32 0.112945676, %v2943_v5  ;;  %v2892_v32 = vmul.f32 %v2891_v15, %v6971_v0  ;;  %v1740_v42 = vmul.f32 %v7607_v29, %v6704_v2 }
 0x38b   : > { %v2903_v63 = vmul.f32 %v2902_v37, %v6971_v0  ;;  %v1988_v31 = vmul.f32 %v7608_v45, %v6936_v53  ;;  %v2053_v10 = vrot.slane %v6973_v19, 7  ;;  %v1952_v4 = vadd.f32 %v1920_v46, %v1882_v49 }
 0x38c   : > { %v2872_v7 = vmul.f32 %v3786_v36, %v2871_v26  ;;  %v2945_v50 = vmul.f32 %v2944_v9, %v6959_v59  ;;  %v2262_v26 = vmul.f32 %v5433_v14, %v2230_v58  ;;  %v2893_v2 = vadd.f32 0.05243302, %v2892_v32 }
 0x38d   : > { %v2904_v23 = vadd.f32 0.112945676, %v2903_v63  ;;  %v1772_v58 = vadd.f32 %v1740_v42, %v6987_v57  ;;  %v1810_v40 = vmul.f32 %v5348_v28, %v6936_v53 }
 0x38e   : > { %v2873_v3 = vadd.f32 %v3786_v36, %v2872_v7  ;;  %v1990_v7 = vmul.f32 %v7608_v45, %v6938_v55  ;;  %v2946_v25 = vadd.f32 0.4994258, %v2945_v50  ;;  %v2294_v15 = vadd.f32 %v2262_v26, %v2165_v60  ;;  %v3796_v60 = vld [vmem:[#allocation2 + $0xa0] sm:$0xff] }
 0x38f   : > { %v2905_v5 = vmul.f32 %v2904_v23, %v6971_v0  ;;  %v2894_v57 = vmul.f32 %v2893_v2, %v6971_v0  ;;  %v1842_v32 = vadd.f32 %v1810_v40, %v1772_v58 }
 0x390   : > { %v2877_v24 = vsel %vm6999_vm8, %v3786_v36, %v2873_v3  ;;  %v1950_v36 = vadd.f32 %v1918_v41, %v1880_v61  ;;  %v2947_v62 = vmul.f32 %v2946_v25, %v6959_v59  ;;  %v7609_v61 = vld [vmem:[#allocation56_spill] sm:$0xff]  ;;  %v7042_v9 = vadd.f32 %v1990_v7, %v1952_v4 }
 0x391   : > { %v2882_v17 = vsel %vm2879_vm9, %v2881_v11, %v2877_v24  ;;  %v2069_v11 = vrot.slane %v6975_v6, 7  ;;  %v2327_v3 = vadd.f32 %v7609_v61, %v6963_v48  ;;  %v7052_v53 = vadd.f32 %v7513_v20, %v2294_v15 }
 0x392   : > { %v2883_v30 = vmul.f32 %v2882_v17, %v2858_v21  ;;  %v2934_v21 = vmul.f32 %v2933_v13, %v6959_v59  ;;  %v7039_v49 = vadd.f32 %v1988_v31, %v1950_v36  ;;  %v2948_v41 = vadd.f32 1.0, %v2947_v62 }
 0x393   : > { %v2906_v13 = vadd.f32 0.4994258, %v2905_v5  ;;  %v2102_v48 = vsel %vm2070_vm13, %v2069_v11, %v2053_v10  ;;  %v1738_v17 = vmul.f32 %v7607_v29, %v6476_v33  ;;  %v2198_v20 = vrot.slane %v7042_v9, 1 }
 0x394   : > { %v3450_v38 = vclamps-f32 %v2883_v30, 1.0  ;;  %v2935_v24 = vadd.f32 0.18741608, %v2934_v21  ;;  %3787 = vrcp.f32 %v2948_v41  ;;  %v2132_v26 = vmul.f32 %v7509_v34, %v2102_v48 }
 0x395   : > { %v2907_v50 = vmul.f32 %v2906_v13, %v6971_v0  ;;  %v2182_v45 = vrot.slane %v7039_v49, 1  ;;  %v2895_v31 = vadd.f32 0.18741608, %v2894_v57  ;;  %v7063_v23 = vmul.f32 0.70710677, %v7052_v53 }
 0x396   : > { %v3018_v37 = vadd.f32 1.0, %v3450_v38  ;;  %v2936_v30 = vmul.f32 %v2935_v24, %v6959_v59  ;;  %v1808_v33 = vmul.f32 %v5348_v28, %v6711_v54  ;;  %v2958_v38 = vand.u32 2147483647, %v2948_v41 }
 0x397   : > { %v2908_v42 = vadd.f32 1.0, %v2907_v50  ;;  %v2966_v34 = vmul.f32 %v7063_v23, %v7063_v23  ;;  %v2960_v4 = vand.u32 2147483648, %v2948_v41  ;;  %v2164_v21 = vadd.f32 %v2132_v26, %v1842_v32 }
 0x398   : > { %v3034_v46 = vmul.f32 %v3018_v37, %v6966_v44  ;;  %v1700_v44 = vmul.f32 %v3796_v60, %v7553_v16  ;;  %v2937_v25 = vadd.f32 1.1283791, %v2936_v30  ;;  %v2215_v62 = vsel %vm2199_vm14, %v2182_v45, %v2198_v20 }
 0x399   : > { %3789 = vrcp.f32 %v2908_v42  ;;  %v2896_v2 = vmul.f32 %v2895_v31, %v6971_v0  ;;  %v7076_v5 = vmin.f32 %v2966_v34, 16.0  ;;  %vm2954_vm10 = vweird.f32 %v2948_v41 }
 0x39a   : > { %v3050_v63 = vmul.f32 %v3034_v46, %v2327_v3  ;;  %v1770_v36 = vadd.f32 %v1738_v17, %v1700_v44  ;;  %v3788_v7 = vpop.eup %3787  ;;  %v2084_v37 = vsel %vm2070_vm13, %v2051_v39, %v2067_v27  ;;  %v2229_v0 = vsel %vm2199_vm14, %v2196_v12, %v2180_v56 }
 0x39b   : > { %v2950_v59 = vmul.f32 %v3788_v7, %v2948_v41  ;;  %vm2955_vm11 = vweird.f32 %v3788_v7  ;;  %v2968_v58 = vmul.f32 2.1237322e-06, %v7076_v5  ;;  %v2979_v40 = vmul.f32 3.8918573e-05, %v7076_v5 }
 0x39c   : > { %3126 = vmatmul.f32.gmra.mxu2 %v3050_v63  ;;  %v1840_v3 = vadd.f32 %v1808_v33, %v1770_v36  ;;  %v2938_v46 = vmul.f32 %v2937_v25, %v6918_v35  ;;  %vm7093_vm12 = vcmp.eq.f32.partialorder %v2958_v38, 8.507059e+37  ;;  %v2961_v39 = vor.u32 1.1754944e-38, %v2960_v4  ;;  %vm7097_vm15 = vmor %vm2954_vm10, %vm2955_vm11 }
 0x39d   : > { %v2951_v15 = vsub.f32 1.0, %v2950_v59  ;;  %v2897_v43 = vadd.f32 1.1283791, %v2896_v2  ;;  %v2969_v56 = vadd.f32 0.00028619796, %v2968_v58  ;;  %vm2914_vm0 = vweird.f32 %v2908_v42 }
 0x39e   : > { %v2980_v12 = vadd.f32 0.001143296, %v2979_v40  ;;  %v2918_v13 = vand.u32 2147483647, %v2908_v42  ;;  %v2920_v48 = vand.u32 2147483648, %v2908_v42  ;;  %v2293_v60 = vadd.f32 %v2215_v62, %v2164_v21 }
 0x39f   : > { %v3790_v41 = vpop.eup %3789  ;;  %v2952_v51 = vmul.f32 %v3788_v7, %v2951_v15  ;;  %v2970_v35 = vmul.f32 %v2969_v56, %v7076_v5  ;;  %v2162_v17 = vadd.f32 %v2084_v37, %v1840_v3  ;;  %v2259_v36 = vmul.f32 %v5433_v14, %v2229_v0  ;;  %v3139_v56 = vld [vmem:[%s4550_s2] sm:$0xff] }
 0x3a0   : > { %v2910_v22 = vmul.f32 %v3790_v41, %v2908_v42  ;;  %vm2915_vm1 = vweird.f32 %v3790_v41  ;;  %v2981_v63 = vmul.f32 %v2980_v12, %v7076_v5  ;;  %v2898_v33 = vmul.f32 %v2897_v43, %v6943_v1 }
 0x3a1   : > { %v2953_v24 = vadd.f32 %v3788_v7, %v2952_v51  ;;  %v2971_v26 = vadd.f32 0.0036580483, %v2970_v35  ;;  %vm2916_vm2 = vmor %vm2914_vm0, %vm2915_vm1  ;;  %v2921_v34 = vor.u32 1.1754944e-38, %v2920_v48  ;;  %vm2919_vm3 = vcmp.eq.f32.partialorder %v2918_v13, 8.507059e+37  ;;  %v3797_v13 = vld [vmem:[#allocation2 + $0xe8] sm:$0xff] }
 0x3a2   : > { %v2911_v57 = vsub.f32 1.0, %v2910_v22  ;;  %v2982_v30 = vadd.f32 0.014752088, %v2981_v63  ;;  %v2348_v38 = vmul.f32 0.5, %v6897_v47  ;;  %v2331_v2 = vadd.f32 %v7609_v61, %v2293_v60  ;;  %v7119_v47 = vld [vmem:[%s7614_s3] ss:$0 sm:$0xff] }
 0x3a3   : > { %v2957_v44 = vsel %vm7097_vm15, %v3788_v7, %v2953_v24  ;;  %v2972_v59 = vmul.f32 %v2971_v26, %v7076_v5  ;;  %v2291_v1 = vadd.f32 %v2259_v36, %v2162_v17  ;;  %v2347_v40 = vmul.f32 0.5, %v6921_v8  ;;  %v3140_v17 = vld [vmem:[%s4550_s2 + $0x8] sm:$0xff]  ;;  %s4058_s3 = scalar_lea.hbm %s7618_s12, 512 }
 0x3a4   : > { %v2962_v50 = vsel %vm7093_vm12, %v2961_v39, %v2957_v44  ;;  %v2912_v32 = vmul.f32 %v3790_v41, %v2911_v57  ;;  %v2983_v7 = vmul.f32 %v2982_v30, %v7076_v5  ;;  %v1704_v48 = vmul.f32 %v3797_v13, %v7553_v16  ;;  %v3147_v13 = vld [vmem:[%s4550_s2 + $0x40] sm:$0xff]  ;;  %p4060_p2 = scmp.lt.s32.totalorder %s4058_s3, %s4054_s15 }
 0x3a5   : > { %v2963_v31 = vmul.f32 %v2962_v50, %v2938_v46  ;;  %v2973_v37 = vadd.f32 0.05243302, %v2972_v59  ;;  %v2329_v39 = vadd.f32 %v7609_v61, %v2291_v1  ;;  %v1742_v63 = vmul.f32 %v7607_v29, %v6711_v54 }
 0x3a6   : > { %v2913_v25 = vadd.f32 %v3790_v41, %v2912_v32  ;;  %v2984_v62 = vadd.f32 0.112945676, %v2983_v7  ;;  %v1812_v32 = vmul.f32 %v5348_v28, %v6938_v55  ;;  %v2086_v29 = vsel %vm2070_vm13, %v2053_v10, %v2069_v11  ;;  %p4061_p4 = por %p4060_p2, %p4059_p11 }
 0x3a7   : > { %v3452_v4 = vclamps-f32 %v2963_v31, 1.0  ;;  %v2974_v43 = vmul.f32 %v2973_v37, %v7076_v5  ;;  %v1774_v50 = vadd.f32 %v1742_v63, %v1704_v48  ;;  %v2231_v6 = vsel %vm2199_vm14, %v2198_v20, %v2182_v45  ;;  %v3148_v63 = vld [vmem:[%s4550_s2 + $0x48] sm:$0xff] }
 0x3a8   : > { %v2917_v21 = vsel %vm2916_vm2, %v3790_v41, %v2913_v25  ;;  %v2985_v0 = vmul.f32 %v2984_v62, %v7076_v5  ;;  %v3091_v41 = vpop.f32.mrf.mxu2  ;;  %v3141_v25 = vld [vmem:[%s4550_s2 + $0x10] sm:$0xff]  ;;  %v2263_v7 = vmul.f32 %v5433_v14, %v2231_v6  ;;  %p4062_p5 = pnand %p4061_p4, %p4057_p8 }
 0x3a9   : > { %v3020_v15 = vadd.f32 1.0, %v3452_v4  ;;  %v2922_v3 = vsel %vm2919_vm3, %v2921_v34, %v2917_v21  ;;  %v3092_v8 = vadd.f32 %v7119_v47, %v3091_v41  ;;  %v2975_v60 = vadd.f32 0.18741608, %v2974_v43 }
 0x3aa   : > { %v2923_v42 = vmul.f32 %v2922_v3, %v2898_v33  ;;  %v2986_v51 = vadd.f32 0.4994258, %v2985_v0  ;;  %v1844_v54 = vadd.f32 %v1812_v32, %v1774_v50  ;;  %v2349_v21 = vmul.f32 0.5, %v7052_v53  ;;  %v3143_v53 = vld [vmem:[%s4550_s2 + $0x20] sm:$0xff]  ;;  %v3149_v50 = vld [vmem:[%s4550_s2 + $0x50] sm:$0xff] }
 0x3ab   : > { %v3036_v58 = vmul.f32 %v3020_v15, %v2348_v38  ;;  %v3155_v57 = vadd.f32 %v3139_v56, %v3092_v8  ;;  %v2976_v26 = vmul.f32 %v2975_v60, %v7076_v5  ;;  %v3142_v15 = vld [vmem:[%s4550_s2 + $0x18] sm:$0xff] }
 0x3ac   : > { %v3451_v46 = vclamps-f32 %v2923_v42, 1.0  ;;  %v2987_v22 = vmul.f32 %v2986_v51, %v7076_v5  ;;  %v2166_v59 = vadd.f32 %v2086_v29, %v1844_v54  ;;  %v3146_v56 = vld [vmem:[%s4550_s2 + $0x38] sm:$0xff]  ;;  %v3151_v29 = vld [vmem:[%s4550_s2 + $0x60] sm:$0xff] }
 0x3ad   : > { %v3052_v18 = vmul.f32 %v3036_v58, %v2331_v2  ;;  %3171 = vst [vmem:[%s5226_s27] sm:$0xff] %v3155_v57  ;;  %v2977_v33 = vadd.f32 1.1283791, %v2976_v26 }
 0x3ae   : > { %v3019_v27 = vadd.f32 1.0, %v3451_v46  ;;  %v2988_v24 = vadd.f32 1.0, %v2987_v22  ;;  %v2295_v45 = vadd.f32 %v2263_v7, %v2166_v59  ;;  %v3154_v7 = vld [vmem:[%s4550_s2 + $0x78] sm:$0xff] }
 0x3af   : > { %3132 = vmatmul.f32.vlgmr.msra.gmra.mxu3 %v3052_v18  ;;  %v2978_v38 = vmul.f32 %v2977_v33, %v7063_v23 }
 0x3b0   : > { %v3035_v12 = vmul.f32 %v3019_v27, %v2347_v40  ;;  %3791 = vrcp.f32 %v2988_v24  ;;  %v3094_v44 = vpop.f32.mrf.mxu2  ;;  %v3000_v34 = vand.u32 2147483648, %v2988_v24  ;;  %vm2994_vm4 = vweird.f32 %v2988_v24 }
 0x3b1   : > { %v3095_v16 = vadd.f32 %v7119_v47, %v3094_v44  ;;  %v2998_v55 = vand.u32 2147483647, %v2988_v24  ;;  %v2333_v23 = vadd.f32 %v7609_v61, %v2295_v45  ;;  %v3144_v61 = vld [vmem:[%s4550_s2 + $0x28] sm:$0xff] }
 0x3b2   : > { %v3051_v35 = vmul.f32 %v3035_v12, %v2329_v39  ;;  %v3001_v10 = vor.u32 1.1754944e-38, %v3000_v34  ;;  %v3145_v39 = vld [vmem:[%s4550_s2 + $0x30] sm:$0xff] }
 0x3b3   : > { %v3156_v31 = vadd.f32 %v3140_v17, %v3095_v16  ;;  %vm2999_vm6 = vcmp.eq.f32.partialorder %v2998_v55, 8.507059e+37  ;;  %v3153_v55 = vld [vmem:[%s4550_s2 + $0x70] sm:$0xff] }
 0x3b4   : > { %3129 = vmatmul.f32.gmra.mxu2 %v3051_v35 }
 0x3b5   : > { %3172 = vst [vmem:[%s5226_s27 + $0x8] sm:$0xff] %v3156_v31 }
 0x3b6   : > { %v3792_v30 = vpop.eup %3791 }
 0x3b7   : > { %v2990_v36 = vmul.f32 %v3792_v30, %v2988_v24  ;;  %vm2995_vm5 = vweird.f32 %v3792_v30 }
 0x3b8   : > { %v3097_v19 = vpop.f32.mrf.mxu2  ;;  %vm2996_vm13 = vmor %vm2994_vm4, %vm2995_vm5 }
 0x3b9   : > { %v2991_v28 = vsub.f32 1.0, %v2990_v36  ;;  %v3098_v11 = vadd.f32 %v7119_v47, %v3097_v19 }
 0x3bb   : > { %v2992_v5 = vmul.f32 %v3792_v30, %v2991_v28  ;;  %v3157_v9 = vadd.f32 %v3141_v25, %v3098_v11  ;;  %v3152_v25 = vld [vmem:[%s4550_s2 + $0x68] sm:$0xff] }
 0x3bd   : > { %v2993_v49 = vadd.f32 %v3792_v30, %v2992_v5  ;;  %3173 = vst [vmem:[%s5226_s27 + $0x10] sm:$0xff] %v3157_v9 }
 0x3bf   : > { %v2997_v52 = vsel %vm2996_vm13, %v3792_v30, %v2993_v49  ;;  %v3150_v30 = vld [vmem:[%s4550_s2 + $0x58] sm:$0xff] }
 0x3c0   : > { %v3002_v4 = vsel %vm2999_vm6, %v3001_v10, %v2997_v52  ;;  %v3100_v2 = vpop.f32.mrf.mxu2 }
 0x3c1   : > { %v3003_v20 = vmul.f32 %v3002_v4, %v2978_v38  ;;  %v3101_v14 = vadd.f32 %v7119_v47, %v3100_v2 }
 0x3c3   : > { %v3453_v62 = vclamps-f32 %v3003_v20, 1.0  ;;  %v3158_v1 = vadd.f32 %v3142_v15, %v3101_v14 }
 0x3c5   : > { %v3021_v3 = vadd.f32 1.0, %v3453_v62  ;;  %3174 = vst [vmem:[%s5226_s27 + $0x18] sm:$0xff] %v3158_v1 }
 0x3c7   : > { %v3037_v42 = vmul.f32 %v3021_v3, %v2349_v21 }
 0x3c8   : > { %v3103_v0 = vpop.f32.mrf.mxu2 }
 0x3c9   : > { %v3053_v37 = vmul.f32 %v3037_v42, %v2333_v23  ;;  %v3104_v58 = vadd.f32 %v7119_v47, %v3103_v0 }
 0x3cb   : > { %3135 = vmatmul.f32.gmra.mxu3 %v3053_v37  ;;  %v3159_v40 = vadd.f32 %v3143_v53, %v3104_v58 }
 0x3cd   : > { %3175 = vst [vmem:[%s5226_s27 + $0x20] sm:$0xff] %v3159_v40 }
 0x3d0   : > { %v3106_v46 = vpop.f32.mrf.mxu2 }
 0x3d1   : > { %v3107_v51 = vadd.f32 %v7119_v47, %v3106_v46 }
 0x3d3   : > { %v3160_v18 = vadd.f32 %v3144_v61, %v3107_v51 }
 0x3d5   : > { %3176 = vst [vmem:[%s5226_s27 + $0x28] sm:$0xff] %v3160_v18 }
 0x3d8   : > { %v3109_v41 = vpop.f32.mrf.mxu2 }
 0x3d9   : > { %v3110_v27 = vadd.f32 %v7119_v47, %v3109_v41 }
 0x3db   : > { %v3161_v43 = vadd.f32 %v3145_v39, %v3110_v27 }
 0x3dd   : > { %3177 = vst [vmem:[%s5226_s27 + $0x30] sm:$0xff] %v3161_v43 }
 0x3e0   : > { %v3112_v22 = vpop.f32.mrf.mxu2 }
 0x3e1   : > { %v3113_v8 = vadd.f32 %v7119_v47, %v3112_v22 }
 0x3e3   : > { %v3162_v12 = vadd.f32 %v3146_v56, %v3113_v8 }
 0x3e5   : > { %3178 = vst [vmem:[%s5226_s27 + $0x38] sm:$0xff] %v3162_v12 }
 0x3e8   : > { %v3115_v24 = vpop.f32.mrf.mxu2 }
 0x3e9   : > { %v3116_v48 = vadd.f32 %v7119_v47, %v3115_v24 }
 0x3eb   : > { %v3163_v57 = vadd.f32 %v3147_v13, %v3116_v48 }
 0x3ed   : > { %3179 = vst [vmem:[%s5226_s27 + $0x40] sm:$0xff] %v3163_v57 }
 0x3f0   : > { %v3118_v35 = vpop.f32.mrf.mxu2 }
 0x3f1   : > { %v3119_v60 = vadd.f32 %v7119_v47, %v3118_v35 }
 0x3f3   : > { %v3164_v44 = vadd.f32 %v3148_v63, %v3119_v60 }
 0x3f5   : > { %3180 = vst [vmem:[%s5226_s27 + $0x48] sm:$0xff] %v3164_v44 }
 0x3f8   : > { %v3121_v17 = vpop.f32.mrf.mxu2 }
 0x3f9   : > { %v3122_v32 = vadd.f32 %v7119_v47, %v3121_v17 }
 0x3fb   : > { %v3165_v26 = vadd.f32 %v3149_v50, %v3122_v32 }
 0x3fd   : > { %3181 = vst [vmem:[%s5226_s27 + $0x50] sm:$0xff] %v3165_v26 }
 0x400   : > { %v3124_v16 = vpop.f32.mrf.mxu2 }
 0x401   : > { %v3125_v31 = vadd.f32 %v7119_v47, %v3124_v16 }
 0x403   : > { %v3166_v36 = vadd.f32 %v3150_v30, %v3125_v31 }
 0x405   : > { %3182 = vst [vmem:[%s5226_s27 + $0x58] sm:$0xff] %v3166_v36 }
 0x41f   : > { %v3127_v54 = vpop.f32.mrf.mxu2 }
 0x420   : > { %v3128_v33 = vadd.f32 %v7119_v47, %v3127_v54 }
 0x422   : > { %v3167_v34 = vadd.f32 %v3151_v29, %v3128_v33 }
 0x424   : > { %3183 = vst [vmem:[%s5226_s27 + $0x60] sm:$0xff] %v3167_v34 }
 0x432   : > { %v3133_v28 = vpop.f32.mrf.mxu3 }
 0x433   : > { %v3134_v6 = vadd.f32 %v7119_v47, %v3133_v28 }
 0x435   : > { %v3169_v5 = vadd.f32 %v3153_v55, %v3134_v6 }
 0x437   : > { %3185 = vst [vmem:[%s5226_s27 + $0x70] sm:$0xff] %v3169_v5  ;;  %v3130_v19 = vpop.f32.mrf.mxu2 }
 0x438   : > { %v3131_v59 = vadd.f32 %v7119_v47, %v3130_v19 }
 0x43a   : > { %v3168_v10 = vadd.f32 %v3152_v25, %v3131_v59 }
 0x43c   : > { %3184 = vst [vmem:[%s5226_s27 + $0x68] sm:$0xff] %v3168_v10 }
 0x44e   : > { %v3136_v11 = vpop.f32.mrf.mxu3 }
 0x44f   : > { %v3137_v38 = vadd.f32 %v7119_v47, %v3136_v11 }
 0x451   : > { %v3170_v49 = vadd.f32 %v3154_v7, %v3137_v38 }
 0x453   : > { %3186 = vst [vmem:[%s5226_s27 + $0x78] sm:$0xff] %v3170_v49 }
 0x454   : > { %4065 = shalt.err (!%p4062_p5)
}
 0x455   : > { %s4218_s0 = smov 128   ;;  %s4219_s27 = smov 8  }
 0x456   : > { %3543 = dma.vmem_to_hbm [thread:$0]  (%p4407_p0), %s3204_s19, 2048, %s3206_s18, %s3188_s4, %s4218_s0, %s4218_s0, %s4219_s27  }
 0x457 PF: > { %s7620_s26 = sld [smem:[#allocation28_spill]]  ;;  %p3586_p12 = scmp.ge.s32.totalorder %s4204_s30, 2 }
 0x459   : > { %p3572_p7 = pnand %p3586_p12, %p4416_p6 }
 0x45b   : > { %p3573_p10 = pneg %p3572_p7 }
 0x45d   : > { %s3220_s14 = sand.u32 1, %s7620_s26  }
 0x45e   : > { %s3221_s17 = scalar_lea.sflag [#allocation5], %s3220_s14 }
 0x45f   : > { %4147 = dma.done.wait (%p3573_p10), %s3221_s17, 2048  }
 0x460   : > { %4149 = vsyncadd (%p3573_p10), %s3221_s17, 4294965248  ;;  %s33_s30 = sadd.s32 1, %s4204_s30   ;;  %s7623_s17 = sld [smem:[#allocation26_spill]] }
 0x461   : > { %p7217_p1 = scmp.ge.s32.totalorder %s33_s30, 6   ;;  %s7624_s18 = sld [smem:[#allocation27_spill]] }
 0x462   : > { %s7625_s10 = sld [smem:[#allocation29_spill]]  ;;  %s7626_s11 = smov %s4422_s20 }
 0x463   : > { %s7627_s27 = sld [smem:[#allocation32_spill]]  ;;  %s7630_s19 = smov %s7655_s23 }
 0x464   : > { %s7628_s29 = sld [smem:[#allocation34_spill]]  ;;  %s7632_s21 = smov %s4172_s22 }
 0x465   : > { %s7629_s1 = sld [smem:[#allocation35_spill]]  ;;  %s7633_s22 = smov %s7626_s11 }
 0x466   : > { %s7634_s23 = smov %s4180_s24  ;;  %s7635_s24 = smov %s4184_s25 }
 0x467   : > { %s7636_s25 = smov %s4486_s8  ;;  %s7637_s26 = smov %s4196_s28 }
 0x468   : > { %s7631_s20 = smov %s7625_s10  ;;  %32 = sbr.rel (!%p7217_p1) target bundleno = 28 (0x1c), region = 164 }
 0x46a   : > { %s7638_s28 = smov %s7628_s29 }
 0x46b   : > { %s7639_s29 = smov %s7629_s1 }
 0x46d   :  { %3227 = vsyncpa [#allocation4], 1 }
 0x46e   :  { %3229 = vsyncpa [#allocation4 + $0x1], 1 }
 0x46f   :  { %3230 = vsyncpa [#allocation7], 1 }
 0x470   :  { %3232 = vsyncpa [#allocation7 + $0x1], 1 }
 0x471   :  { %3233 = vsyncpa [#allocation10], 1 }
 0x472   :  { %3234 = vsyncpa [#allocation13], 1 }
 0x473   :  { %3235 = vsyncpa [#allocation16], 1 }
 0x474   :  { %3236 = vsyncpa [#allocation5], 1 }
 0x475   :  { %3238 = vsyncpa [#allocation5 + $0x1], 1 }

</bundles_post_ra>
